<compile_context>
chip_gen: v6e
topology: v6e:2x2x1
jax: 0.10.0
libtpu: 0.0.40
codegen_flags: <defaults>
</compile_context>

<pallas_src>
import math
import functools

import jax
import jax.numpy as jnp
from jax.experimental import pallas as pl
from jax.experimental.pallas import tpu as pltpu


def _pick_vmem_limit():
    # Generation-keyed scoped-VMEM budget: ~96 MiB on v5e/v6e (128 MiB VMEM),
    # ~48 MiB on v7x (64 MiB VMEM). Falls back to a v7x-safe value.
    try:
        cap = int(pltpu.get_tpu_info().vmem_capacity_bytes)
        return min((cap * 3) // 4, 100 * 1024 * 1024)
    except Exception:
        return 48 * 1024 * 1024


VMEM_LIMIT_BYTES = _pick_vmem_limit()


def _compiler_params(dim_semantics):
    return pltpu.CompilerParams(dimension_semantics=dim_semantics,
                                vmem_limit_bytes=VMEM_LIMIT_BYTES)


# ----------------------------------------------------------------------------
# Kernels
# ----------------------------------------------------------------------------
def make_bilstm_kernel(T, Bc, H):
    """Fused fwd+bwd LSTM over the whole sequence for one batch chunk.

    x_ref:   (T, Bc, Din)  bf16  layer input (time-major)
    wih_ref: (Din, 8H)     bf16  [fwd | bwd] input->gate weights (pre-transposed)
    b_ref:   (1, 8H)       f32   (b_ih + b_hh) for both directions
    whh_ref: (2H, 8H)      bf16  block-diagonal [fwd | bwd] hidden->gate weights
    y_ref:   (T, Bc, 2H)   bf16  [h_fwd | h_bwd] per time step
    gx_ref:  (T, Bc, 8H)   f32   scratch: precomputed x @ W_ih + b
    """
    H4 = 4 * H

    def bilstm_kernel(x_ref, wih_ref, b_ref, whh_ref, y_ref, gx_ref):
        wih = wih_ref[...]
        bias = b_ref[...]
        whh = whh_ref[...]

        # Prologue: input->gates for the whole chunk, kept in VMEM (gate slab
        # never touches HBM).
        def precompute(t, carry):
            gx_ref[t] = (jnp.dot(x_ref[t], wih,
                                 preferred_element_type=jnp.float32) + bias)
            return carry

        jax.lax.fori_loop(0, T, precompute, 0, unroll=min(T, 8))

        def cell(g, c_prev):
            i = jax.nn.sigmoid(g[:, 0 * H:1 * H])
            f = jax.nn.sigmoid(g[:, 1 * H:2 * H])
            gg = jnp.tanh(g[:, 2 * H:3 * H])
            o = jax.nn.sigmoid(g[:, 3 * H:4 * H])
            c = f * c_prev + i * gg
            h = o * jnp.tanh(c)
            return h, c

        def step(s, carry):
            h_cat, c_f, c_b = carry                      # (Bc,2H), (Bc,H), (Bc,H)
            t_b = T - 1 - s
            # Single MXU push for BOTH directions (block-diagonal whh).
            g_hh = jnp.dot(h_cat.astype(whh.dtype), whh,
                           preferred_element_type=jnp.float32)        # (Bc, 8H)
            g_f = gx_ref[s][:, 0:H4] + g_hh[:, 0:H4]
            g_b = gx_ref[t_b][:, H4:2 * H4] + g_hh[:, H4:2 * H4]
            h_f, c_f = cell(g_f, c_f)
            h_b, c_b = cell(g_b, c_b)
            y_ref[s, :, 0:H] = h_f.astype(y_ref.dtype)
            y_ref[t_b, :, H:2 * H] = h_b.astype(y_ref.dtype)
            return jnp.concatenate([h_f, h_b], axis=-1), c_f, c_b

        h0 = jnp.zeros((Bc, 2 * H), jnp.float32)
        c0 = jnp.zeros((Bc, H), jnp.float32)
        jax.lax.fori_loop(0, T, step, (h0, c0, c0),
                          unroll=(T if T <= 16 else 8))

    return bilstm_kernel


def make_mha_kernel(T, num_heads):
    """Self-attention over time for ONE batch element (grid over batch).

    x_ref: (1, T, E) bf16; wqkv_ref: (E, 3E) bf16 (scale folded into Q);
    bqkv_ref: (1, 3E) f32; wo_ref: (E, E) bf16; bo_ref: (1, E) f32;
    o_ref: (1, T, E) bf16.
    """
    def mha_kernel(x_ref, wqkv_ref, bqkv_ref, wo_ref, bo_ref, o_ref):
        E = x_ref.shape[-1]
        hd = E // num_heads
        x = x_ref[0]                                               # (T, E)
        qkv = (jnp.dot(x, wqkv_ref[...], preferred_element_type=jnp.float32)
               + bqkv_ref[...])                                    # (T, 3E) f32

        # TODO(synk): for long T, switch to flash-style q/kv tiling with online
        # softmax instead of materializing the (T, T) scores per head.
        ctx_heads = []
        for h in range(num_heads):
            q = qkv[:, h * hd:(h + 1) * hd].astype(jnp.bfloat16)   # pre-scaled
            k = qkv[:, E + h * hd:E + (h + 1) * hd].astype(jnp.bfloat16)
            v = qkv[:, 2 * E + h * hd:2 * E + (h + 1) * hd].astype(jnp.bfloat16)
            s = jnp.einsum('qd,kd->qk', q, k,
                           preferred_element_type=jnp.float32)     # (T, T)
            s = s - jnp.max(s, axis=-1, keepdims=True)
            p = jnp.exp(s)
            p = p / jnp.sum(p, axis=-1, keepdims=True)             # exact softmax
            ctx_heads.append(jnp.dot(p.astype(jnp.bfloat16), v,
                                     preferred_element_type=jnp.float32))
        ctx = jnp.concatenate(ctx_heads, axis=-1)                  # (T, E)
        # One full-depth output projection instead of num_heads K=hd dots.
        out = (jnp.dot(ctx.astype(jnp.bfloat16), wo_ref[...],
                       preferred_element_type=jnp.float32) + bo_ref[...])
        o_ref[0] = out.astype(o_ref.dtype)

    return mha_kernel


def fused_fc_kernel(x1_ref, x2_ref, w1_ref, w2_ref, b_ref, o_ref):
    """logits tile = x1 @ w1 + x2 @ w2 + b (folds the [rnn_out, ctx] concat)."""
    acc = jnp.dot(x1_ref[...], w1_ref[...], preferred_element_type=jnp.float32)
    acc = acc + jnp.dot(x2_ref[...], w2_ref[...], preferred_element_type=jnp.float32)
    o_ref[...] = (acc + b_ref[...]).astype(o_ref.dtype)


# ----------------------------------------------------------------------------
# Wrappers (pallas_call plumbing)
# ----------------------------------------------------------------------------
def bilstm_layer(x_tbd, lp):
    """x_tbd: (T, B, Din) bf16 -> (T, B, 2H) bf16."""
    T, B, Din = x_tbd.shape
    H = lp["whh_bd"].shape[0] // 2
    Bc = 8 if (B % 8 == 0) else B      # batch-chunk grid axis (megacore on v7x)
    grid = (B // Bc,)
    # TODO(synk): for very long T, additionally chunk the time axis with h/c
    # carried in VMEM scratch so the gates slab stays within v7x's 64 MiB VMEM.
    return pl.pallas_call(
        make_bilstm_kernel(T, Bc, H),
        out_shape=jax.ShapeDtypeStruct((T, B, 2 * H), jnp.bfloat16),
        grid_spec=pltpu.PrefetchScalarGridSpec(
            num_scalar_prefetch=0,
            grid=grid,
            in_specs=[
                pl.BlockSpec((T, Bc, Din), lambda i: (0, i, 0)),
                pl.BlockSpec((Din, 8 * H), lambda i: (0, 0)),
                pl.BlockSpec((1, 8 * H), lambda i: (0, 0)),
                pl.BlockSpec((2 * H, 8 * H), lambda i: (0, 0)),
            ],
            out_specs=pl.BlockSpec((T, Bc, 2 * H), lambda i: (0, i, 0)),
            scratch_shapes=[pltpu.VMEM((T, Bc, 8 * H), jnp.float32)],
        ),
        compiler_params=_compiler_params(("parallel",)),
    )(x_tbd, lp["wih_t"], lp["b"], lp["whh_bd"])


def multihead_self_attention(x_bte, p, num_heads):
    """x_bte: (B, T, E) bf16 -> (B, T, E) bf16. Grid over batch (parallel)."""
    B, T, E = x_bte.shape
    return pl.pallas_call(
        make_mha_kernel(T, num_heads),
        out_shape=jax.ShapeDtypeStruct((B, T, E), jnp.bfloat16),
        grid_spec=pltpu.PrefetchScalarGridSpec(
            num_scalar_prefetch=0,
            grid=(B,),
            in_specs=[
                pl.BlockSpec((1, T, E), lambda b: (b, 0, 0)),
                pl.BlockSpec((E, 3 * E), lambda b: (0, 0)),
                pl.BlockSpec((1, 3 * E), lambda b: (0, 0)),
                pl.BlockSpec((E, E), lambda b: (0, 0)),
                pl.BlockSpec((1, E), lambda b: (0, 0)),
            ],
            out_specs=pl.BlockSpec((1, T, E), lambda b: (b, 0, 0)),
        ),
        compiler_params=_compiler_params(("parallel",)),
    )(x_bte, p["wqkv_t"], p["bqkv"], p["wo_t"], p["bo"])


def fused_fc(x1, x2, w1_t, w2_t, b, *, tn_max=1024, tv_max=512):
    """logits = x1 @ w1_t + x2 @ w2_t + b.

    Grid is (vocab, rows) with rows innermost so each (K, tv) weight tile is
    streamed from HBM exactly once (the vocab projection is memory-bound).
    """
    N, K = x1.shape
    V = w1_t.shape[1]
    tn = N if N <= tn_max else tn_max
    tv = V if V <= tv_max else tv_max
    grid = (pl.cdiv(V, tv), pl.cdiv(N, tn))
    return pl.pallas_call(
        fused_fc_kernel,
        out_shape=jax.ShapeDtypeStruct((N, V), jnp.float32),
        grid_spec=pltpu.PrefetchScalarGridSpec(
            num_scalar_prefetch=0,
            grid=grid,
            in_specs=[
                pl.BlockSpec((tn, K), lambda v, n: (n, 0)),
                pl.BlockSpec((tn, K), lambda v, n: (n, 0)),
                pl.BlockSpec((K, tv), lambda v, n: (0, v)),
                pl.BlockSpec((K, tv), lambda v, n: (0, v)),
                pl.BlockSpec((1, tv), lambda v, n: (0, v)),
            ],
            out_specs=pl.BlockSpec((tn, tv), lambda v, n: (n, v)),
        ),
        compiler_params=_compiler_params(("parallel", "parallel")),
    )(x1, x2, w1_t, w2_t, b)


# ----------------------------------------------------------------------------
# Model: parameter init + forward
# ----------------------------------------------------------------------------
def init_params(key, vocab_size, embedding_size, hidden_size, n_layers,
                num_heads, pad_token):
    """Weights stored pre-transposed / pre-stacked / bf16 for the kernels."""
    keys = iter(jax.random.split(key, 128))

    def u(shape, scale=0.1):
        return jax.random.uniform(next(keys), shape, jnp.float32, -scale, scale)

    bf16 = jnp.bfloat16
    emb = u((vocab_size, embedding_size)).at[pad_token].set(0.0).astype(bf16)

    H = hidden_size
    lstm = []
    for layer in range(n_layers):
        d_in = embedding_size if layer == 0 else 2 * H
        w_ih_f, w_ih_b = u((4 * H, d_in)), u((4 * H, d_in))       # PyTorch layout
        w_hh_f, w_hh_b = u((4 * H, H)), u((4 * H, H))
        b_f = u((1, 4 * H)) + u((1, 4 * H))                        # b_ih + b_hh
        b_b = u((1, 4 * H)) + u((1, 4 * H))
        whh_bd = jnp.zeros((2 * H, 8 * H), jnp.float32)
        whh_bd = whh_bd.at[:H, :4 * H].set(w_hh_f.T)               # fwd block
        whh_bd = whh_bd.at[H:, 4 * H:].set(w_hh_b.T)               # bwd block
        lstm.append(dict(
            wih_t=jnp.concatenate([w_ih_f.T, w_ih_b.T], axis=1).astype(bf16),
            whh_bd=whh_bd.astype(bf16),                            # (2H, 8H)
            b=jnp.concatenate([b_f, b_b], axis=1),                 # (1, 8H) f32
        ))

    E2 = 2 * H
    hd = E2 // num_heads
    scale = 1.0 / math.sqrt(hd)
    wq, wk, wv, wo = u((E2, E2)), u((E2, E2)), u((E2, E2)), u((E2, E2))
    bq, bk, bv, bo = u((1, E2)), u((1, E2)), u((1, E2)), u((1, E2))
    mha = dict(
        wqkv_t=jnp.concatenate([wq.T * scale, wk.T, wv.T], axis=1).astype(bf16),
        bqkv=jnp.concatenate([bq * scale, bk, bv], axis=1),        # (1, 3E2) f32
        wo_t=wo.T.astype(bf16),                                    # (E2, E2)
        bo=bo,                                                     # (1, E2) f32
    )

    fc_w = u((vocab_size, 4 * H))                      # PyTorch (V, 4H) layout
    fc = dict(w1_t=fc_w[:, :E2].T.astype(bf16),        # applies to rnn_out
              w2_t=fc_w[:, E2:].T.astype(bf16),        # applies to attention ctx
              b=u((1, vocab_size)))                    # f32

    return dict(emb=emb, lstm=lstm, mha=mha, fc=fc)


@functools.partial(jax.jit, static_argnames=("num_heads",))
def forward(params, tokens, *, num_heads):
    """tokens: (B, T) int32 -> logits (B, T, vocab) float32."""
    # Time-major embedding gather (folds the (B,T)->(T,B) transpose into the
    # token indices; avoids an activation-sized HBM transpose).
    x = jnp.take(params["emb"], tokens.T, axis=0)            # (T, B, E) bf16

    for lp in params["lstm"]:
        x = bilstm_layer(x, lp)                              # (T, B, 2H) bf16
    rnn_bt = jnp.transpose(x, (1, 0, 2))                     # (B, T, 2H) bf16

    ctx_bt = multihead_self_attention(rnn_bt, params["mha"], num_heads)

    B, T, E2 = rnn_bt.shape
    logits = fused_fc(rnn_bt.reshape(B * T, E2), ctx_bt.reshape(B * T, E2),
                      params["fc"]["w1_t"], params["fc"]["w2_t"],
                      params["fc"]["b"])
    V = params["fc"]["b"].shape[-1]
    return logits.reshape(B, T, V)


# ----------------------------------------------------------------------------
if __name__ == "__main__":
    vocab_size = 32
    embedding_size = 16
    hidden_size = 32
    n_layers = 2
    num_heads = 2
    pad_token = 22
    B, T = 2, 8

    key = jax.random.PRNGKey(0)
    k_params, k_tokens = jax.random.split(key)

    params = init_params(k_params, vocab_size, embedding_size, hidden_size,
                         n_layers, num_heads, pad_token)
    tokens = jax.random.randint(k_tokens, (B, T), 0, vocab_size, dtype=jnp.int32)
    tokens = tokens.at[0, -1].set(pad_token)   # exercise the padding row

    logits = forward(params, tokens, num_heads=num_heads)
    logits = jax.block_until_ready(logits)

    assert logits.shape == (B, T, vocab_size), logits.shape
    assert bool(jnp.all(jnp.isfinite(logits))), "non-finite logits"
    print("KERNEL_OK")
</pallas_src>

<mosaic_0001>
module attributes {stable_mosaic.version = 11 : i64} {
  func.func @mha_kernel(%arg0: i32, %arg1: memref<1x8x64xbf16, #tpu.memory_space<vmem>>, %arg2: memref<64x192xbf16, #tpu.memory_space<vmem>>, %arg3: memref<1x192xf32, #tpu.memory_space<vmem>>, %arg4: memref<64x64xbf16, #tpu.memory_space<vmem>>, %arg5: memref<1x64xf32, #tpu.memory_space<vmem>>, %arg6: memref<1x8x64xbf16, #tpu.memory_space<vmem>>) attributes {dimension_semantics = [#tpu.dimension_semantics<parallel>], iteration_bounds = array<i64: 2>, scalar_prefetch = 0 : i64, scratch_operands = 0 : i64, tpu.core_type = #tpu.core_type<tc>, window_params = [{transform_indices = @transform_0, window_bounds = array<i64: 1, 8, 64>}, {pipeline_mode = #tpu.pipeline_mode<synchronous>, transform_indices = @transform_1, window_bounds = array<i64: 64, 192>}, {pipeline_mode = #tpu.pipeline_mode<synchronous>, transform_indices = @transform_2, window_bounds = array<i64: 1, 192>}, {pipeline_mode = #tpu.pipeline_mode<synchronous>, transform_indices = @transform_3, window_bounds = array<i64: 64, 64>}, {pipeline_mode = #tpu.pipeline_mode<synchronous>, transform_indices = @transform_4, window_bounds = array<i64: 1, 64>}, {transform_indices = @transform_5, window_bounds = array<i64: 1, 8, 64>}]} {
    %c0 = arith.constant 0 : index
    %c0_0 = arith.constant 0 : index
    %c0_1 = arith.constant 0 : index
    %0 = vector.load %arg1[%c0, %c0_0, %c0_1] : memref<1x8x64xbf16, #tpu.memory_space<vmem>>, vector<1x8x64xbf16>
    %1 = vector.shape_cast %0 : vector<1x8x64xbf16> to vector<8x64xbf16>
    %c0_2 = arith.constant 0 : index
    %c0_3 = arith.constant 0 : index
    %2 = vector.load %arg2[%c0_2, %c0_3] : memref<64x192xbf16, #tpu.memory_space<vmem>>, vector<64x192xbf16>
    %cst = arith.constant dense<0.000000e+00> : vector<8x192xf32>
    %3 = tpu.matmul %1, %2, %cst {dimension_numbers = #tpu.dot_dimension_numbers<[1], [0], [0], [1], [0, 0, 1, 1], [], []>} : vector<8x64xbf16>, vector<64x192xbf16>, vector<8x192xf32> -> vector<8x192xf32>
    %c0_4 = arith.constant 0 : index
    %c0_5 = arith.constant 0 : index
    %4 = vector.load %arg3[%c0_4, %c0_5] : memref<1x192xf32, #tpu.memory_space<vmem>>, vector<1x192xf32>
    %5 = vector.broadcast %4 : vector<1x192xf32> to vector<8x192xf32>
    %6 = arith.addf %3, %5 : vector<8x192xf32>
    %7 = vector.extract_strided_slice %6 {offsets = [0, 0], sizes = [8, 32], strides = [1, 1]} : vector<8x192xf32> to vector<8x32xf32>
    %8 = arith.truncf %7 : vector<8x32xf32> to vector<8x32xbf16>
    %9 = vector.extract_strided_slice %6 {offsets = [0, 64], sizes = [8, 32], strides = [1, 1]} : vector<8x192xf32> to vector<8x32xf32>
    %10 = arith.truncf %9 : vector<8x32xf32> to vector<8x32xbf16>
    %11 = vector.extract_strided_slice %6 {offsets = [0, 128], sizes = [8, 32], strides = [1, 1]} : vector<8x192xf32> to vector<8x32xf32>
    %12 = arith.truncf %11 : vector<8x32xf32> to vector<8x32xbf16>
    "tpu.trace_start"() <{level = 10 : i32, message = "qd,kd->qk"}> : () -> ()
    %cst_6 = arith.constant dense<0.000000e+00> : vector<8x8xf32>
    %13 = tpu.matmul %8, %10, %cst_6 {dimension_numbers = #tpu.dot_dimension_numbers<[1], [1], [0], [0], [0, 0, 1, 0], [], []>} : vector<8x32xbf16>, vector<8x32xbf16>, vector<8x8xf32> -> vector<8x8xf32>
    "tpu.trace_stop"() : () -> ()
    %cst_7 = arith.constant dense<0xFF800000> : vector<8xf32>
    %14 = vector.multi_reduction <maximumf>, %13, %cst_7 [1] : vector<8x8xf32> to vector<8xf32>
    %15 = vector.shape_cast %14 : vector<8xf32> to vector<8x1xf32>
    %16 = vector.broadcast %15 : vector<8x1xf32> to vector<8x8xf32>
    %17 = arith.subf %13, %16 : vector<8x8xf32>
    %18 = math.exp %17 : vector<8x8xf32>
    %cst_8 = arith.constant dense<0.000000e+00> : vector<8xf32>
    %19 = vector.multi_reduction <add>, %18, %cst_8 [1] : vector<8x8xf32> to vector<8xf32>
    %20 = vector.shape_cast %19 : vector<8xf32> to vector<8x1xf32>
    %21 = vector.broadcast %20 : vector<8x1xf32> to vector<8x8xf32>
    %22 = arith.divf %18, %21 : vector<8x8xf32>
    %23 = arith.truncf %22 : vector<8x8xf32> to vector<8x8xbf16>
    %cst_9 = arith.constant dense<0.000000e+00> : vector<8x32xf32>
    %24 = tpu.matmul %23, %12, %cst_9 {dimension_numbers = #tpu.dot_dimension_numbers<[1], [0], [0], [1], [0, 0, 1, 1], [], []>} : vector<8x8xbf16>, vector<8x32xbf16>, vector<8x32xf32> -> vector<8x32xf32>
    %25 = vector.extract_strided_slice %6 {offsets = [0, 32], sizes = [8, 32], strides = [1, 1]} : vector<8x192xf32> to vector<8x32xf32>
    %26 = arith.truncf %25 : vector<8x32xf32> to vector<8x32xbf16>
    %27 = vector.extract_strided_slice %6 {offsets = [0, 96], sizes = [8, 32], strides = [1, 1]} : vector<8x192xf32> to vector<8x32xf32>
    %28 = arith.truncf %27 : vector<8x32xf32> to vector<8x32xbf16>
    %29 = vector.extract_strided_slice %6 {offsets = [0, 160], sizes = [8, 32], strides = [1, 1]} : vector<8x192xf32> to vector<8x32xf32>
    %30 = arith.truncf %29 : vector<8x32xf32> to vector<8x32xbf16>
    "tpu.trace_start"() <{level = 10 : i32, message = "qd,kd->qk"}> : () -> ()
    %cst_10 = arith.constant dense<0.000000e+00> : vector<8x8xf32>
    %31 = tpu.matmul %26, %28, %cst_10 {dimension_numbers = #tpu.dot_dimension_numbers<[1], [1], [0], [0], [0, 0, 1, 0], [], []>} : vector<8x32xbf16>, vector<8x32xbf16>, vector<8x8xf32> -> vector<8x8xf32>
    "tpu.trace_stop"() : () -> ()
    %cst_11 = arith.constant dense<0xFF800000> : vector<8xf32>
    %32 = vector.multi_reduction <maximumf>, %31, %cst_11 [1] : vector<8x8xf32> to vector<8xf32>
    %33 = vector.shape_cast %32 : vector<8xf32> to vector<8x1xf32>
    %34 = vector.broadcast %33 : vector<8x1xf32> to vector<8x8xf32>
    %35 = arith.subf %31, %34 : vector<8x8xf32>
    %36 = math.exp %35 : vector<8x8xf32>
    %cst_12 = arith.constant dense<0.000000e+00> : vector<8xf32>
    %37 = vector.multi_reduction <add>, %36, %cst_12 [1] : vector<8x8xf32> to vector<8xf32>
    %38 = vector.shape_cast %37 : vector<8xf32> to vector<8x1xf32>
    %39 = vector.broadcast %38 : vector<8x1xf32> to vector<8x8xf32>
    %40 = arith.divf %36, %39 : vector<8x8xf32>
    %41 = arith.truncf %40 : vector<8x8xf32> to vector<8x8xbf16>
    %cst_13 = arith.constant dense<0.000000e+00> : vector<8x32xf32>
    %42 = tpu.matmul %41, %30, %cst_13 {dimension_numbers = #tpu.dot_dimension_numbers<[1], [0], [0], [1], [0, 0, 1, 1], [], []>} : vector<8x8xbf16>, vector<8x32xbf16>, vector<8x32xf32> -> vector<8x32xf32>
    %43 = tpu.concatenate %24, %42 in 1 : vector<8x32xf32>, vector<8x32xf32> -> vector<8x64xf32>
    %44 = arith.truncf %43 : vector<8x64xf32> to vector<8x64xbf16>
    %c0_14 = arith.constant 0 : index
    %c0_15 = arith.constant 0 : index
    %45 = vector.load %arg4[%c0_14, %c0_15] : memref<64x64xbf16, #tpu.memory_space<vmem>>, vector<64x64xbf16>
    %cst_16 = arith.constant dense<0.000000e+00> : vector<8x64xf32>
    %46 = tpu.matmul %44, %45, %cst_16 {dimension_numbers = #tpu.dot_dimension_numbers<[1], [0], [0], [1], [0, 0, 1, 1], [], []>} : vector<8x64xbf16>, vector<64x64xbf16>, vector<8x64xf32> -> vector<8x64xf32>
    %c0_17 = arith.constant 0 : index
    %c0_18 = arith.constant 0 : index
    %47 = vector.load %arg5[%c0_17, %c0_18] : memref<1x64xf32, #tpu.memory_space<vmem>>, vector<1x64xf32>
    %48 = vector.broadcast %47 : vector<1x64xf32> to vector<8x64xf32>
    %49 = arith.addf %46, %48 : vector<8x64xf32>
    %50 = arith.truncf %49 : vector<8x64xf32> to vector<8x64xbf16>
    %c0_19 = arith.constant 0 : index
    %c0_20 = arith.constant 0 : index
    %c0_21 = arith.constant 0 : index
    %51 = vector.load %arg6[%c0_19, %c0_20, %c0_21] : memref<1x8x64xbf16, #tpu.memory_space<vmem>>, vector<1x8x64xbf16>
    %52 = vector.shape_cast %51 : vector<1x8x64xbf16> to vector<8x64xbf16>
    %53 = vector.shape_cast %50 : vector<8x64xbf16> to vector<1x8x64xbf16>
    tpu.vector_store %arg6[%c0_19, %c0_20, %c0_21], %53 {strides = array<i32>} : memref<1x8x64xbf16, #tpu.memory_space<vmem>>, vector<1x8x64xbf16>,
    return
  }
  func.func @transform_0(%arg0: i32) -> (i32, i32, i32) {
    %c0_i32 = arith.constant 0 : i32
    %c0_i32_0 = arith.constant 0 : i32
    %c0_i32_1 = arith.constant 0 : i32
    return %arg0, %c0_i32, %c0_i32_0 : i32, i32, i32
  }
  func.func @transform_1(%arg0: i32) -> (i32, i32) {
    %c0_i32 = arith.constant 0 : i32
    %c0_i32_0 = arith.constant 0 : i32
    %c0_i32_1 = arith.constant 0 : i32
    return %c0_i32, %c0_i32_0 : i32, i32
  }
  func.func @transform_2(%arg0: i32) -> (i32, i32) {
    %c0_i32 = arith.constant 0 : i32
    %c0_i32_0 = arith.constant 0 : i32
    %c0_i32_1 = arith.constant 0 : i32
    return %c0_i32, %c0_i32_0 : i32, i32
  }
  func.func @transform_3(%arg0: i32) -> (i32, i32) {
    %c0_i32 = arith.constant 0 : i32
    %c0_i32_0 = arith.constant 0 : i32
    %c0_i32_1 = arith.constant 0 : i32
    return %c0_i32, %c0_i32_0 : i32, i32
  }
  func.func @transform_4(%arg0: i32) -> (i32, i32) {
    %c0_i32 = arith.constant 0 : i32
    %c0_i32_0 = arith.constant 0 : i32
    %c0_i32_1 = arith.constant 0 : i32
    return %c0_i32, %c0_i32_0 : i32, i32
  }
  func.func @transform_5(%arg0: i32) -> (i32, i32, i32) {
    %c0_i32 = arith.constant 0 : i32
    %c0_i32_0 = arith.constant 0 : i32
    %c0_i32_1 = arith.constant 0 : i32
    return %arg0, %c0_i32, %c0_i32_0 : i32, i32, i32
  }
}

module attributes {stable_mosaic.version = 11 : i64} {
  func.func @bilstm_kernel(%arg0: i32, %arg1: memref<8x2x16xbf16, #tpu.memory_space<vmem>>, %arg2: memref<16x256xbf16, #tpu.memory_space<vmem>>, %arg3: memref<1x256xf32, #tpu.memory_space<vmem>>, %arg4: memref<64x256xbf16, #tpu.memory_space<vmem>>, %arg5: memref<8x2x64xbf16, #tpu.memory_space<vmem>>, %arg6: memref<8x2x256xf32, #tpu.memory_space<vmem>>) attributes {dimension_semantics = [#tpu.dimension_semantics<parallel>], iteration_bounds = array<i64: 1>, scalar_prefetch = 0 : i64, scratch_operands = 1 : i64, tpu.core_type = #tpu.core_type<tc>, window_params = [{transform_indices = @transform_0, window_bounds = array<i64: 8, 2, 16>}, {pipeline_mode = #tpu.pipeline_mode<synchronous>, transform_indices = @transform_1, window_bounds = array<i64: 16, 256>}, {pipeline_mode = #tpu.pipeline_mode<synchronous>, transform_indices = @transform_2, window_bounds = array<i64: 1, 256>}, {pipeline_mode = #tpu.pipeline_mode<synchronous>, transform_indices = @transform_3, window_bounds = array<i64: 64, 256>}, {transform_indices = @transform_4, window_bounds = array<i64: 8, 2, 64>}]} {
    %c0 = arith.constant 0 : index
    %c0_0 = arith.constant 0 : index
    %0 = vector.load %arg2[%c0, %c0_0] : memref<16x256xbf16, #tpu.memory_space<vmem>>, vector<16x256xbf16>
    %c0_1 = arith.constant 0 : index
    %c0_2 = arith.constant 0 : index
    %1 = vector.load %arg3[%c0_1, %c0_2] : memref<1x256xf32, #tpu.memory_space<vmem>>, vector<1x256xf32>
    %c0_3 = arith.constant 0 : index
    %c0_4 = arith.constant 0 : index
    %2 = vector.load %arg4[%c0_3, %c0_4] : memref<64x256xbf16, #tpu.memory_space<vmem>>, vector<64x256xbf16>
    %c0_i32 = arith.constant 0 : i32
    %3 = arith.index_cast %c0_i32 : i32 to index
    %c0_5 = arith.constant 0 : index
    %c0_6 = arith.constant 0 : index
    %4 = vector.load %arg1[%3, %c0_5, %c0_6] : memref<8x2x16xbf16, #tpu.memory_space<vmem>>, vector<1x2x16xbf16>
    %5 = vector.shape_cast %4 : vector<1x2x16xbf16> to vector<2x16xbf16>
    %cst = arith.constant dense<0.000000e+00> : vector<2x256xf32>
    %6 = tpu.matmul %5, %0, %cst {dimension_numbers = #tpu.dot_dimension_numbers<[1], [0], [0], [1], [0, 0, 1, 1], [], []>} : vector<2x16xbf16>, vector<16x256xbf16>, vector<2x256xf32> -> vector<2x256xf32>
    %7 = vector.broadcast %1 : vector<1x256xf32> to vector<2x256xf32>
    %8 = arith.addf %6, %7 : vector<2x256xf32>
    %9 = arith.index_cast %c0_i32 : i32 to index
    %c0_7 = arith.constant 0 : index
    %c0_8 = arith.constant 0 : index
    %10 = vector.load %arg6[%9, %c0_7, %c0_8] : memref<8x2x256xf32, #tpu.memory_space<vmem>>, vector<1x2x256xf32>
    %11 = vector.shape_cast %10 : vector<1x2x256xf32> to vector<2x256xf32>
    %12 = vector.shape_cast %8 : vector<2x256xf32> to vector<1x2x256xf32>
    tpu.vector_store %arg6[%9, %c0_7, %c0_8], %12 {strides = array<i32>} : memref<8x2x256xf32, #tpu.memory_space<vmem>>, vector<1x2x256xf32>,
    %c1_i32 = arith.constant 1 : i32
    %13 = arith.index_cast %c1_i32 : i32 to index
    %c0_9 = arith.constant 0 : index
    %c0_10 = arith.constant 0 : index
    %14 = vector.load %arg1[%13, %c0_9, %c0_10] : memref<8x2x16xbf16, #tpu.memory_space<vmem>>, vector<1x2x16xbf16>
    %15 = vector.shape_cast %14 : vector<1x2x16xbf16> to vector<2x16xbf16>
    %cst_11 = arith.constant dense<0.000000e+00> : vector<2x256xf32>
    %16 = tpu.matmul %15, %0, %cst_11 {dimension_numbers = #tpu.dot_dimension_numbers<[1], [0], [0], [1], [0, 0, 1, 1], [], []>} : vector<2x16xbf16>, vector<16x256xbf16>, vector<2x256xf32> -> vector<2x256xf32>
    %17 = vector.broadcast %1 : vector<1x256xf32> to vector<2x256xf32>
    %18 = arith.addf %16, %17 : vector<2x256xf32>
    %19 = arith.index_cast %c1_i32 : i32 to index
    %c0_12 = arith.constant 0 : index
    %c0_13 = arith.constant 0 : index
    %20 = vector.load %arg6[%19, %c0_12, %c0_13] : memref<8x2x256xf32, #tpu.memory_space<vmem>>, vector<1x2x256xf32>
    %21 = vector.shape_cast %20 : vector<1x2x256xf32> to vector<2x256xf32>
    %22 = vector.shape_cast %18 : vector<2x256xf32> to vector<1x2x256xf32>
    tpu.vector_store %arg6[%19, %c0_12, %c0_13], %22 {strides = array<i32>} : memref<8x2x256xf32, #tpu.memory_space<vmem>>, vector<1x2x256xf32>,
    %c2_i32 = arith.constant 2 : i32
    %23 = arith.index_cast %c2_i32 : i32 to index
    %c0_14 = arith.constant 0 : index
    %c0_15 = arith.constant 0 : index
    %24 = vector.load %arg1[%23, %c0_14, %c0_15] : memref<8x2x16xbf16, #tpu.memory_space<vmem>>, vector<1x2x16xbf16>
    %25 = vector.shape_cast %24 : vector<1x2x16xbf16> to vector<2x16xbf16>
    %cst_16 = arith.constant dense<0.000000e+00> : vector<2x256xf32>
    %26 = tpu.matmul %25, %0, %cst_16 {dimension_numbers = #tpu.dot_dimension_numbers<[1], [0], [0], [1], [0, 0, 1, 1], [], []>} : vector<2x16xbf16>, vector<16x256xbf16>, vector<2x256xf32> -> vector<2x256xf32>
    %27 = vector.broadcast %1 : vector<1x256xf32> to vector<2x256xf32>
    %28 = arith.addf %26, %27 : vector<2x256xf32>
    %29 = arith.index_cast %c2_i32 : i32 to index
    %c0_17 = arith.constant 0 : index
    %c0_18 = arith.constant 0 : index
    %30 = vector.load %arg6[%29, %c0_17, %c0_18] : memref<8x2x256xf32, #tpu.memory_space<vmem>>, vector<1x2x256xf32>
    %31 = vector.shape_cast %30 : vector<1x2x256xf32> to vector<2x256xf32>
    %32 = vector.shape_cast %28 : vector<2x256xf32> to vector<1x2x256xf32>
    tpu.vector_store %arg6[%29, %c0_17, %c0_18], %32 {strides = array<i32>} : memref<8x2x256xf32, #tpu.memory_space<vmem>>, vector<1x2x256xf32>,
    %c3_i32 = arith.constant 3 : i32
    %33 = arith.index_cast %c3_i32 : i32 to index
    %c0_19 = arith.constant 0 : index
    %c0_20 = arith.constant 0 : index
    %34 = vector.load %arg1[%33, %c0_19, %c0_20] : memref<8x2x16xbf16, #tpu.memory_space<vmem>>, vector<1x2x16xbf16>
    %35 = vector.shape_cast %34 : vector<1x2x16xbf16> to vector<2x16xbf16>
    %cst_21 = arith.constant dense<0.000000e+00> : vector<2x256xf32>
    %36 = tpu.matmul %35, %0, %cst_21 {dimension_numbers = #tpu.dot_dimension_numbers<[1], [0], [0], [1], [0, 0, 1, 1], [], []>} : vector<2x16xbf16>, vector<16x256xbf16>, vector<2x256xf32> -> vector<2x256xf32>
    %37 = vector.broadcast %1 : vector<1x256xf32> to vector<2x256xf32>
    %38 = arith.addf %36, %37 : vector<2x256xf32>
    %39 = arith.index_cast %c3_i32 : i32 to index
    %c0_22 = arith.constant 0 : index
    %c0_23 = arith.constant 0 : index
    %40 = vector.load %arg6[%39, %c0_22, %c0_23] : memref<8x2x256xf32, #tpu.memory_space<vmem>>, vector<1x2x256xf32>
    %41 = vector.shape_cast %40 : vector<1x2x256xf32> to vector<2x256xf32>
    %42 = vector.shape_cast %38 : vector<2x256xf32> to vector<1x2x256xf32>
    tpu.vector_store %arg6[%39, %c0_22, %c0_23], %42 {strides = array<i32>} : memref<8x2x256xf32, #tpu.memory_space<vmem>>, vector<1x2x256xf32>,
    %c4_i32 = arith.constant 4 : i32
    %43 = arith.index_cast %c4_i32 : i32 to index
    %c0_24 = arith.constant 0 : index
    %c0_25 = arith.constant 0 : index
    %44 = vector.load %arg1[%43, %c0_24, %c0_25] : memref<8x2x16xbf16, #tpu.memory_space<vmem>>, vector<1x2x16xbf16>
    %45 = vector.shape_cast %44 : vector<1x2x16xbf16> to vector<2x16xbf16>
    %cst_26 = arith.constant dense<0.000000e+00> : vector<2x256xf32>
    %46 = tpu.matmul %45, %0, %cst_26 {dimension_numbers = #tpu.dot_dimension_numbers<[1], [0], [0], [1], [0, 0, 1, 1], [], []>} : vector<2x16xbf16>, vector<16x256xbf16>, vector<2x256xf32> -> vector<2x256xf32>
    %47 = vector.broadcast %1 : vector<1x256xf32> to vector<2x256xf32>
    %48 = arith.addf %46, %47 : vector<2x256xf32>
    %49 = arith.index_cast %c4_i32 : i32 to index
    %c0_27 = arith.constant 0 : index
    %c0_28 = arith.constant 0 : index
    %50 = vector.load %arg6[%49, %c0_27, %c0_28] : memref<8x2x256xf32, #tpu.memory_space<vmem>>, vector<1x2x256xf32>
    %51 = vector.shape_cast %50 : vector<1x2x256xf32> to vector<2x256xf32>
    %52 = vector.shape_cast %48 : vector<2x256xf32> to vector<1x2x256xf32>
    tpu.vector_store %arg6[%49, %c0_27, %c0_28], %52 {strides = array<i32>} : memref<8x2x256xf32, #tpu.memory_space<vmem>>, vector<1x2x256xf32>,
    %c5_i32 = arith.constant 5 : i32
    %53 = arith.index_cast %c5_i32 : i32 to index
    %c0_29 = arith.constant 0 : index
    %c0_30 = arith.constant 0 : index
    %54 = vector.load %arg1[%53, %c0_29, %c0_30] : memref<8x2x16xbf16, #tpu.memory_space<vmem>>, vector<1x2x16xbf16>
    %55 = vector.shape_cast %54 : vector<1x2x16xbf16> to vector<2x16xbf16>
    %cst_31 = arith.constant dense<0.000000e+00> : vector<2x256xf32>
    %56 = tpu.matmul %55, %0, %cst_31 {dimension_numbers = #tpu.dot_dimension_numbers<[1], [0], [0], [1], [0, 0, 1, 1], [], []>} : vector<2x16xbf16>, vector<16x256xbf16>, vector<2x256xf32> -> vector<2x256xf32>
    %57 = vector.broadcast %1 : vector<1x256xf32> to vector<2x256xf32>
    %58 = arith.addf %56, %57 : vector<2x256xf32>
    %59 = arith.index_cast %c5_i32 : i32 to index
    %c0_32 = arith.constant 0 : index
    %c0_33 = arith.constant 0 : index
    %60 = vector.load %arg6[%59, %c0_32, %c0_33] : memref<8x2x256xf32, #tpu.memory_space<vmem>>, vector<1x2x256xf32>
    %61 = vector.shape_cast %60 : vector<1x2x256xf32> to vector<2x256xf32>
    %62 = vector.shape_cast %58 : vector<2x256xf32> to vector<1x2x256xf32>
    tpu.vector_store %arg6[%59, %c0_32, %c0_33], %62 {strides = array<i32>} : memref<8x2x256xf32, #tpu.memory_space<vmem>>, vector<1x2x256xf32>,
    %c6_i32 = arith.constant 6 : i32
    %63 = arith.index_cast %c6_i32 : i32 to index
    %c0_34 = arith.constant 0 : index
    %c0_35 = arith.constant 0 : index
    %64 = vector.load %arg1[%63, %c0_34, %c0_35] : memref<8x2x16xbf16, #tpu.memory_space<vmem>>, vector<1x2x16xbf16>
    %65 = vector.shape_cast %64 : vector<1x2x16xbf16> to vector<2x16xbf16>
    %cst_36 = arith.constant dense<0.000000e+00> : vector<2x256xf32>
    %66 = tpu.matmul %65, %0, %cst_36 {dimension_numbers = #tpu.dot_dimension_numbers<[1], [0], [0], [1], [0, 0, 1, 1], [], []>} : vector<2x16xbf16>, vector<16x256xbf16>, vector<2x256xf32> -> vector<2x256xf32>
    %67 = vector.broadcast %1 : vector<1x256xf32> to vector<2x256xf32>
    %68 = arith.addf %66, %67 : vector<2x256xf32>
    %69 = arith.index_cast %c6_i32 : i32 to index
    %c0_37 = arith.constant 0 : index
    %c0_38 = arith.constant 0 : index
    %70 = vector.load %arg6[%69, %c0_37, %c0_38] : memref<8x2x256xf32, #tpu.memory_space<vmem>>, vector<1x2x256xf32>
    %71 = vector.shape_cast %70 : vector<1x2x256xf32> to vector<2x256xf32>
    %72 = vector.shape_cast %68 : vector<2x256xf32> to vector<1x2x256xf32>
    tpu.vector_store %arg6[%69, %c0_37, %c0_38], %72 {strides = array<i32>} : memref<8x2x256xf32, #tpu.memory_space<vmem>>, vector<1x2x256xf32>,
    %c7_i32 = arith.constant 7 : i32
    %73 = arith.index_cast %c7_i32 : i32 to index
    %c0_39 = arith.constant 0 : index
    %c0_40 = arith.constant 0 : index
    %74 = vector.load %arg1[%73, %c0_39, %c0_40] : memref<8x2x16xbf16, #tpu.memory_space<vmem>>, vector<1x2x16xbf16>
    %75 = vector.shape_cast %74 : vector<1x2x16xbf16> to vector<2x16xbf16>
    %cst_41 = arith.constant dense<0.000000e+00> : vector<2x256xf32>
    %76 = tpu.matmul %75, %0, %cst_41 {dimension_numbers = #tpu.dot_dimension_numbers<[1], [0], [0], [1], [0, 0, 1, 1], [], []>} : vector<2x16xbf16>, vector<16x256xbf16>, vector<2x256xf32> -> vector<2x256xf32>
    %77 = vector.broadcast %1 : vector<1x256xf32> to vector<2x256xf32>
    %78 = arith.addf %76, %77 : vector<2x256xf32>
    %79 = arith.index_cast %c7_i32 : i32 to index
    %c0_42 = arith.constant 0 : index
    %c0_43 = arith.constant 0 : index
    %80 = vector.load %arg6[%79, %c0_42, %c0_43] : memref<8x2x256xf32, #tpu.memory_space<vmem>>, vector<1x2x256xf32>
    %81 = vector.shape_cast %80 : vector<1x2x256xf32> to vector<2x256xf32>
    %82 = vector.shape_cast %78 : vector<2x256xf32> to vector<1x2x256xf32>
    tpu.vector_store %arg6[%79, %c0_42, %c0_43], %82 {strides = array<i32>} : memref<8x2x256xf32, #tpu.memory_space<vmem>>, vector<1x2x256xf32>,
    %c8_i32 = arith.constant 8 : i32
    %cst_44 = arith.constant 0.000000e+00 : f32
    %83 = vector.broadcast %cst_44 : f32 to vector<2x64xf32>
    %cst_45 = arith.constant 0.000000e+00 : f32
    %84 = vector.broadcast %cst_45 : f32 to vector<2x32xf32>
    %c0_i32_46 = arith.constant 0 : i32
    %c7_i32_47 = arith.constant 7 : i32
    %85 = arith.subi %c7_i32_47, %c0_i32_46 : i32
    %86 = arith.truncf %83 : vector<2x64xf32> to vector<2x64xbf16>
    %cst_48 = arith.constant dense<0.000000e+00> : vector<2x256xf32>
    %87 = tpu.matmul %86, %2, %cst_48 {dimension_numbers = #tpu.dot_dimension_numbers<[1], [0], [0], [1], [0, 0, 1, 1], [], []>} : vector<2x64xbf16>, vector<64x256xbf16>, vector<2x256xf32> -> vector<2x256xf32>
    %88 = arith.index_cast %c0_i32_46 : i32 to index
    %c0_49 = arith.constant 0 : index
    %c0_50 = arith.constant 0 : index
    %89 = vector.load %arg6[%88, %c0_49, %c0_50] : memref<8x2x256xf32, #tpu.memory_space<vmem>>, vector<1x2x256xf32>
    %90 = vector.shape_cast %89 : vector<1x2x256xf32> to vector<2x256xf32>
    %91 = vector.extract_strided_slice %90 {offsets = [0, 0], sizes = [2, 128], strides = [1, 1]} : vector<2x256xf32> to vector<2x128xf32>
    %92 = vector.extract_strided_slice %87 {offsets = [0, 0], sizes = [2, 128], strides = [1, 1]} : vector<2x256xf32> to vector<2x128xf32>
    %93 = arith.addf %91, %92 : vector<2x128xf32>
    %94 = arith.index_cast %85 : i32 to index
    %c0_51 = arith.constant 0 : index
    %c0_52 = arith.constant 0 : index
    %95 = vector.load %arg6[%94, %c0_51, %c0_52] : memref<8x2x256xf32, #tpu.memory_space<vmem>>, vector<1x2x256xf32>
    %96 = vector.shape_cast %95 : vector<1x2x256xf32> to vector<2x256xf32>
    %97 = vector.extract_strided_slice %96 {offsets = [0, 128], sizes = [2, 128], strides = [1, 1]} : vector<2x256xf32> to vector<2x128xf32>
    %98 = vector.extract_strided_slice %87 {offsets = [0, 128], sizes = [2, 128], strides = [1, 1]} : vector<2x256xf32> to vector<2x128xf32>
    %99 = arith.addf %97, %98 : vector<2x128xf32>
    %100 = vector.extract_strided_slice %93 {offsets = [0, 0], sizes = [2, 32], strides = [1, 1]} : vector<2x128xf32> to vector<2x32xf32>
    %101 = arith.negf %100 : vector<2x32xf32>
    %102 = math.exp %101 : vector<2x32xf32>
    %cst_53 = arith.constant 1.000000e+00 : f32
    %103 = vector.broadcast %cst_53 : f32 to vector<2x32xf32>
    %104 = arith.addf %103, %102 : vector<2x32xf32>
    %105 = arith.divf %103, %104 : vector<2x32xf32>
    %106 = vector.extract_strided_slice %93 {offsets = [0, 32], sizes = [2, 32], strides = [1, 1]} : vector<2x128xf32> to vector<2x32xf32>
    %107 = arith.negf %106 : vector<2x32xf32>
    %108 = math.exp %107 : vector<2x32xf32>
    %cst_54 = arith.constant 1.000000e+00 : f32
    %109 = vector.broadcast %cst_54 : f32 to vector<2x32xf32>
    %110 = arith.addf %109, %108 : vector<2x32xf32>
    %111 = arith.divf %109, %110 : vector<2x32xf32>
    %112 = vector.extract_strided_slice %93 {offsets = [0, 64], sizes = [2, 32], strides = [1, 1]} : vector<2x128xf32> to vector<2x32xf32>
    %113 = math.tanh %112 : vector<2x32xf32>
    %114 = vector.extract_strided_slice %93 {offsets = [0, 96], sizes = [2, 32], strides = [1, 1]} : vector<2x128xf32> to vector<2x32xf32>
    %115 = arith.negf %114 : vector<2x32xf32>
    %116 = math.exp %115 : vector<2x32xf32>
    %cst_55 = arith.constant 1.000000e+00 : f32
    %117 = vector.broadcast %cst_55 : f32 to vector<2x32xf32>
    %118 = arith.addf %117, %116 : vector<2x32xf32>
    %119 = arith.divf %117, %118 : vector<2x32xf32>
    %120 = arith.mulf %111, %84 : vector<2x32xf32>
    %121 = arith.mulf %105, %113 : vector<2x32xf32>
    %122 = arith.addf %120, %121 : vector<2x32xf32>
    %123 = math.tanh %122 : vector<2x32xf32>
    %124 = arith.mulf %119, %123 : vector<2x32xf32>
    %125 = vector.extract_strided_slice %99 {offsets = [0, 0], sizes = [2, 32], strides = [1, 1]} : vector<2x128xf32> to vector<2x32xf32>
    %126 = arith.negf %125 : vector<2x32xf32>
    %127 = math.exp %126 : vector<2x32xf32>
    %cst_56 = arith.constant 1.000000e+00 : f32
    %128 = vector.broadcast %cst_56 : f32 to vector<2x32xf32>
    %129 = arith.addf %128, %127 : vector<2x32xf32>
    %130 = arith.divf %128, %129 : vector<2x32xf32>
    %131 = vector.extract_strided_slice %99 {offsets = [0, 32], sizes = [2, 32], strides = [1, 1]} : vector<2x128xf32> to vector<2x32xf32>
    %132 = arith.negf %131 : vector<2x32xf32>
    %133 = math.exp %132 : vector<2x32xf32>
    %cst_57 = arith.constant 1.000000e+00 : f32
    %134 = vector.broadcast %cst_57 : f32 to vector<2x32xf32>
    %135 = arith.addf %134, %133 : vector<2x32xf32>
    %136 = arith.divf %134, %135 : vector<2x32xf32>
    %137 = vector.extract_strided_slice %99 {offsets = [0, 64], sizes = [2, 32], strides = [1, 1]} : vector<2x128xf32> to vector<2x32xf32>
    %138 = math.tanh %137 : vector<2x32xf32>
    %139 = vector.extract_strided_slice %99 {offsets = [0, 96], sizes = [2, 32], strides = [1, 1]} : vector<2x128xf32> to vector<2x32xf32>
    %140 = arith.negf %139 : vector<2x32xf32>
    %141 = math.exp %140 : vector<2x32xf32>
    %cst_58 = arith.constant 1.000000e+00 : f32
    %142 = vector.broadcast %cst_58 : f32 to vector<2x32xf32>
    %143 = arith.addf %142, %141 : vector<2x32xf32>
    %144 = arith.divf %142, %143 : vector<2x32xf32>
    %145 = arith.mulf %136, %84 : vector<2x32xf32>
    %146 = arith.mulf %130, %138 : vector<2x32xf32>
    %147 = arith.addf %145, %146 : vector<2x32xf32>
    %148 = math.tanh %147 : vector<2x32xf32>
    %149 = arith.mulf %144, %148 : vector<2x32xf32>
    %150 = arith.truncf %124 : vector<2x32xf32> to vector<2x32xbf16>
    %151 = arith.index_cast %c0_i32_46 : i32 to index
    %c0_59 = arith.constant 0 : index
    %c0_60 = arith.constant 0 : index
    %152 = vector.load %arg5[%151, %c0_59, %c0_60] : memref<8x2x64xbf16, #tpu.memory_space<vmem>>, vector<1x2x32xbf16>
    %153 = vector.shape_cast %152 : vector<1x2x32xbf16> to vector<2x32xbf16>
    %154 = vector.shape_cast %150 : vector<2x32xbf16> to vector<1x2x32xbf16>
    tpu.vector_store %arg5[%151, %c0_59, %c0_60], %154 {strides = array<i32>} : memref<8x2x64xbf16, #tpu.memory_space<vmem>>, vector<1x2x32xbf16>,
    %155 = arith.truncf %149 : vector<2x32xf32> to vector<2x32xbf16>
    %156 = arith.index_cast %85 : i32 to index
    %c0_61 = arith.constant 0 : index
    %c32 = arith.constant 32 : index
    %157 = vector.load %arg5[%156, %c0_61, %c32] : memref<8x2x64xbf16, #tpu.memory_space<vmem>>, vector<1x2x32xbf16>
    %158 = vector.shape_cast %157 : vector<1x2x32xbf16> to vector<2x32xbf16>
    %159 = vector.shape_cast %155 : vector<2x32xbf16> to vector<1x2x32xbf16>
    tpu.vector_store %arg5[%156, %c0_61, %c32], %159 {strides = array<i32>} : memref<8x2x64xbf16, #tpu.memory_space<vmem>>, vector<1x2x32xbf16>,
    %160 = tpu.concatenate %124, %149 in 1 : vector<2x32xf32>, vector<2x32xf32> -> vector<2x64xf32>
    %c1_i32_62 = arith.constant 1 : i32
    %c7_i32_63 = arith.constant 7 : i32
    %161 = arith.subi %c7_i32_63, %c1_i32_62 : i32
    %162 = arith.truncf %160 : vector<2x64xf32> to vector<2x64xbf16>
    %cst_64 = arith.constant dense<0.000000e+00> : vector<2x256xf32>
    %163 = tpu.matmul %162, %2, %cst_64 {dimension_numbers = #tpu.dot_dimension_numbers<[1], [0], [0], [1], [0, 0, 1, 1], [], []>} : vector<2x64xbf16>, vector<64x256xbf16>, vector<2x256xf32> -> vector<2x256xf32>
    %164 = arith.index_cast %c1_i32_62 : i32 to index
    %c0_65 = arith.constant 0 : index
    %c0_66 = arith.constant 0 : index
    %165 = vector.load %arg6[%164, %c0_65, %c0_66] : memref<8x2x256xf32, #tpu.memory_space<vmem>>, vector<1x2x256xf32>
    %166 = vector.shape_cast %165 : vector<1x2x256xf32> to vector<2x256xf32>
    %167 = vector.extract_strided_slice %166 {offsets = [0, 0], sizes = [2, 128], strides = [1, 1]} : vector<2x256xf32> to vector<2x128xf32>
    %168 = vector.extract_strided_slice %163 {offsets = [0, 0], sizes = [2, 128], strides = [1, 1]} : vector<2x256xf32> to vector<2x128xf32>
    %169 = arith.addf %167, %168 : vector<2x128xf32>
    %170 = arith.index_cast %161 : i32 to index
    %c0_67 = arith.constant 0 : index
    %c0_68 = arith.constant 0 : index
    %171 = vector.load %arg6[%170, %c0_67, %c0_68] : memref<8x2x256xf32, #tpu.memory_space<vmem>>, vector<1x2x256xf32>
    %172 = vector.shape_cast %171 : vector<1x2x256xf32> to vector<2x256xf32>
    %173 = vector.extract_strided_slice %172 {offsets = [0, 128], sizes = [2, 128], strides = [1, 1]} : vector<2x256xf32> to vector<2x128xf32>
    %174 = vector.extract_strided_slice %163 {offsets = [0, 128], sizes = [2, 128], strides = [1, 1]} : vector<2x256xf32> to vector<2x128xf32>
    %175 = arith.addf %173, %174 : vector<2x128xf32>
    %176 = vector.extract_strided_slice %169 {offsets = [0, 0], sizes = [2, 32], strides = [1, 1]} : vector<2x128xf32> to vector<2x32xf32>
    %177 = arith.negf %176 : vector<2x32xf32>
    %178 = math.exp %177 : vector<2x32xf32>
    %cst_69 = arith.constant 1.000000e+00 : f32
    %179 = vector.broadcast %cst_69 : f32 to vector<2x32xf32>
    %180 = arith.addf %179, %178 : vector<2x32xf32>
    %181 = arith.divf %179, %180 : vector<2x32xf32>
    %182 = vector.extract_strided_slice %169 {offsets = [0, 32], sizes = [2, 32], strides = [1, 1]} : vector<2x128xf32> to vector<2x32xf32>
    %183 = arith.negf %182 : vector<2x32xf32>
    %184 = math.exp %183 : vector<2x32xf32>
    %cst_70 = arith.constant 1.000000e+00 : f32
    %185 = vector.broadcast %cst_70 : f32 to vector<2x32xf32>
    %186 = arith.addf %185, %184 : vector<2x32xf32>
    %187 = arith.divf %185, %186 : vector<2x32xf32>
    %188 = vector.extract_strided_slice %169 {offsets = [0, 64], sizes = [2, 32], strides = [1, 1]} : vector<2x128xf32> to vector<2x32xf32>
    %189 = math.tanh %188 : vector<2x32xf32>
    %190 = vector.extract_strided_slice %169 {offsets = [0, 96], sizes = [2, 32], strides = [1, 1]} : vector<2x128xf32> to vector<2x32xf32>
    %191 = arith.negf %190 : vector<2x32xf32>
    %192 = math.exp %191 : vector<2x32xf32>
    %cst_71 = arith.constant 1.000000e+00 : f32
    %193 = vector.broadcast %cst_71 : f32 to vector<2x32xf32>
    %194 = arith.addf %193, %192 : vector<2x32xf32>
    %195 = arith.divf %193, %194 : vector<2x32xf32>
    %196 = arith.mulf %187, %122 : vector<2x32xf32>
    %197 = arith.mulf %181, %189 : vector<2x32xf32>
    %198 = arith.addf %196, %197 : vector<2x32xf32>
    %199 = math.tanh %198 : vector<2x32xf32>
    %200 = arith.mulf %195, %199 : vector<2x32xf32>
    %201 = vector.extract_strided_slice %175 {offsets = [0, 0], sizes = [2, 32], strides = [1, 1]} : vector<2x128xf32> to vector<2x32xf32>
    %202 = arith.negf %201 : vector<2x32xf32>
    %203 = math.exp %202 : vector<2x32xf32>
    %cst_72 = arith.constant 1.000000e+00 : f32
    %204 = vector.broadcast %cst_72 : f32 to vector<2x32xf32>
    %205 = arith.addf %204, %203 : vector<2x32xf32>
    %206 = arith.divf %204, %205 : vector<2x32xf32>
    %207 = vector.extract_strided_slice %175 {offsets = [0, 32], sizes = [2, 32], strides = [1, 1]} : vector<2x128xf32> to vector<2x32xf32>
    %208 = arith.negf %207 : vector<2x32xf32>
    %209 = math.exp %208 : vector<2x32xf32>
    %cst_73 = arith.constant 1.000000e+00 : f32
    %210 = vector.broadcast %cst_73 : f32 to vector<2x32xf32>
    %211 = arith.addf %210, %209 : vector<2x32xf32>
    %212 = arith.divf %210, %211 : vector<2x32xf32>
    %213 = vector.extract_strided_slice %175 {offsets = [0, 64], sizes = [2, 32], strides = [1, 1]} : vector<2x128xf32> to vector<2x32xf32>
    %214 = math.tanh %213 : vector<2x32xf32>
    %215 = vector.extract_strided_slice %175 {offsets = [0, 96], sizes = [2, 32], strides = [1, 1]} : vector<2x128xf32> to vector<2x32xf32>
    %216 = arith.negf %215 : vector<2x32xf32>
    %217 = math.exp %216 : vector<2x32xf32>
    %cst_74 = arith.constant 1.000000e+00 : f32
    %218 = vector.broadcast %cst_74 : f32 to vector<2x32xf32>
    %219 = arith.addf %218, %217 : vector<2x32xf32>
    %220 = arith.divf %218, %219 : vector<2x32xf32>
    %221 = arith.mulf %212, %147 : vector<2x32xf32>
    %222 = arith.mulf %206, %214 : vector<2x32xf32>
    %223 = arith.addf %221, %222 : vector<2x32xf32>
    %224 = math.tanh %223 : vector<2x32xf32>
    %225 = arith.mulf %220, %224 : vector<2x32xf32>
    %226 = arith.truncf %200 : vector<2x32xf32> to vector<2x32xbf16>
    %227 = arith.index_cast %c1_i32_62 : i32 to index
    %c0_75 = arith.constant 0 : index
    %c0_76 = arith.constant 0 : index
    %228 = vector.load %arg5[%227, %c0_75, %c0_76] : memref<8x2x64xbf16, #tpu.memory_space<vmem>>, vector<1x2x32xbf16>
    %229 = vector.shape_cast %228 : vector<1x2x32xbf16> to vector<2x32xbf16>
    %230 = vector.shape_cast %226 : vector<2x32xbf16> to vector<1x2x32xbf16>
    tpu.vector_store %arg5[%227, %c0_75, %c0_76], %230 {strides = array<i32>} : memref<8x2x64xbf16, #tpu.memory_space<vmem>>, vector<1x2x32xbf16>,
    %231 = arith.truncf %225 : vector<2x32xf32> to vector<2x32xbf16>
    %232 = arith.index_cast %161 : i32 to index
    %c0_77 = arith.constant 0 : index
    %c32_78 = arith.constant 32 : index
    %233 = vector.load %arg5[%232, %c0_77, %c32_78] : memref<8x2x64xbf16, #tpu.memory_space<vmem>>, vector<1x2x32xbf16>
    %234 = vector.shape_cast %233 : vector<1x2x32xbf16> to vector<2x32xbf16>
    %235 = vector.shape_cast %231 : vector<2x32xbf16> to vector<1x2x32xbf16>
    tpu.vector_store %arg5[%232, %c0_77, %c32_78], %235 {strides = array<i32>} : memref<8x2x64xbf16, #tpu.memory_space<vmem>>, vector<1x2x32xbf16>,
    %236 = tpu.concatenate %200, %225 in 1 : vector<2x32xf32>, vector<2x32xf32> -> vector<2x64xf32>
    %c2_i32_79 = arith.constant 2 : i32
    %c7_i32_80 = arith.constant 7 : i32
    %237 = arith.subi %c7_i32_80, %c2_i32_79 : i32
    %238 = arith.truncf %236 : vector<2x64xf32> to vector<2x64xbf16>
    %cst_81 = arith.constant dense<0.000000e+00> : vector<2x256xf32>
    %239 = tpu.matmul %238, %2, %cst_81 {dimension_numbers = #tpu.dot_dimension_numbers<[1], [0], [0], [1], [0, 0, 1, 1], [], []>} : vector<2x64xbf16>, vector<64x256xbf16>, vector<2x256xf32> -> vector<2x256xf32>
    %240 = arith.index_cast %c2_i32_79 : i32 to index
    %c0_82 = arith.constant 0 : index
    %c0_83 = arith.constant 0 : index
    %241 = vector.load %arg6[%240, %c0_82, %c0_83] : memref<8x2x256xf32, #tpu.memory_space<vmem>>, vector<1x2x256xf32>
    %242 = vector.shape_cast %241 : vector<1x2x256xf32> to vector<2x256xf32>
    %243 = vector.extract_strided_slice %242 {offsets = [0, 0], sizes = [2, 128], strides = [1, 1]} : vector<2x256xf32> to vector<2x128xf32>
    %244 = vector.extract_strided_slice %239 {offsets = [0, 0], sizes = [2, 128], strides = [1, 1]} : vector<2x256xf32> to vector<2x128xf32>
    %245 = arith.addf %243, %244 : vector<2x128xf32>
    %246 = arith.index_cast %237 : i32 to index
    %c0_84 = arith.constant 0 : index
    %c0_85 = arith.constant 0 : index
    %247 = vector.load %arg6[%246, %c0_84, %c0_85] : memref<8x2x256xf32, #tpu.memory_space<vmem>>, vector<1x2x256xf32>
    %248 = vector.shape_cast %247 : vector<1x2x256xf32> to vector<2x256xf32>
    %249 = vector.extract_strided_slice %248 {offsets = [0, 128], sizes = [2, 128], strides = [1, 1]} : vector<2x256xf32> to vector<2x128xf32>
    %250 = vector.extract_strided_slice %239 {offsets = [0, 128], sizes = [2, 128], strides = [1, 1]} : vector<2x256xf32> to vector<2x128xf32>
    %251 = arith.addf %249, %250 : vector<2x128xf32>
    %252 = vector.extract_strided_slice %245 {offsets = [0, 0], sizes = [2, 32], strides = [1, 1]} : vector<2x128xf32> to vector<2x32xf32>
    %253 = arith.negf %252 : vector<2x32xf32>
    %254 = math.exp %253 : vector<2x32xf32>
    %cst_86 = arith.constant 1.000000e+00 : f32
    %255 = vector.broadcast %cst_86 : f32 to vector<2x32xf32>
    %256 = arith.addf %255, %254 : vector<2x32xf32>
    %257 = arith.divf %255, %256 : vector<2x32xf32>
    %258 = vector.extract_strided_slice %245 {offsets = [0, 32], sizes = [2, 32], strides = [1, 1]} : vector<2x128xf32> to vector<2x32xf32>
    %259 = arith.negf %258 : vector<2x32xf32>
    %260 = math.exp %259 : vector<2x32xf32>
    %cst_87 = arith.constant 1.000000e+00 : f32
    %261 = vector.broadcast %cst_87 : f32 to vector<2x32xf32>
    %262 = arith.addf %261, %260 : vector<2x32xf32>
    %263 = arith.divf %261, %262 : vector<2x32xf32>
    %264 = vector.extract_strided_slice %245 {offsets = [0, 64], sizes = [2, 32], strides = [1, 1]} : vector<2x128xf32> to vector<2x32xf32>
    %265 = math.tanh %264 : vector<2x32xf32>
    %266 = vector.extract_strided_slice %245 {offsets = [0, 96], sizes = [2, 32], strides = [1, 1]} : vector<2x128xf32> to vector<2x32xf32>
    %267 = arith.negf %266 : vector<2x32xf32>
    %268 = math.exp %267 : vector<2x32xf32>
    %cst_88 = arith.constant 1.000000e+00 : f32
    %269 = vector.broadcast %cst_88 : f32 to vector<2x32xf32>
    %270 = arith.addf %269, %268 : vector<2x32xf32>
    %271 = arith.divf %269, %270 : vector<2x32xf32>
    %272 = arith.mulf %263, %198 : vector<2x32xf32>
    %273 = arith.mulf %257, %265 : vector<2x32xf32>
    %274 = arith.addf %272, %273 : vector<2x32xf32>
    %275 = math.tanh %274 : vector<2x32xf32>
    %276 = arith.mulf %271, %275 : vector<2x32xf32>
    %277 = vector.extract_strided_slice %251 {offsets = [0, 0], sizes = [2, 32], strides = [1, 1]} : vector<2x128xf32> to vector<2x32xf32>
    %278 = arith.negf %277 : vector<2x32xf32>
    %279 = math.exp %278 : vector<2x32xf32>
    %cst_89 = arith.constant 1.000000e+00 : f32
    %280 = vector.broadcast %cst_89 : f32 to vector<2x32xf32>
    %281 = arith.addf %280, %279 : vector<2x32xf32>
    %282 = arith.divf %280, %281 : vector<2x32xf32>
    %283 = vector.extract_strided_slice %251 {offsets = [0, 32], sizes = [2, 32], strides = [1, 1]} : vector<2x128xf32> to vector<2x32xf32>
    %284 = arith.negf %283 : vector<2x32xf32>
    %285 = math.exp %284 : vector<2x32xf32>
    %cst_90 = arith.constant 1.000000e+00 : f32
    %286 = vector.broadcast %cst_90 : f32 to vector<2x32xf32>
    %287 = arith.addf %286, %285 : vector<2x32xf32>
    %288 = arith.divf %286, %287 : vector<2x32xf32>
    %289 = vector.extract_strided_slice %251 {offsets = [0, 64], sizes = [2, 32], strides = [1, 1]} : vector<2x128xf32> to vector<2x32xf32>
    %290 = math.tanh %289 : vector<2x32xf32>
    %291 = vector.extract_strided_slice %251 {offsets = [0, 96], sizes = [2, 32], strides = [1, 1]} : vector<2x128xf32> to vector<2x32xf32>
    %292 = arith.negf %291 : vector<2x32xf32>
    %293 = math.exp %292 : vector<2x32xf32>
    %cst_91 = arith.constant 1.000000e+00 : f32
    %294 = vector.broadcast %cst_91 : f32 to vector<2x32xf32>
    %295 = arith.addf %294, %293 : vector<2x32xf32>
    %296 = arith.divf %294, %295 : vector<2x32xf32>
    %297 = arith.mulf %288, %223 : vector<2x32xf32>
    %298 = arith.mulf %282, %290 : vector<2x32xf32>
    %299 = arith.addf %297, %298 : vector<2x32xf32>
    %300 = math.tanh %299 : vector<2x32xf32>
    %301 = arith.mulf %296, %300 : vector<2x32xf32>
    %302 = arith.truncf %276 : vector<2x32xf32> to vector<2x32xbf16>
    %303 = arith.index_cast %c2_i32_79 : i32 to index
    %c0_92 = arith.constant 0 : index
    %c0_93 = arith.constant 0 : index
    %304 = vector.load %arg5[%303, %c0_92, %c0_93] : memref<8x2x64xbf16, #tpu.memory_space<vmem>>, vector<1x2x32xbf16>
    %305 = vector.shape_cast %304 : vector<1x2x32xbf16> to vector<2x32xbf16>
    %306 = vector.shape_cast %302 : vector<2x32xbf16> to vector<1x2x32xbf16>
    tpu.vector_store %arg5[%303, %c0_92, %c0_93], %306 {strides = array<i32>} : memref<8x2x64xbf16, #tpu.memory_space<vmem>>, vector<1x2x32xbf16>,
    %307 = arith.truncf %301 : vector<2x32xf32> to vector<2x32xbf16>
    %308 = arith.index_cast %237 : i32 to index
    %c0_94 = arith.constant 0 : index
    %c32_95 = arith.constant 32 : index
    %309 = vector.load %arg5[%308, %c0_94, %c32_95] : memref<8x2x64xbf16, #tpu.memory_space<vmem>>, vector<1x2x32xbf16>
    %310 = vector.shape_cast %309 : vector<1x2x32xbf16> to vector<2x32xbf16>
    %311 = vector.shape_cast %307 : vector<2x32xbf16> to vector<1x2x32xbf16>
    tpu.vector_store %arg5[%308, %c0_94, %c32_95], %311 {strides = array<i32>} : memref<8x2x64xbf16, #tpu.memory_space<vmem>>, vector<1x2x32xbf16>,
    %312 = tpu.concatenate %276, %301 in 1 : vector<2x32xf32>, vector<2x32xf32> -> vector<2x64xf32>
    %c3_i32_96 = arith.constant 3 : i32
    %c7_i32_97 = arith.constant 7 : i32
    %313 = arith.subi %c7_i32_97, %c3_i32_96 : i32
    %314 = arith.truncf %312 : vector<2x64xf32> to vector<2x64xbf16>
    %cst_98 = arith.constant dense<0.000000e+00> : vector<2x256xf32>
    %315 = tpu.matmul %314, %2, %cst_98 {dimension_numbers = #tpu.dot_dimension_numbers<[1], [0], [0], [1], [0, 0, 1, 1], [], []>} : vector<2x64xbf16>, vector<64x256xbf16>, vector<2x256xf32> -> vector<2x256xf32>
    %316 = arith.index_cast %c3_i32_96 : i32 to index
    %c0_99 = arith.constant 0 : index
    %c0_100 = arith.constant 0 : index
    %317 = vector.load %arg6[%316, %c0_99, %c0_100] : memref<8x2x256xf32, #tpu.memory_space<vmem>>, vector<1x2x256xf32>
    %318 = vector.shape_cast %317 : vector<1x2x256xf32> to vector<2x256xf32>
    %319 = vector.extract_strided_slice %318 {offsets = [0, 0], sizes = [2, 128], strides = [1, 1]} : vector<2x256xf32> to vector<2x128xf32>
    %320 = vector.extract_strided_slice %315 {offsets = [0, 0], sizes = [2, 128], strides = [1, 1]} : vector<2x256xf32> to vector<2x128xf32>
    %321 = arith.addf %319, %320 : vector<2x128xf32>
    %322 = arith.index_cast %313 : i32 to index
    %c0_101 = arith.constant 0 : index
    %c0_102 = arith.constant 0 : index
    %323 = vector.load %arg6[%322, %c0_101, %c0_102] : memref<8x2x256xf32, #tpu.memory_space<vmem>>, vector<1x2x256xf32>
    %324 = vector.shape_cast %323 : vector<1x2x256xf32> to vector<2x256xf32>
    %325 = vector.extract_strided_slice %324 {offsets = [0, 128], sizes = [2, 128], strides = [1, 1]} : vector<2x256xf32> to vector<2x128xf32>
    %326 = vector.extract_strided_slice %315 {offsets = [0, 128], sizes = [2, 128], strides = [1, 1]} : vector<2x256xf32> to vector<2x128xf32>
    %327 = arith.addf %325, %326 : vector<2x128xf32>
    %328 = vector.extract_strided_slice %321 {offsets = [0, 0], sizes = [2, 32], strides = [1, 1]} : vector<2x128xf32> to vector<2x32xf32>
    %329 = arith.negf %328 : vector<2x32xf32>
    %330 = math.exp %329 : vector<2x32xf32>
    %cst_103 = arith.constant 1.000000e+00 : f32
    %331 = vector.broadcast %cst_103 : f32 to vector<2x32xf32>
    %332 = arith.addf %331, %330 : vector<2x32xf32>
    %333 = arith.divf %331, %332 : vector<2x32xf32>
    %334 = vector.extract_strided_slice %321 {offsets = [0, 32], sizes = [2, 32], strides = [1, 1]} : vector<2x128xf32> to vector<2x32xf32>
    %335 = arith.negf %334 : vector<2x32xf32>
    %336 = math.exp %335 : vector<2x32xf32>
    %cst_104 = arith.constant 1.000000e+00 : f32
    %337 = vector.broadcast %cst_104 : f32 to vector<2x32xf32>
    %338 = arith.addf %337, %336 : vector<2x32xf32>
    %339 = arith.divf %337, %338 : vector<2x32xf32>
    %340 = vector.extract_strided_slice %321 {offsets = [0, 64], sizes = [2, 32], strides = [1, 1]} : vector<2x128xf32> to vector<2x32xf32>
    %341 = math.tanh %340 : vector<2x32xf32>
    %342 = vector.extract_strided_slice %321 {offsets = [0, 96], sizes = [2, 32], strides = [1, 1]} : vector<2x128xf32> to vector<2x32xf32>
    %343 = arith.negf %342 : vector<2x32xf32>
    %344 = math.exp %343 : vector<2x32xf32>
    %cst_105 = arith.constant 1.000000e+00 : f32
    %345 = vector.broadcast %cst_105 : f32 to vector<2x32xf32>
    %346 = arith.addf %345, %344 : vector<2x32xf32>
    %347 = arith.divf %345, %346 : vector<2x32xf32>
    %348 = arith.mulf %339, %274 : vector<2x32xf32>
    %349 = arith.mulf %333, %341 : vector<2x32xf32>
    %350 = arith.addf %348, %349 : vector<2x32xf32>
    %351 = math.tanh %350 : vector<2x32xf32>
    %352 = arith.mulf %347, %351 : vector<2x32xf32>
    %353 = vector.extract_strided_slice %327 {offsets = [0, 0], sizes = [2, 32], strides = [1, 1]} : vector<2x128xf32> to vector<2x32xf32>
    %354 = arith.negf %353 : vector<2x32xf32>
    %355 = math.exp %354 : vector<2x32xf32>
    %cst_106 = arith.constant 1.000000e+00 : f32
    %356 = vector.broadcast %cst_106 : f32 to vector<2x32xf32>
    %357 = arith.addf %356, %355 : vector<2x32xf32>
    %358 = arith.divf %356, %357 : vector<2x32xf32>
    %359 = vector.extract_strided_slice %327 {offsets = [0, 32], sizes = [2, 32], strides = [1, 1]} : vector<2x128xf32> to vector<2x32xf32>
    %360 = arith.negf %359 : vector<2x32xf32>
    %361 = math.exp %360 : vector<2x32xf32>
    %cst_107 = arith.constant 1.000000e+00 : f32
    %362 = vector.broadcast %cst_107 : f32 to vector<2x32xf32>
    %363 = arith.addf %362, %361 : vector<2x32xf32>
    %364 = arith.divf %362, %363 : vector<2x32xf32>
    %365 = vector.extract_strided_slice %327 {offsets = [0, 64], sizes = [2, 32], strides = [1, 1]} : vector<2x128xf32> to vector<2x32xf32>
    %366 = math.tanh %365 : vector<2x32xf32>
    %367 = vector.extract_strided_slice %327 {offsets = [0, 96], sizes = [2, 32], strides = [1, 1]} : vector<2x128xf32> to vector<2x32xf32>
    %368 = arith.negf %367 : vector<2x32xf32>
    %369 = math.exp %368 : vector<2x32xf32>
    %cst_108 = arith.constant 1.000000e+00 : f32
    %370 = vector.broadcast %cst_108 : f32 to vector<2x32xf32>
    %371 = arith.addf %370, %369 : vector<2x32xf32>
    %372 = arith.divf %370, %371 : vector<2x32xf32>
    %373 = arith.mulf %364, %299 : vector<2x32xf32>
    %374 = arith.mulf %358, %366 : vector<2x32xf32>
    %375 = arith.addf %373, %374 : vector<2x32xf32>
    %376 = math.tanh %375 : vector<2x32xf32>
    %377 = arith.mulf %372, %376 : vector<2x32xf32>
    %378 = arith.truncf %352 : vector<2x32xf32> to vector<2x32xbf16>
    %379 = arith.index_cast %c3_i32_96 : i32 to index
    %c0_109 = arith.constant 0 : index
    %c0_110 = arith.constant 0 : index
    %380 = vector.load %arg5[%379, %c0_109, %c0_110] : memref<8x2x64xbf16, #tpu.memory_space<vmem>>, vector<1x2x32xbf16>
    %381 = vector.shape_cast %380 : vector<1x2x32xbf16> to vector<2x32xbf16>
    %382 = vector.shape_cast %378 : vector<2x32xbf16> to vector<1x2x32xbf16>
    tpu.vector_store %arg5[%379, %c0_109, %c0_110], %382 {strides = array<i32>} : memref<8x2x64xbf16, #tpu.memory_space<vmem>>, vector<1x2x32xbf16>,
    %383 = arith.truncf %377 : vector<2x32xf32> to vector<2x32xbf16>
    %384 = arith.index_cast %313 : i32 to index
    %c0_111 = arith.constant 0 : index
    %c32_112 = arith.constant 32 : index
    %385 = vector.load %arg5[%384, %c0_111, %c32_112] : memref<8x2x64xbf16, #tpu.memory_space<vmem>>, vector<1x2x32xbf16>
    %386 = vector.shape_cast %385 : vector<1x2x32xbf16> to vector<2x32xbf16>
    %387 = vector.shape_cast %383 : vector<2x32xbf16> to vector<1x2x32xbf16>
    tpu.vector_store %arg5[%384, %c0_111, %c32_112], %387 {strides = array<i32>} : memref<8x2x64xbf16, #tpu.memory_space<vmem>>, vector<1x2x32xbf16>,
    %388 = tpu.concatenate %352, %377 in 1 : vector<2x32xf32>, vector<2x32xf32> -> vector<2x64xf32>
    %c4_i32_113 = arith.constant 4 : i32
    %c7_i32_114 = arith.constant 7 : i32
    %389 = arith.subi %c7_i32_114, %c4_i32_113 : i32
    %390 = arith.truncf %388 : vector<2x64xf32> to vector<2x64xbf16>
    %cst_115 = arith.constant dense<0.000000e+00> : vector<2x256xf32>
    %391 = tpu.matmul %390, %2, %cst_115 {dimension_numbers = #tpu.dot_dimension_numbers<[1], [0], [0], [1], [0, 0, 1, 1], [], []>} : vector<2x64xbf16>, vector<64x256xbf16>, vector<2x256xf32> -> vector<2x256xf32>
    %392 = arith.index_cast %c4_i32_113 : i32 to index
    %c0_116 = arith.constant 0 : index
    %c0_117 = arith.constant 0 : index
    %393 = vector.load %arg6[%392, %c0_116, %c0_117] : memref<8x2x256xf32, #tpu.memory_space<vmem>>, vector<1x2x256xf32>
    %394 = vector.shape_cast %393 : vector<1x2x256xf32> to vector<2x256xf32>
    %395 = vector.extract_strided_slice %394 {offsets = [0, 0], sizes = [2, 128], strides = [1, 1]} : vector<2x256xf32> to vector<2x128xf32>
    %396 = vector.extract_strided_slice %391 {offsets = [0, 0], sizes = [2, 128], strides = [1, 1]} : vector<2x256xf32> to vector<2x128xf32>
    %397 = arith.addf %395, %396 : vector<2x128xf32>
    %398 = arith.index_cast %389 : i32 to index
    %c0_118 = arith.constant 0 : index
    %c0_119 = arith.constant 0 : index
    %399 = vector.load %arg6[%398, %c0_118, %c0_119] : memref<8x2x256xf32, #tpu.memory_space<vmem>>, vector<1x2x256xf32>
    %400 = vector.shape_cast %399 : vector<1x2x256xf32> to vector<2x256xf32>
    %401 = vector.extract_strided_slice %400 {offsets = [0, 128], sizes = [2, 128], strides = [1, 1]} : vector<2x256xf32> to vector<2x128xf32>
    %402 = vector.extract_strided_slice %391 {offsets = [0, 128], sizes = [2, 128], strides = [1, 1]} : vector<2x256xf32> to vector<2x128xf32>
    %403 = arith.addf %401, %402 : vector<2x128xf32>
    %404 = vector.extract_strided_slice %397 {offsets = [0, 0], sizes = [2, 32], strides = [1, 1]} : vector<2x128xf32> to vector<2x32xf32>
    %405 = arith.negf %404 : vector<2x32xf32>
    %406 = math.exp %405 : vector<2x32xf32>
    %cst_120 = arith.constant 1.000000e+00 : f32
    %407 = vector.broadcast %cst_120 : f32 to vector<2x32xf32>
    %408 = arith.addf %407, %406 : vector<2x32xf32>
    %409 = arith.divf %407, %408 : vector<2x32xf32>
    %410 = vector.extract_strided_slice %397 {offsets = [0, 32], sizes = [2, 32], strides = [1, 1]} : vector<2x128xf32> to vector<2x32xf32>
    %411 = arith.negf %410 : vector<2x32xf32>
    %412 = math.exp %411 : vector<2x32xf32>
    %cst_121 = arith.constant 1.000000e+00 : f32
    %413 = vector.broadcast %cst_121 : f32 to vector<2x32xf32>
    %414 = arith.addf %413, %412 : vector<2x32xf32>
    %415 = arith.divf %413, %414 : vector<2x32xf32>
    %416 = vector.extract_strided_slice %397 {offsets = [0, 64], sizes = [2, 32], strides = [1, 1]} : vector<2x128xf32> to vector<2x32xf32>
    %417 = math.tanh %416 : vector<2x32xf32>
    %418 = vector.extract_strided_slice %397 {offsets = [0, 96], sizes = [2, 32], strides = [1, 1]} : vector<2x128xf32> to vector<2x32xf32>
    %419 = arith.negf %418 : vector<2x32xf32>
    %420 = math.exp %419 : vector<2x32xf32>
    %cst_122 = arith.constant 1.000000e+00 : f32
    %421 = vector.broadcast %cst_122 : f32 to vector<2x32xf32>
    %422 = arith.addf %421, %420 : vector<2x32xf32>
    %423 = arith.divf %421, %422 : vector<2x32xf32>
    %424 = arith.mulf %415, %350 : vector<2x32xf32>
    %425 = arith.mulf %409, %417 : vector<2x32xf32>
    %426 = arith.addf %424, %425 : vector<2x32xf32>
    %427 = math.tanh %426 : vector<2x32xf32>
    %428 = arith.mulf %423, %427 : vector<2x32xf32>
    %429 = vector.extract_strided_slice %403 {offsets = [0, 0], sizes = [2, 32], strides = [1, 1]} : vector<2x128xf32> to vector<2x32xf32>
    %430 = arith.negf %429 : vector<2x32xf32>
    %431 = math.exp %430 : vector<2x32xf32>
    %cst_123 = arith.constant 1.000000e+00 : f32
    %432 = vector.broadcast %cst_123 : f32 to vector<2x32xf32>
    %433 = arith.addf %432, %431 : vector<2x32xf32>
    %434 = arith.divf %432, %433 : vector<2x32xf32>
    %435 = vector.extract_strided_slice %403 {offsets = [0, 32], sizes = [2, 32], strides = [1, 1]} : vector<2x128xf32> to vector<2x32xf32>
    %436 = arith.negf %435 : vector<2x32xf32>
    %437 = math.exp %436 : vector<2x32xf32>
    %cst_124 = arith.constant 1.000000e+00 : f32
    %438 = vector.broadcast %cst_124 : f32 to vector<2x32xf32>
    %439 = arith.addf %438, %437 : vector<2x32xf32>
    %440 = arith.divf %438, %439 : vector<2x32xf32>
    %441 = vector.extract_strided_slice %403 {offsets = [0, 64], sizes = [2, 32], strides = [1, 1]} : vector<2x128xf32> to vector<2x32xf32>
    %442 = math.tanh %441 : vector<2x32xf32>
    %443 = vector.extract_strided_slice %403 {offsets = [0, 96], sizes = [2, 32], strides = [1, 1]} : vector<2x128xf32> to vector<2x32xf32>
    %444 = arith.negf %443 : vector<2x32xf32>
    %445 = math.exp %444 : vector<2x32xf32>
    %cst_125 = arith.constant 1.000000e+00 : f32
    %446 = vector.broadcast %cst_125 : f32 to vector<2x32xf32>
    %447 = arith.addf %446, %445 : vector<2x32xf32>
    %448 = arith.divf %446, %447 : vector<2x32xf32>
    %449 = arith.mulf %440, %375 : vector<2x32xf32>
    %450 = arith.mulf %434, %442 : vector<2x32xf32>
    %451 = arith.addf %449, %450 : vector<2x32xf32>
    %452 = math.tanh %451 : vector<2x32xf32>
    %453 = arith.mulf %448, %452 : vector<2x32xf32>
    %454 = arith.truncf %428 : vector<2x32xf32> to vector<2x32xbf16>
    %455 = arith.index_cast %c4_i32_113 : i32 to index
    %c0_126 = arith.constant 0 : index
    %c0_127 = arith.constant 0 : index
    %456 = vector.load %arg5[%455, %c0_126, %c0_127] : memref<8x2x64xbf16, #tpu.memory_space<vmem>>, vector<1x2x32xbf16>
    %457 = vector.shape_cast %456 : vector<1x2x32xbf16> to vector<2x32xbf16>
    %458 = vector.shape_cast %454 : vector<2x32xbf16> to vector<1x2x32xbf16>
    tpu.vector_store %arg5[%455, %c0_126, %c0_127], %458 {strides = array<i32>} : memref<8x2x64xbf16, #tpu.memory_space<vmem>>, vector<1x2x32xbf16>,
    %459 = arith.truncf %453 : vector<2x32xf32> to vector<2x32xbf16>
    %460 = arith.index_cast %389 : i32 to index
    %c0_128 = arith.constant 0 : index
    %c32_129 = arith.constant 32 : index
    %461 = vector.load %arg5[%460, %c0_128, %c32_129] : memref<8x2x64xbf16, #tpu.memory_space<vmem>>, vector<1x2x32xbf16>
    %462 = vector.shape_cast %461 : vector<1x2x32xbf16> to vector<2x32xbf16>
    %463 = vector.shape_cast %459 : vector<2x32xbf16> to vector<1x2x32xbf16>
    tpu.vector_store %arg5[%460, %c0_128, %c32_129], %463 {strides = array<i32>} : memref<8x2x64xbf16, #tpu.memory_space<vmem>>, vector<1x2x32xbf16>,
    %464 = tpu.concatenate %428, %453 in 1 : vector<2x32xf32>, vector<2x32xf32> -> vector<2x64xf32>
    %c5_i32_130 = arith.constant 5 : i32
    %c7_i32_131 = arith.constant 7 : i32
    %465 = arith.subi %c7_i32_131, %c5_i32_130 : i32
    %466 = arith.truncf %464 : vector<2x64xf32> to vector<2x64xbf16>
    %cst_132 = arith.constant dense<0.000000e+00> : vector<2x256xf32>
    %467 = tpu.matmul %466, %2, %cst_132 {dimension_numbers = #tpu.dot_dimension_numbers<[1], [0], [0], [1], [0, 0, 1, 1], [], []>} : vector<2x64xbf16>, vector<64x256xbf16>, vector<2x256xf32> -> vector<2x256xf32>
    %468 = arith.index_cast %c5_i32_130 : i32 to index
    %c0_133 = arith.constant 0 : index
    %c0_134 = arith.constant 0 : index
    %469 = vector.load %arg6[%468, %c0_133, %c0_134] : memref<8x2x256xf32, #tpu.memory_space<vmem>>, vector<1x2x256xf32>
    %470 = vector.shape_cast %469 : vector<1x2x256xf32> to vector<2x256xf32>
    %471 = vector.extract_strided_slice %470 {offsets = [0, 0], sizes = [2, 128], strides = [1, 1]} : vector<2x256xf32> to vector<2x128xf32>
    %472 = vector.extract_strided_slice %467 {offsets = [0, 0], sizes = [2, 128], strides = [1, 1]} : vector<2x256xf32> to vector<2x128xf32>
    %473 = arith.addf %471, %472 : vector<2x128xf32>
    %474 = arith.index_cast %465 : i32 to index
    %c0_135 = arith.constant 0 : index
    %c0_136 = arith.constant 0 : index
    %475 = vector.load %arg6[%474, %c0_135, %c0_136] : memref<8x2x256xf32, #tpu.memory_space<vmem>>, vector<1x2x256xf32>
    %476 = vector.shape_cast %475 : vector<1x2x256xf32> to vector<2x256xf32>
    %477 = vector.extract_strided_slice %476 {offsets = [0, 128], sizes = [2, 128], strides = [1, 1]} : vector<2x256xf32> to vector<2x128xf32>
    %478 = vector.extract_strided_slice %467 {offsets = [0, 128], sizes = [2, 128], strides = [1, 1]} : vector<2x256xf32> to vector<2x128xf32>
    %479 = arith.addf %477, %478 : vector<2x128xf32>
    %480 = vector.extract_strided_slice %473 {offsets = [0, 0], sizes = [2, 32], strides = [1, 1]} : vector<2x128xf32> to vector<2x32xf32>
    %481 = arith.negf %480 : vector<2x32xf32>
    %482 = math.exp %481 : vector<2x32xf32>
    %cst_137 = arith.constant 1.000000e+00 : f32
    %483 = vector.broadcast %cst_137 : f32 to vector<2x32xf32>
    %484 = arith.addf %483, %482 : vector<2x32xf32>
    %485 = arith.divf %483, %484 : vector<2x32xf32>
    %486 = vector.extract_strided_slice %473 {offsets = [0, 32], sizes = [2, 32], strides = [1, 1]} : vector<2x128xf32> to vector<2x32xf32>
    %487 = arith.negf %486 : vector<2x32xf32>
    %488 = math.exp %487 : vector<2x32xf32>
    %cst_138 = arith.constant 1.000000e+00 : f32
    %489 = vector.broadcast %cst_138 : f32 to vector<2x32xf32>
    %490 = arith.addf %489, %488 : vector<2x32xf32>
    %491 = arith.divf %489, %490 : vector<2x32xf32>
    %492 = vector.extract_strided_slice %473 {offsets = [0, 64], sizes = [2, 32], strides = [1, 1]} : vector<2x128xf32> to vector<2x32xf32>
    %493 = math.tanh %492 : vector<2x32xf32>
    %494 = vector.extract_strided_slice %473 {offsets = [0, 96], sizes = [2, 32], strides = [1, 1]} : vector<2x128xf32> to vector<2x32xf32>
    %495 = arith.negf %494 : vector<2x32xf32>
    %496 = math.exp %495 : vector<2x32xf32>
    %cst_139 = arith.constant 1.000000e+00 : f32
    %497 = vector.broadcast %cst_139 : f32 to vector<2x32xf32>
    %498 = arith.addf %497, %496 : vector<2x32xf32>
    %499 = arith.divf %497, %498 : vector<2x32xf32>
    %500 = arith.mulf %491, %426 : vector<2x32xf32>
    %501 = arith.mulf %485, %493 : vector<2x32xf32>
    %502 = arith.addf %500, %501 : vector<2x32xf32>
    %503 = math.tanh %502 : vector<2x32xf32>
    %504 = arith.mulf %499, %503 : vector<2x32xf32>
    %505 = vector.extract_strided_slice %479 {offsets = [0, 0], sizes = [2, 32], strides = [1, 1]} : vector<2x128xf32> to vector<2x32xf32>
    %506 = arith.negf %505 : vector<2x32xf32>
    %507 = math.exp %506 : vector<2x32xf32>
    %cst_140 = arith.constant 1.000000e+00 : f32
    %508 = vector.broadcast %cst_140 : f32 to vector<2x32xf32>
    %509 = arith.addf %508, %507 : vector<2x32xf32>
    %510 = arith.divf %508, %509 : vector<2x32xf32>
    %511 = vector.extract_strided_slice %479 {offsets = [0, 32], sizes = [2, 32], strides = [1, 1]} : vector<2x128xf32> to vector<2x32xf32>
    %512 = arith.negf %511 : vector<2x32xf32>
    %513 = math.exp %512 : vector<2x32xf32>
    %cst_141 = arith.constant 1.000000e+00 : f32
    %514 = vector.broadcast %cst_141 : f32 to vector<2x32xf32>
    %515 = arith.addf %514, %513 : vector<2x32xf32>
    %516 = arith.divf %514, %515 : vector<2x32xf32>
    %517 = vector.extract_strided_slice %479 {offsets = [0, 64], sizes = [2, 32], strides = [1, 1]} : vector<2x128xf32> to vector<2x32xf32>
    %518 = math.tanh %517 : vector<2x32xf32>
    %519 = vector.extract_strided_slice %479 {offsets = [0, 96], sizes = [2, 32], strides = [1, 1]} : vector<2x128xf32> to vector<2x32xf32>
    %520 = arith.negf %519 : vector<2x32xf32>
    %521 = math.exp %520 : vector<2x32xf32>
    %cst_142 = arith.constant 1.000000e+00 : f32
    %522 = vector.broadcast %cst_142 : f32 to vector<2x32xf32>
    %523 = arith.addf %522, %521 : vector<2x32xf32>
    %524 = arith.divf %522, %523 : vector<2x32xf32>
    %525 = arith.mulf %516, %451 : vector<2x32xf32>
    %526 = arith.mulf %510, %518 : vector<2x32xf32>
    %527 = arith.addf %525, %526 : vector<2x32xf32>
    %528 = math.tanh %527 : vector<2x32xf32>
    %529 = arith.mulf %524, %528 : vector<2x32xf32>
    %530 = arith.truncf %504 : vector<2x32xf32> to vector<2x32xbf16>
    %531 = arith.index_cast %c5_i32_130 : i32 to index
    %c0_143 = arith.constant 0 : index
    %c0_144 = arith.constant 0 : index
    %532 = vector.load %arg5[%531, %c0_143, %c0_144] : memref<8x2x64xbf16, #tpu.memory_space<vmem>>, vector<1x2x32xbf16>
    %533 = vector.shape_cast %532 : vector<1x2x32xbf16> to vector<2x32xbf16>
    %534 = vector.shape_cast %530 : vector<2x32xbf16> to vector<1x2x32xbf16>
    tpu.vector_store %arg5[%531, %c0_143, %c0_144], %534 {strides = array<i32>} : memref<8x2x64xbf16, #tpu.memory_space<vmem>>, vector<1x2x32xbf16>,
    %535 = arith.truncf %529 : vector<2x32xf32> to vector<2x32xbf16>
    %536 = arith.index_cast %465 : i32 to index
    %c0_145 = arith.constant 0 : index
    %c32_146 = arith.constant 32 : index
    %537 = vector.load %arg5[%536, %c0_145, %c32_146] : memref<8x2x64xbf16, #tpu.memory_space<vmem>>, vector<1x2x32xbf16>
    %538 = vector.shape_cast %537 : vector<1x2x32xbf16> to vector<2x32xbf16>
    %539 = vector.shape_cast %535 : vector<2x32xbf16> to vector<1x2x32xbf16>
    tpu.vector_store %arg5[%536, %c0_145, %c32_146], %539 {strides = array<i32>} : memref<8x2x64xbf16, #tpu.memory_space<vmem>>, vector<1x2x32xbf16>,
    %540 = tpu.concatenate %504, %529 in 1 : vector<2x32xf32>, vector<2x32xf32> -> vector<2x64xf32>
    %c6_i32_147 = arith.constant 6 : i32
    %c7_i32_148 = arith.constant 7 : i32
    %541 = arith.subi %c7_i32_148, %c6_i32_147 : i32
    %542 = arith.truncf %540 : vector<2x64xf32> to vector<2x64xbf16>
    %cst_149 = arith.constant dense<0.000000e+00> : vector<2x256xf32>
    %543 = tpu.matmul %542, %2, %cst_149 {dimension_numbers = #tpu.dot_dimension_numbers<[1], [0], [0], [1], [0, 0, 1, 1], [], []>} : vector<2x64xbf16>, vector<64x256xbf16>, vector<2x256xf32> -> vector<2x256xf32>
    %544 = arith.index_cast %c6_i32_147 : i32 to index
    %c0_150 = arith.constant 0 : index
    %c0_151 = arith.constant 0 : index
    %545 = vector.load %arg6[%544, %c0_150, %c0_151] : memref<8x2x256xf32, #tpu.memory_space<vmem>>, vector<1x2x256xf32>
    %546 = vector.shape_cast %545 : vector<1x2x256xf32> to vector<2x256xf32>
    %547 = vector.extract_strided_slice %546 {offsets = [0, 0], sizes = [2, 128], strides = [1, 1]} : vector<2x256xf32> to vector<2x128xf32>
    %548 = vector.extract_strided_slice %543 {offsets = [0, 0], sizes = [2, 128], strides = [1, 1]} : vector<2x256xf32> to vector<2x128xf32>
    %549 = arith.addf %547, %548 : vector<2x128xf32>
    %550 = arith.index_cast %541 : i32 to index
    %c0_152 = arith.constant 0 : index
    %c0_153 = arith.constant 0 : index
    %551 = vector.load %arg6[%550, %c0_152, %c0_153] : memref<8x2x256xf32, #tpu.memory_space<vmem>>, vector<1x2x256xf32>
    %552 = vector.shape_cast %551 : vector<1x2x256xf32> to vector<2x256xf32>
    %553 = vector.extract_strided_slice %552 {offsets = [0, 128], sizes = [2, 128], strides = [1, 1]} : vector<2x256xf32> to vector<2x128xf32>
    %554 = vector.extract_strided_slice %543 {offsets = [0, 128], sizes = [2, 128], strides = [1, 1]} : vector<2x256xf32> to vector<2x128xf32>
    %555 = arith.addf %553, %554 : vector<2x128xf32>
    %556 = vector.extract_strided_slice %549 {offsets = [0, 0], sizes = [2, 32], strides = [1, 1]} : vector<2x128xf32> to vector<2x32xf32>
    %557 = arith.negf %556 : vector<2x32xf32>
    %558 = math.exp %557 : vector<2x32xf32>
    %cst_154 = arith.constant 1.000000e+00 : f32
    %559 = vector.broadcast %cst_154 : f32 to vector<2x32xf32>
    %560 = arith.addf %559, %558 : vector<2x32xf32>
    %561 = arith.divf %559, %560 : vector<2x32xf32>
    %562 = vector.extract_strided_slice %549 {offsets = [0, 32], sizes = [2, 32], strides = [1, 1]} : vector<2x128xf32> to vector<2x32xf32>
    %563 = arith.negf %562 : vector<2x32xf32>
    %564 = math.exp %563 : vector<2x32xf32>
    %cst_155 = arith.constant 1.000000e+00 : f32
    %565 = vector.broadcast %cst_155 : f32 to vector<2x32xf32>
    %566 = arith.addf %565, %564 : vector<2x32xf32>
    %567 = arith.divf %565, %566 : vector<2x32xf32>
    %568 = vector.extract_strided_slice %549 {offsets = [0, 64], sizes = [2, 32], strides = [1, 1]} : vector<2x128xf32> to vector<2x32xf32>
    %569 = math.tanh %568 : vector<2x32xf32>
    %570 = vector.extract_strided_slice %549 {offsets = [0, 96], sizes = [2, 32], strides = [1, 1]} : vector<2x128xf32> to vector<2x32xf32>
    %571 = arith.negf %570 : vector<2x32xf32>
    %572 = math.exp %571 : vector<2x32xf32>
    %cst_156 = arith.constant 1.000000e+00 : f32
    %573 = vector.broadcast %cst_156 : f32 to vector<2x32xf32>
    %574 = arith.addf %573, %572 : vector<2x32xf32>
    %575 = arith.divf %573, %574 : vector<2x32xf32>
    %576 = arith.mulf %567, %502 : vector<2x32xf32>
    %577 = arith.mulf %561, %569 : vector<2x32xf32>
    %578 = arith.addf %576, %577 : vector<2x32xf32>
    %579 = math.tanh %578 : vector<2x32xf32>
    %580 = arith.mulf %575, %579 : vector<2x32xf32>
    %581 = vector.extract_strided_slice %555 {offsets = [0, 0], sizes = [2, 32], strides = [1, 1]} : vector<2x128xf32> to vector<2x32xf32>
    %582 = arith.negf %581 : vector<2x32xf32>
    %583 = math.exp %582 : vector<2x32xf32>
    %cst_157 = arith.constant 1.000000e+00 : f32
    %584 = vector.broadcast %cst_157 : f32 to vector<2x32xf32>
    %585 = arith.addf %584, %583 : vector<2x32xf32>
    %586 = arith.divf %584, %585 : vector<2x32xf32>
    %587 = vector.extract_strided_slice %555 {offsets = [0, 32], sizes = [2, 32], strides = [1, 1]} : vector<2x128xf32> to vector<2x32xf32>
    %588 = arith.negf %587 : vector<2x32xf32>
    %589 = math.exp %588 : vector<2x32xf32>
    %cst_158 = arith.constant 1.000000e+00 : f32
    %590 = vector.broadcast %cst_158 : f32 to vector<2x32xf32>
    %591 = arith.addf %590, %589 : vector<2x32xf32>
    %592 = arith.divf %590, %591 : vector<2x32xf32>
    %593 = vector.extract_strided_slice %555 {offsets = [0, 64], sizes = [2, 32], strides = [1, 1]} : vector<2x128xf32> to vector<2x32xf32>
    %594 = math.tanh %593 : vector<2x32xf32>
    %595 = vector.extract_strided_slice %555 {offsets = [0, 96], sizes = [2, 32], strides = [1, 1]} : vector<2x128xf32> to vector<2x32xf32>
    %596 = arith.negf %595 : vector<2x32xf32>
    %597 = math.exp %596 : vector<2x32xf32>
    %cst_159 = arith.constant 1.000000e+00 : f32
    %598 = vector.broadcast %cst_159 : f32 to vector<2x32xf32>
    %599 = arith.addf %598, %597 : vector<2x32xf32>
    %600 = arith.divf %598, %599 : vector<2x32xf32>
    %601 = arith.mulf %592, %527 : vector<2x32xf32>
    %602 = arith.mulf %586, %594 : vector<2x32xf32>
    %603 = arith.addf %601, %602 : vector<2x32xf32>
    %604 = math.tanh %603 : vector<2x32xf32>
    %605 = arith.mulf %600, %604 : vector<2x32xf32>
    %606 = arith.truncf %580 : vector<2x32xf32> to vector<2x32xbf16>
    %607 = arith.index_cast %c6_i32_147 : i32 to index
    %c0_160 = arith.constant 0 : index
    %c0_161 = arith.constant 0 : index
    %608 = vector.load %arg5[%607, %c0_160, %c0_161] : memref<8x2x64xbf16, #tpu.memory_space<vmem>>, vector<1x2x32xbf16>
    %609 = vector.shape_cast %608 : vector<1x2x32xbf16> to vector<2x32xbf16>
    %610 = vector.shape_cast %606 : vector<2x32xbf16> to vector<1x2x32xbf16>
    tpu.vector_store %arg5[%607, %c0_160, %c0_161], %610 {strides = array<i32>} : memref<8x2x64xbf16, #tpu.memory_space<vmem>>, vector<1x2x32xbf16>,
    %611 = arith.truncf %605 : vector<2x32xf32> to vector<2x32xbf16>
    %612 = arith.index_cast %541 : i32 to index
    %c0_162 = arith.constant 0 : index
    %c32_163 = arith.constant 32 : index
    %613 = vector.load %arg5[%612, %c0_162, %c32_163] : memref<8x2x64xbf16, #tpu.memory_space<vmem>>, vector<1x2x32xbf16>
    %614 = vector.shape_cast %613 : vector<1x2x32xbf16> to vector<2x32xbf16>
    %615 = vector.shape_cast %611 : vector<2x32xbf16> to vector<1x2x32xbf16>
    tpu.vector_store %arg5[%612, %c0_162, %c32_163], %615 {strides = array<i32>} : memref<8x2x64xbf16, #tpu.memory_space<vmem>>, vector<1x2x32xbf16>,
    %616 = tpu.concatenate %580, %605 in 1 : vector<2x32xf32>, vector<2x32xf32> -> vector<2x64xf32>
    %c7_i32_164 = arith.constant 7 : i32
    %c7_i32_165 = arith.constant 7 : i32
    %617 = arith.subi %c7_i32_165, %c7_i32_164 : i32
    %618 = arith.truncf %616 : vector<2x64xf32> to vector<2x64xbf16>
    %cst_166 = arith.constant dense<0.000000e+00> : vector<2x256xf32>
    %619 = tpu.matmul %618, %2, %cst_166 {dimension_numbers = #tpu.dot_dimension_numbers<[1], [0], [0], [1], [0, 0, 1, 1], [], []>} : vector<2x64xbf16>, vector<64x256xbf16>, vector<2x256xf32> -> vector<2x256xf32>
    %620 = arith.index_cast %c7_i32_164 : i32 to index
    %c0_167 = arith.constant 0 : index
    %c0_168 = arith.constant 0 : index
    %621 = vector.load %arg6[%620, %c0_167, %c0_168] : memref<8x2x256xf32, #tpu.memory_space<vmem>>, vector<1x2x256xf32>
    %622 = vector.shape_cast %621 : vector<1x2x256xf32> to vector<2x256xf32>
    %623 = vector.extract_strided_slice %622 {offsets = [0, 0], sizes = [2, 128], strides = [1, 1]} : vector<2x256xf32> to vector<2x128xf32>
    %624 = vector.extract_strided_slice %619 {offsets = [0, 0], sizes = [2, 128], strides = [1, 1]} : vector<2x256xf32> to vector<2x128xf32>
    %625 = arith.addf %623, %624 : vector<2x128xf32>
    %626 = arith.index_cast %617 : i32 to index
    %c0_169 = arith.constant 0 : index
    %c0_170 = arith.constant 0 : index
    %627 = vector.load %arg6[%626, %c0_169, %c0_170] : memref<8x2x256xf32, #tpu.memory_space<vmem>>, vector<1x2x256xf32>
    %628 = vector.shape_cast %627 : vector<1x2x256xf32> to vector<2x256xf32>
    %629 = vector.extract_strided_slice %628 {offsets = [0, 128], sizes = [2, 128], strides = [1, 1]} : vector<2x256xf32> to vector<2x128xf32>
    %630 = vector.extract_strided_slice %619 {offsets = [0, 128], sizes = [2, 128], strides = [1, 1]} : vector<2x256xf32> to vector<2x128xf32>
    %631 = arith.addf %629, %630 : vector<2x128xf32>
    %632 = vector.extract_strided_slice %625 {offsets = [0, 0], sizes = [2, 32], strides = [1, 1]} : vector<2x128xf32> to vector<2x32xf32>
    %633 = arith.negf %632 : vector<2x32xf32>
    %634 = math.exp %633 : vector<2x32xf32>
    %cst_171 = arith.constant 1.000000e+00 : f32
    %635 = vector.broadcast %cst_171 : f32 to vector<2x32xf32>
    %636 = arith.addf %635, %634 : vector<2x32xf32>
    %637 = arith.divf %635, %636 : vector<2x32xf32>
    %638 = vector.extract_strided_slice %625 {offsets = [0, 32], sizes = [2, 32], strides = [1, 1]} : vector<2x128xf32> to vector<2x32xf32>
    %639 = arith.negf %638 : vector<2x32xf32>
    %640 = math.exp %639 : vector<2x32xf32>
    %cst_172 = arith.constant 1.000000e+00 : f32
    %641 = vector.broadcast %cst_172 : f32 to vector<2x32xf32>
    %642 = arith.addf %641, %640 : vector<2x32xf32>
    %643 = arith.divf %641, %642 : vector<2x32xf32>
    %644 = vector.extract_strided_slice %625 {offsets = [0, 64], sizes = [2, 32], strides = [1, 1]} : vector<2x128xf32> to vector<2x32xf32>
    %645 = math.tanh %644 : vector<2x32xf32>
    %646 = vector.extract_strided_slice %625 {offsets = [0, 96], sizes = [2, 32], strides = [1, 1]} : vector<2x128xf32> to vector<2x32xf32>
    %647 = arith.negf %646 : vector<2x32xf32>
    %648 = math.exp %647 : vector<2x32xf32>
    %cst_173 = arith.constant 1.000000e+00 : f32
    %649 = vector.broadcast %cst_173 : f32 to vector<2x32xf32>
    %650 = arith.addf %649, %648 : vector<2x32xf32>
    %651 = arith.divf %649, %650 : vector<2x32xf32>
    %652 = arith.mulf %643, %578 : vector<2x32xf32>
    %653 = arith.mulf %637, %645 : vector<2x32xf32>
    %654 = arith.addf %652, %653 : vector<2x32xf32>
    %655 = math.tanh %654 : vector<2x32xf32>
    %656 = arith.mulf %651, %655 : vector<2x32xf32>
    %657 = vector.extract_strided_slice %631 {offsets = [0, 0], sizes = [2, 32], strides = [1, 1]} : vector<2x128xf32> to vector<2x32xf32>
    %658 = arith.negf %657 : vector<2x32xf32>
    %659 = math.exp %658 : vector<2x32xf32>
    %cst_174 = arith.constant 1.000000e+00 : f32
    %660 = vector.broadcast %cst_174 : f32 to vector<2x32xf32>
    %661 = arith.addf %660, %659 : vector<2x32xf32>
    %662 = arith.divf %660, %661 : vector<2x32xf32>
    %663 = vector.extract_strided_slice %631 {offsets = [0, 32], sizes = [2, 32], strides = [1, 1]} : vector<2x128xf32> to vector<2x32xf32>
    %664 = arith.negf %663 : vector<2x32xf32>
    %665 = math.exp %664 : vector<2x32xf32>
    %cst_175 = arith.constant 1.000000e+00 : f32
    %666 = vector.broadcast %cst_175 : f32 to vector<2x32xf32>
    %667 = arith.addf %666, %665 : vector<2x32xf32>
    %668 = arith.divf %666, %667 : vector<2x32xf32>
    %669 = vector.extract_strided_slice %631 {offsets = [0, 64], sizes = [2, 32], strides = [1, 1]} : vector<2x128xf32> to vector<2x32xf32>
    %670 = math.tanh %669 : vector<2x32xf32>
    %671 = vector.extract_strided_slice %631 {offsets = [0, 96], sizes = [2, 32], strides = [1, 1]} : vector<2x128xf32> to vector<2x32xf32>
    %672 = arith.negf %671 : vector<2x32xf32>
    %673 = math.exp %672 : vector<2x32xf32>
    %cst_176 = arith.constant 1.000000e+00 : f32
    %674 = vector.broadcast %cst_176 : f32 to vector<2x32xf32>
    %675 = arith.addf %674, %673 : vector<2x32xf32>
    %676 = arith.divf %674, %675 : vector<2x32xf32>
    %677 = arith.mulf %668, %603 : vector<2x32xf32>
    %678 = arith.mulf %662, %670 : vector<2x32xf32>
    %679 = arith.addf %677, %678 : vector<2x32xf32>
    %680 = math.tanh %679 : vector<2x32xf32>
    %681 = arith.mulf %676, %680 : vector<2x32xf32>
    %682 = arith.truncf %656 : vector<2x32xf32> to vector<2x32xbf16>
    %683 = arith.index_cast %c7_i32_164 : i32 to index
    %c0_177 = arith.constant 0 : index
    %c0_178 = arith.constant 0 : index
    %684 = vector.load %arg5[%683, %c0_177, %c0_178] : memref<8x2x64xbf16, #tpu.memory_space<vmem>>, vector<1x2x32xbf16>
    %685 = vector.shape_cast %684 : vector<1x2x32xbf16> to vector<2x32xbf16>
    %686 = vector.shape_cast %682 : vector<2x32xbf16> to vector<1x2x32xbf16>
    tpu.vector_store %arg5[%683, %c0_177, %c0_178], %686 {strides = array<i32>} : memref<8x2x64xbf16, #tpu.memory_space<vmem>>, vector<1x2x32xbf16>,
    %687 = arith.truncf %681 : vector<2x32xf32> to vector<2x32xbf16>
    %688 = arith.index_cast %617 : i32 to index
    %c0_179 = arith.constant 0 : index
    %c32_180 = arith.constant 32 : index
    %689 = vector.load %arg5[%688, %c0_179, %c32_180] : memref<8x2x64xbf16, #tpu.memory_space<vmem>>, vector<1x2x32xbf16>
    %690 = vector.shape_cast %689 : vector<1x2x32xbf16> to vector<2x32xbf16>
    %691 = vector.shape_cast %687 : vector<2x32xbf16> to vector<1x2x32xbf16>
    tpu.vector_store %arg5[%688, %c0_179, %c32_180], %691 {strides = array<i32>} : memref<8x2x64xbf16, #tpu.memory_space<vmem>>, vector<1x2x32xbf16>,
    %692 = tpu.concatenate %656, %681 in 1 : vector<2x32xf32>, vector<2x32xf32> -> vector<2x64xf32>
    %c8_i32_181 = arith.constant 8 : i32
    return
  }
  func.func @transform_0(%arg0: i32) -> (i32, i32, i32) {
    %c0_i32 = arith.constant 0 : i32
    %c0_i32_0 = arith.constant 0 : i32
    %c0_i32_1 = arith.constant 0 : i32
    return %c0_i32, %arg0, %c0_i32_0 : i32, i32, i32
  }
  func.func @transform_1(%arg0: i32) -> (i32, i32) {
    %c0_i32 = arith.constant 0 : i32
    %c0_i32_0 = arith.constant 0 : i32
    %c0_i32_1 = arith.constant 0 : i32
    return %c0_i32, %c0_i32_0 : i32, i32
  }
  func.func @transform_2(%arg0: i32) -> (i32, i32) {
    %c0_i32 = arith.constant 0 : i32
    %c0_i32_0 = arith.constant 0 : i32
    %c0_i32_1 = arith.constant 0 : i32
    return %c0_i32, %c0_i32_0 : i32, i32
  }
  func.func @transform_3(%arg0: i32) -> (i32, i32) {
    %c0_i32 = arith.constant 0 : i32
    %c0_i32_0 = arith.constant 0 : i32
    %c0_i32_1 = arith.constant 0 : i32
    return %c0_i32, %c0_i32_0 : i32, i32
  }
  func.func @transform_4(%arg0: i32) -> (i32, i32, i32) {
    %c0_i32 = arith.constant 0 : i32
    %c0_i32_0 = arith.constant 0 : i32
    %c0_i32_1 = arith.constant 0 : i32
    return %c0_i32, %arg0, %c0_i32_0 : i32, i32, i32
  }
}

module attributes {stable_mosaic.version = 11 : i64} {
  func.func @bilstm_kernel(%arg0: i32, %arg1: memref<8x2x64xbf16, #tpu.memory_space<vmem>>, %arg2: memref<64x256xbf16, #tpu.memory_space<vmem>>, %arg3: memref<1x256xf32, #tpu.memory_space<vmem>>, %arg4: memref<64x256xbf16, #tpu.memory_space<vmem>>, %arg5: memref<8x2x64xbf16, #tpu.memory_space<vmem>>, %arg6: memref<8x2x256xf32, #tpu.memory_space<vmem>>) attributes {dimension_semantics = [#tpu.dimension_semantics<parallel>], iteration_bounds = array<i64: 1>, scalar_prefetch = 0 : i64, scratch_operands = 1 : i64, tpu.core_type = #tpu.core_type<tc>, window_params = [{transform_indices = @transform_0, window_bounds = array<i64: 8, 2, 64>}, {pipeline_mode = #tpu.pipeline_mode<synchronous>, transform_indices = @transform_1, window_bounds = array<i64: 64, 256>}, {pipeline_mode = #tpu.pipeline_mode<synchronous>, transform_indices = @transform_2, window_bounds = array<i64: 1, 256>}, {pipeline_mode = #tpu.pipeline_mode<synchronous>, transform_indices = @transform_3, window_bounds = array<i64: 64, 256>}, {transform_indices = @transform_4, window_bounds = array<i64: 8, 2, 64>}]} {
    %c0 = arith.constant 0 : index
    %c0_0 = arith.constant 0 : index
    %0 = vector.load %arg2[%c0, %c0_0] : memref<64x256xbf16, #tpu.memory_space<vmem>>, vector<64x256xbf16>
    %c0_1 = arith.constant 0 : index
    %c0_2 = arith.constant 0 : index
    %1 = vector.load %arg3[%c0_1, %c0_2] : memref<1x256xf32, #tpu.memory_space<vmem>>, vector<1x256xf32>
    %c0_3 = arith.constant 0 : index
    %c0_4 = arith.constant 0 : index
    %2 = vector.load %arg4[%c0_3, %c0_4] : memref<64x256xbf16, #tpu.memory_space<vmem>>, vector<64x256xbf16>
    %c0_i32 = arith.constant 0 : i32
    %3 = arith.index_cast %c0_i32 : i32 to index
    %c0_5 = arith.constant 0 : index
    %c0_6 = arith.constant 0 : index
    %4 = vector.load %arg1[%3, %c0_5, %c0_6] : memref<8x2x64xbf16, #tpu.memory_space<vmem>>, vector<1x2x64xbf16>
    %5 = vector.shape_cast %4 : vector<1x2x64xbf16> to vector<2x64xbf16>
    %cst = arith.constant dense<0.000000e+00> : vector<2x256xf32>
    %6 = tpu.matmul %5, %0, %cst {dimension_numbers = #tpu.dot_dimension_numbers<[1], [0], [0], [1], [0, 0, 1, 1], [], []>} : vector<2x64xbf16>, vector<64x256xbf16>, vector<2x256xf32> -> vector<2x256xf32>
    %7 = vector.broadcast %1 : vector<1x256xf32> to vector<2x256xf32>
    %8 = arith.addf %6, %7 : vector<2x256xf32>
    %9 = arith.index_cast %c0_i32 : i32 to index
    %c0_7 = arith.constant 0 : index
    %c0_8 = arith.constant 0 : index
    %10 = vector.load %arg6[%9, %c0_7, %c0_8] : memref<8x2x256xf32, #tpu.memory_space<vmem>>, vector<1x2x256xf32>
    %11 = vector.shape_cast %10 : vector<1x2x256xf32> to vector<2x256xf32>
    %12 = vector.shape_cast %8 : vector<2x256xf32> to vector<1x2x256xf32>
    tpu.vector_store %arg6[%9, %c0_7, %c0_8], %12 {strides = array<i32>} : memref<8x2x256xf32, #tpu.memory_space<vmem>>, vector<1x2x256xf32>,
    %c1_i32 = arith.constant 1 : i32
    %13 = arith.index_cast %c1_i32 : i32 to index
    %c0_9 = arith.constant 0 : index
    %c0_10 = arith.constant 0 : index
    %14 = vector.load %arg1[%13, %c0_9, %c0_10] : memref<8x2x64xbf16, #tpu.memory_space<vmem>>, vector<1x2x64xbf16>
    %15 = vector.shape_cast %14 : vector<1x2x64xbf16> to vector<2x64xbf16>
    %cst_11 = arith.constant dense<0.000000e+00> : vector<2x256xf32>
    %16 = tpu.matmul %15, %0, %cst_11 {dimension_numbers = #tpu.dot_dimension_numbers<[1], [0], [0], [1], [0, 0, 1, 1], [], []>} : vector<2x64xbf16>, vector<64x256xbf16>, vector<2x256xf32> -> vector<2x256xf32>
    %17 = vector.broadcast %1 : vector<1x256xf32> to vector<2x256xf32>
    %18 = arith.addf %16, %17 : vector<2x256xf32>
    %19 = arith.index_cast %c1_i32 : i32 to index
    %c0_12 = arith.constant 0 : index
    %c0_13 = arith.constant 0 : index
    %20 = vector.load %arg6[%19, %c0_12, %c0_13] : memref<8x2x256xf32, #tpu.memory_space<vmem>>, vector<1x2x256xf32>
    %21 = vector.shape_cast %20 : vector<1x2x256xf32> to vector<2x256xf32>
    %22 = vector.shape_cast %18 : vector<2x256xf32> to vector<1x2x256xf32>
    tpu.vector_store %arg6[%19, %c0_12, %c0_13], %22 {strides = array<i32>} : memref<8x2x256xf32, #tpu.memory_space<vmem>>, vector<1x2x256xf32>,
    %c2_i32 = arith.constant 2 : i32
    %23 = arith.index_cast %c2_i32 : i32 to index
    %c0_14 = arith.constant 0 : index
    %c0_15 = arith.constant 0 : index
    %24 = vector.load %arg1[%23, %c0_14, %c0_15] : memref<8x2x64xbf16, #tpu.memory_space<vmem>>, vector<1x2x64xbf16>
    %25 = vector.shape_cast %24 : vector<1x2x64xbf16> to vector<2x64xbf16>
    %cst_16 = arith.constant dense<0.000000e+00> : vector<2x256xf32>
    %26 = tpu.matmul %25, %0, %cst_16 {dimension_numbers = #tpu.dot_dimension_numbers<[1], [0], [0], [1], [0, 0, 1, 1], [], []>} : vector<2x64xbf16>, vector<64x256xbf16>, vector<2x256xf32> -> vector<2x256xf32>
    %27 = vector.broadcast %1 : vector<1x256xf32> to vector<2x256xf32>
    %28 = arith.addf %26, %27 : vector<2x256xf32>
    %29 = arith.index_cast %c2_i32 : i32 to index
    %c0_17 = arith.constant 0 : index
    %c0_18 = arith.constant 0 : index
    %30 = vector.load %arg6[%29, %c0_17, %c0_18] : memref<8x2x256xf32, #tpu.memory_space<vmem>>, vector<1x2x256xf32>
    %31 = vector.shape_cast %30 : vector<1x2x256xf32> to vector<2x256xf32>
    %32 = vector.shape_cast %28 : vector<2x256xf32> to vector<1x2x256xf32>
    tpu.vector_store %arg6[%29, %c0_17, %c0_18], %32 {strides = array<i32>} : memref<8x2x256xf32, #tpu.memory_space<vmem>>, vector<1x2x256xf32>,
    %c3_i32 = arith.constant 3 : i32
    %33 = arith.index_cast %c3_i32 : i32 to index
    %c0_19 = arith.constant 0 : index
    %c0_20 = arith.constant 0 : index
    %34 = vector.load %arg1[%33, %c0_19, %c0_20] : memref<8x2x64xbf16, #tpu.memory_space<vmem>>, vector<1x2x64xbf16>
    %35 = vector.shape_cast %34 : vector<1x2x64xbf16> to vector<2x64xbf16>
    %cst_21 = arith.constant dense<0.000000e+00> : vector<2x256xf32>
    %36 = tpu.matmul %35, %0, %cst_21 {dimension_numbers = #tpu.dot_dimension_numbers<[1], [0], [0], [1], [0, 0, 1, 1], [], []>} : vector<2x64xbf16>, vector<64x256xbf16>, vector<2x256xf32> -> vector<2x256xf32>
    %37 = vector.broadcast %1 : vector<1x256xf32> to vector<2x256xf32>
    %38 = arith.addf %36, %37 : vector<2x256xf32>
    %39 = arith.index_cast %c3_i32 : i32 to index
    %c0_22 = arith.constant 0 : index
    %c0_23 = arith.constant 0 : index
    %40 = vector.load %arg6[%39, %c0_22, %c0_23] : memref<8x2x256xf32, #tpu.memory_space<vmem>>, vector<1x2x256xf32>
    %41 = vector.shape_cast %40 : vector<1x2x256xf32> to vector<2x256xf32>
    %42 = vector.shape_cast %38 : vector<2x256xf32> to vector<1x2x256xf32>
    tpu.vector_store %arg6[%39, %c0_22, %c0_23], %42 {strides = array<i32>} : memref<8x2x256xf32, #tpu.memory_space<vmem>>, vector<1x2x256xf32>,
    %c4_i32 = arith.constant 4 : i32
    %43 = arith.index_cast %c4_i32 : i32 to index
    %c0_24 = arith.constant 0 : index
    %c0_25 = arith.constant 0 : index
    %44 = vector.load %arg1[%43, %c0_24, %c0_25] : memref<8x2x64xbf16, #tpu.memory_space<vmem>>, vector<1x2x64xbf16>
    %45 = vector.shape_cast %44 : vector<1x2x64xbf16> to vector<2x64xbf16>
    %cst_26 = arith.constant dense<0.000000e+00> : vector<2x256xf32>
    %46 = tpu.matmul %45, %0, %cst_26 {dimension_numbers = #tpu.dot_dimension_numbers<[1], [0], [0], [1], [0, 0, 1, 1], [], []>} : vector<2x64xbf16>, vector<64x256xbf16>, vector<2x256xf32> -> vector<2x256xf32>
    %47 = vector.broadcast %1 : vector<1x256xf32> to vector<2x256xf32>
    %48 = arith.addf %46, %47 : vector<2x256xf32>
    %49 = arith.index_cast %c4_i32 : i32 to index
    %c0_27 = arith.constant 0 : index
    %c0_28 = arith.constant 0 : index
    %50 = vector.load %arg6[%49, %c0_27, %c0_28] : memref<8x2x256xf32, #tpu.memory_space<vmem>>, vector<1x2x256xf32>
    %51 = vector.shape_cast %50 : vector<1x2x256xf32> to vector<2x256xf32>
    %52 = vector.shape_cast %48 : vector<2x256xf32> to vector<1x2x256xf32>
    tpu.vector_store %arg6[%49, %c0_27, %c0_28], %52 {strides = array<i32>} : memref<8x2x256xf32, #tpu.memory_space<vmem>>, vector<1x2x256xf32>,
    %c5_i32 = arith.constant 5 : i32
    %53 = arith.index_cast %c5_i32 : i32 to index
    %c0_29 = arith.constant 0 : index
    %c0_30 = arith.constant 0 : index
    %54 = vector.load %arg1[%53, %c0_29, %c0_30] : memref<8x2x64xbf16, #tpu.memory_space<vmem>>, vector<1x2x64xbf16>
    %55 = vector.shape_cast %54 : vector<1x2x64xbf16> to vector<2x64xbf16>
    %cst_31 = arith.constant dense<0.000000e+00> : vector<2x256xf32>
    %56 = tpu.matmul %55, %0, %cst_31 {dimension_numbers = #tpu.dot_dimension_numbers<[1], [0], [0], [1], [0, 0, 1, 1], [], []>} : vector<2x64xbf16>, vector<64x256xbf16>, vector<2x256xf32> -> vector<2x256xf32>
    %57 = vector.broadcast %1 : vector<1x256xf32> to vector<2x256xf32>
    %58 = arith.addf %56, %57 : vector<2x256xf32>
    %59 = arith.index_cast %c5_i32 : i32 to index
    %c0_32 = arith.constant 0 : index
    %c0_33 = arith.constant 0 : index
    %60 = vector.load %arg6[%59, %c0_32, %c0_33] : memref<8x2x256xf32, #tpu.memory_space<vmem>>, vector<1x2x256xf32>
    %61 = vector.shape_cast %60 : vector<1x2x256xf32> to vector<2x256xf32>
    %62 = vector.shape_cast %58 : vector<2x256xf32> to vector<1x2x256xf32>
    tpu.vector_store %arg6[%59, %c0_32, %c0_33], %62 {strides = array<i32>} : memref<8x2x256xf32, #tpu.memory_space<vmem>>, vector<1x2x256xf32>,
    %c6_i32 = arith.constant 6 : i32
    %63 = arith.index_cast %c6_i32 : i32 to index
    %c0_34 = arith.constant 0 : index
    %c0_35 = arith.constant 0 : index
    %64 = vector.load %arg1[%63, %c0_34, %c0_35] : memref<8x2x64xbf16, #tpu.memory_space<vmem>>, vector<1x2x64xbf16>
    %65 = vector.shape_cast %64 : vector<1x2x64xbf16> to vector<2x64xbf16>
    %cst_36 = arith.constant dense<0.000000e+00> : vector<2x256xf32>
    %66 = tpu.matmul %65, %0, %cst_36 {dimension_numbers = #tpu.dot_dimension_numbers<[1], [0], [0], [1], [0, 0, 1, 1], [], []>} : vector<2x64xbf16>, vector<64x256xbf16>, vector<2x256xf32> -> vector<2x256xf32>
    %67 = vector.broadcast %1 : vector<1x256xf32> to vector<2x256xf32>
    %68 = arith.addf %66, %67 : vector<2x256xf32>
    %69 = arith.index_cast %c6_i32 : i32 to index
    %c0_37 = arith.constant 0 : index
    %c0_38 = arith.constant 0 : index
    %70 = vector.load %arg6[%69, %c0_37, %c0_38] : memref<8x2x256xf32, #tpu.memory_space<vmem>>, vector<1x2x256xf32>
    %71 = vector.shape_cast %70 : vector<1x2x256xf32> to vector<2x256xf32>
    %72 = vector.shape_cast %68 : vector<2x256xf32> to vector<1x2x256xf32>
    tpu.vector_store %arg6[%69, %c0_37, %c0_38], %72 {strides = array<i32>} : memref<8x2x256xf32, #tpu.memory_space<vmem>>, vector<1x2x256xf32>,
    %c7_i32 = arith.constant 7 : i32
    %73 = arith.index_cast %c7_i32 : i32 to index
    %c0_39 = arith.constant 0 : index
    %c0_40 = arith.constant 0 : index
    %74 = vector.load %arg1[%73, %c0_39, %c0_40] : memref<8x2x64xbf16, #tpu.memory_space<vmem>>, vector<1x2x64xbf16>
    %75 = vector.shape_cast %74 : vector<1x2x64xbf16> to vector<2x64xbf16>
    %cst_41 = arith.constant dense<0.000000e+00> : vector<2x256xf32>
    %76 = tpu.matmul %75, %0, %cst_41 {dimension_numbers = #tpu.dot_dimension_numbers<[1], [0], [0], [1], [0, 0, 1, 1], [], []>} : vector<2x64xbf16>, vector<64x256xbf16>, vector<2x256xf32> -> vector<2x256xf32>
    %77 = vector.broadcast %1 : vector<1x256xf32> to vector<2x256xf32>
    %78 = arith.addf %76, %77 : vector<2x256xf32>
    %79 = arith.index_cast %c7_i32 : i32 to index
    %c0_42 = arith.constant 0 : index
    %c0_43 = arith.constant 0 : index
    %80 = vector.load %arg6[%79, %c0_42, %c0_43] : memref<8x2x256xf32, #tpu.memory_space<vmem>>, vector<1x2x256xf32>
    %81 = vector.shape_cast %80 : vector<1x2x256xf32> to vector<2x256xf32>
    %82 = vector.shape_cast %78 : vector<2x256xf32> to vector<1x2x256xf32>
    tpu.vector_store %arg6[%79, %c0_42, %c0_43], %82 {strides = array<i32>} : memref<8x2x256xf32, #tpu.memory_space<vmem>>, vector<1x2x256xf32>,
    %c8_i32 = arith.constant 8 : i32
    %cst_44 = arith.constant 0.000000e+00 : f32
    %83 = vector.broadcast %cst_44 : f32 to vector<2x64xf32>
    %cst_45 = arith.constant 0.000000e+00 : f32
    %84 = vector.broadcast %cst_45 : f32 to vector<2x32xf32>
    %c0_i32_46 = arith.constant 0 : i32
    %c7_i32_47 = arith.constant 7 : i32
    %85 = arith.subi %c7_i32_47, %c0_i32_46 : i32
    %86 = arith.truncf %83 : vector<2x64xf32> to vector<2x64xbf16>
    %cst_48 = arith.constant dense<0.000000e+00> : vector<2x256xf32>
    %87 = tpu.matmul %86, %2, %cst_48 {dimension_numbers = #tpu.dot_dimension_numbers<[1], [0], [0], [1], [0, 0, 1, 1], [], []>} : vector<2x64xbf16>, vector<64x256xbf16>, vector<2x256xf32> -> vector<2x256xf32>
    %88 = arith.index_cast %c0_i32_46 : i32 to index
    %c0_49 = arith.constant 0 : index
    %c0_50 = arith.constant 0 : index
    %89 = vector.load %arg6[%88, %c0_49, %c0_50] : memref<8x2x256xf32, #tpu.memory_space<vmem>>, vector<1x2x256xf32>
    %90 = vector.shape_cast %89 : vector<1x2x256xf32> to vector<2x256xf32>
    %91 = vector.extract_strided_slice %90 {offsets = [0, 0], sizes = [2, 128], strides = [1, 1]} : vector<2x256xf32> to vector<2x128xf32>
    %92 = vector.extract_strided_slice %87 {offsets = [0, 0], sizes = [2, 128], strides = [1, 1]} : vector<2x256xf32> to vector<2x128xf32>
    %93 = arith.addf %91, %92 : vector<2x128xf32>
    %94 = arith.index_cast %85 : i32 to index
    %c0_51 = arith.constant 0 : index
    %c0_52 = arith.constant 0 : index
    %95 = vector.load %arg6[%94, %c0_51, %c0_52] : memref<8x2x256xf32, #tpu.memory_space<vmem>>, vector<1x2x256xf32>
    %96 = vector.shape_cast %95 : vector<1x2x256xf32> to vector<2x256xf32>
    %97 = vector.extract_strided_slice %96 {offsets = [0, 128], sizes = [2, 128], strides = [1, 1]} : vector<2x256xf32> to vector<2x128xf32>
    %98 = vector.extract_strided_slice %87 {offsets = [0, 128], sizes = [2, 128], strides = [1, 1]} : vector<2x256xf32> to vector<2x128xf32>
    %99 = arith.addf %97, %98 : vector<2x128xf32>
    %100 = vector.extract_strided_slice %93 {offsets = [0, 0], sizes = [2, 32], strides = [1, 1]} : vector<2x128xf32> to vector<2x32xf32>
    %101 = arith.negf %100 : vector<2x32xf32>
    %102 = math.exp %101 : vector<2x32xf32>
    %cst_53 = arith.constant 1.000000e+00 : f32
    %103 = vector.broadcast %cst_53 : f32 to vector<2x32xf32>
    %104 = arith.addf %103, %102 : vector<2x32xf32>
    %105 = arith.divf %103, %104 : vector<2x32xf32>
    %106 = vector.extract_strided_slice %93 {offsets = [0, 32], sizes = [2, 32], strides = [1, 1]} : vector<2x128xf32> to vector<2x32xf32>
    %107 = arith.negf %106 : vector<2x32xf32>
    %108 = math.exp %107 : vector<2x32xf32>
    %cst_54 = arith.constant 1.000000e+00 : f32
    %109 = vector.broadcast %cst_54 : f32 to vector<2x32xf32>
    %110 = arith.addf %109, %108 : vector<2x32xf32>
    %111 = arith.divf %109, %110 : vector<2x32xf32>
    %112 = vector.extract_strided_slice %93 {offsets = [0, 64], sizes = [2, 32], strides = [1, 1]} : vector<2x128xf32> to vector<2x32xf32>
    %113 = math.tanh %112 : vector<2x32xf32>
    %114 = vector.extract_strided_slice %93 {offsets = [0, 96], sizes = [2, 32], strides = [1, 1]} : vector<2x128xf32> to vector<2x32xf32>
    %115 = arith.negf %114 : vector<2x32xf32>
    %116 = math.exp %115 : vector<2x32xf32>
    %cst_55 = arith.constant 1.000000e+00 : f32
    %117 = vector.broadcast %cst_55 : f32 to vector<2x32xf32>
    %118 = arith.addf %117, %116 : vector<2x32xf32>
    %119 = arith.divf %117, %118 : vector<2x32xf32>
    %120 = arith.mulf %111, %84 : vector<2x32xf32>
    %121 = arith.mulf %105, %113 : vector<2x32xf32>
    %122 = arith.addf %120, %121 : vector<2x32xf32>
    %123 = math.tanh %122 : vector<2x32xf32>
    %124 = arith.mulf %119, %123 : vector<2x32xf32>
    %125 = vector.extract_strided_slice %99 {offsets = [0, 0], sizes = [2, 32], strides = [1, 1]} : vector<2x128xf32> to vector<2x32xf32>
    %126 = arith.negf %125 : vector<2x32xf32>
    %127 = math.exp %126 : vector<2x32xf32>
    %cst_56 = arith.constant 1.000000e+00 : f32
    %128 = vector.broadcast %cst_56 : f32 to vector<2x32xf32>
    %129 = arith.addf %128, %127 : vector<2x32xf32>
    %130 = arith.divf %128, %129 : vector<2x32xf32>
    %131 = vector.extract_strided_slice %99 {offsets = [0, 32], sizes = [2, 32], strides = [1, 1]} : vector<2x128xf32> to vector<2x32xf32>
    %132 = arith.negf %131 : vector<2x32xf32>
    %133 = math.exp %132 : vector<2x32xf32>
    %cst_57 = arith.constant 1.000000e+00 : f32
    %134 = vector.broadcast %cst_57 : f32 to vector<2x32xf32>
    %135 = arith.addf %134, %133 : vector<2x32xf32>
    %136 = arith.divf %134, %135 : vector<2x32xf32>
    %137 = vector.extract_strided_slice %99 {offsets = [0, 64], sizes = [2, 32], strides = [1, 1]} : vector<2x128xf32> to vector<2x32xf32>
    %138 = math.tanh %137 : vector<2x32xf32>
    %139 = vector.extract_strided_slice %99 {offsets = [0, 96], sizes = [2, 32], strides = [1, 1]} : vector<2x128xf32> to vector<2x32xf32>
    %140 = arith.negf %139 : vector<2x32xf32>
    %141 = math.exp %140 : vector<2x32xf32>
    %cst_58 = arith.constant 1.000000e+00 : f32
    %142 = vector.broadcast %cst_58 : f32 to vector<2x32xf32>
    %143 = arith.addf %142, %141 : vector<2x32xf32>
    %144 = arith.divf %142, %143 : vector<2x32xf32>
    %145 = arith.mulf %136, %84 : vector<2x32xf32>
    %146 = arith.mulf %130, %138 : vector<2x32xf32>
    %147 = arith.addf %145, %146 : vector<2x32xf32>
    %148 = math.tanh %147 : vector<2x32xf32>
    %149 = arith.mulf %144, %148 : vector<2x32xf32>
    %150 = arith.truncf %124 : vector<2x32xf32> to vector<2x32xbf16>
    %151 = arith.index_cast %c0_i32_46 : i32 to index
    %c0_59 = arith.constant 0 : index
    %c0_60 = arith.constant 0 : index
    %152 = vector.load %arg5[%151, %c0_59, %c0_60] : memref<8x2x64xbf16, #tpu.memory_space<vmem>>, vector<1x2x32xbf16>
    %153 = vector.shape_cast %152 : vector<1x2x32xbf16> to vector<2x32xbf16>
    %154 = vector.shape_cast %150 : vector<2x32xbf16> to vector<1x2x32xbf16>
    tpu.vector_store %arg5[%151, %c0_59, %c0_60], %154 {strides = array<i32>} : memref<8x2x64xbf16, #tpu.memory_space<vmem>>, vector<1x2x32xbf16>,
    %155 = arith.truncf %149 : vector<2x32xf32> to vector<2x32xbf16>
    %156 = arith.index_cast %85 : i32 to index
    %c0_61 = arith.constant 0 : index
    %c32 = arith.constant 32 : index
    %157 = vector.load %arg5[%156, %c0_61, %c32] : memref<8x2x64xbf16, #tpu.memory_space<vmem>>, vector<1x2x32xbf16>
    %158 = vector.shape_cast %157 : vector<1x2x32xbf16> to vector<2x32xbf16>
    %159 = vector.shape_cast %155 : vector<2x32xbf16> to vector<1x2x32xbf16>
    tpu.vector_store %arg5[%156, %c0_61, %c32], %159 {strides = array<i32>} : memref<8x2x64xbf16, #tpu.memory_space<vmem>>, vector<1x2x32xbf16>,
    %160 = tpu.concatenate %124, %149 in 1 : vector<2x32xf32>, vector<2x32xf32> -> vector<2x64xf32>
    %c1_i32_62 = arith.constant 1 : i32
    %c7_i32_63 = arith.constant 7 : i32
    %161 = arith.subi %c7_i32_63, %c1_i32_62 : i32
    %162 = arith.truncf %160 : vector<2x64xf32> to vector<2x64xbf16>
    %cst_64 = arith.constant dense<0.000000e+00> : vector<2x256xf32>
    %163 = tpu.matmul %162, %2, %cst_64 {dimension_numbers = #tpu.dot_dimension_numbers<[1], [0], [0], [1], [0, 0, 1, 1], [], []>} : vector<2x64xbf16>, vector<64x256xbf16>, vector<2x256xf32> -> vector<2x256xf32>
    %164 = arith.index_cast %c1_i32_62 : i32 to index
    %c0_65 = arith.constant 0 : index
    %c0_66 = arith.constant 0 : index
    %165 = vector.load %arg6[%164, %c0_65, %c0_66] : memref<8x2x256xf32, #tpu.memory_space<vmem>>, vector<1x2x256xf32>
    %166 = vector.shape_cast %165 : vector<1x2x256xf32> to vector<2x256xf32>
    %167 = vector.extract_strided_slice %166 {offsets = [0, 0], sizes = [2, 128], strides = [1, 1]} : vector<2x256xf32> to vector<2x128xf32>
    %168 = vector.extract_strided_slice %163 {offsets = [0, 0], sizes = [2, 128], strides = [1, 1]} : vector<2x256xf32> to vector<2x128xf32>
    %169 = arith.addf %167, %168 : vector<2x128xf32>
    %170 = arith.index_cast %161 : i32 to index
    %c0_67 = arith.constant 0 : index
    %c0_68 = arith.constant 0 : index
    %171 = vector.load %arg6[%170, %c0_67, %c0_68] : memref<8x2x256xf32, #tpu.memory_space<vmem>>, vector<1x2x256xf32>
    %172 = vector.shape_cast %171 : vector<1x2x256xf32> to vector<2x256xf32>
    %173 = vector.extract_strided_slice %172 {offsets = [0, 128], sizes = [2, 128], strides = [1, 1]} : vector<2x256xf32> to vector<2x128xf32>
    %174 = vector.extract_strided_slice %163 {offsets = [0, 128], sizes = [2, 128], strides = [1, 1]} : vector<2x256xf32> to vector<2x128xf32>
    %175 = arith.addf %173, %174 : vector<2x128xf32>
    %176 = vector.extract_strided_slice %169 {offsets = [0, 0], sizes = [2, 32], strides = [1, 1]} : vector<2x128xf32> to vector<2x32xf32>
    %177 = arith.negf %176 : vector<2x32xf32>
    %178 = math.exp %177 : vector<2x32xf32>
    %cst_69 = arith.constant 1.000000e+00 : f32
    %179 = vector.broadcast %cst_69 : f32 to vector<2x32xf32>
    %180 = arith.addf %179, %178 : vector<2x32xf32>
    %181 = arith.divf %179, %180 : vector<2x32xf32>
    %182 = vector.extract_strided_slice %169 {offsets = [0, 32], sizes = [2, 32], strides = [1, 1]} : vector<2x128xf32> to vector<2x32xf32>
    %183 = arith.negf %182 : vector<2x32xf32>
    %184 = math.exp %183 : vector<2x32xf32>
    %cst_70 = arith.constant 1.000000e+00 : f32
    %185 = vector.broadcast %cst_70 : f32 to vector<2x32xf32>
    %186 = arith.addf %185, %184 : vector<2x32xf32>
    %187 = arith.divf %185, %186 : vector<2x32xf32>
    %188 = vector.extract_strided_slice %169 {offsets = [0, 64], sizes = [2, 32], strides = [1, 1]} : vector<2x128xf32> to vector<2x32xf32>
    %189 = math.tanh %188 : vector<2x32xf32>
    %190 = vector.extract_strided_slice %169 {offsets = [0, 96], sizes = [2, 32], strides = [1, 1]} : vector<2x128xf32> to vector<2x32xf32>
    %191 = arith.negf %190 : vector<2x32xf32>
    %192 = math.exp %191 : vector<2x32xf32>
    %cst_71 = arith.constant 1.000000e+00 : f32
    %193 = vector.broadcast %cst_71 : f32 to vector<2x32xf32>
    %194 = arith.addf %193, %192 : vector<2x32xf32>
    %195 = arith.divf %193, %194 : vector<2x32xf32>
    %196 = arith.mulf %187, %122 : vector<2x32xf32>
    %197 = arith.mulf %181, %189 : vector<2x32xf32>
    %198 = arith.addf %196, %197 : vector<2x32xf32>
    %199 = math.tanh %198 : vector<2x32xf32>
    %200 = arith.mulf %195, %199 : vector<2x32xf32>
    %201 = vector.extract_strided_slice %175 {offsets = [0, 0], sizes = [2, 32], strides = [1, 1]} : vector<2x128xf32> to vector<2x32xf32>
    %202 = arith.negf %201 : vector<2x32xf32>
    %203 = math.exp %202 : vector<2x32xf32>
    %cst_72 = arith.constant 1.000000e+00 : f32
    %204 = vector.broadcast %cst_72 : f32 to vector<2x32xf32>
    %205 = arith.addf %204, %203 : vector<2x32xf32>
    %206 = arith.divf %204, %205 : vector<2x32xf32>
    %207 = vector.extract_strided_slice %175 {offsets = [0, 32], sizes = [2, 32], strides = [1, 1]} : vector<2x128xf32> to vector<2x32xf32>
    %208 = arith.negf %207 : vector<2x32xf32>
    %209 = math.exp %208 : vector<2x32xf32>
    %cst_73 = arith.constant 1.000000e+00 : f32
    %210 = vector.broadcast %cst_73 : f32 to vector<2x32xf32>
    %211 = arith.addf %210, %209 : vector<2x32xf32>
    %212 = arith.divf %210, %211 : vector<2x32xf32>
    %213 = vector.extract_strided_slice %175 {offsets = [0, 64], sizes = [2, 32], strides = [1, 1]} : vector<2x128xf32> to vector<2x32xf32>
    %214 = math.tanh %213 : vector<2x32xf32>
    %215 = vector.extract_strided_slice %175 {offsets = [0, 96], sizes = [2, 32], strides = [1, 1]} : vector<2x128xf32> to vector<2x32xf32>
    %216 = arith.negf %215 : vector<2x32xf32>
    %217 = math.exp %216 : vector<2x32xf32>
    %cst_74 = arith.constant 1.000000e+00 : f32
    %218 = vector.broadcast %cst_74 : f32 to vector<2x32xf32>
    %219 = arith.addf %218, %217 : vector<2x32xf32>
    %220 = arith.divf %218, %219 : vector<2x32xf32>
    %221 = arith.mulf %212, %147 : vector<2x32xf32>
    %222 = arith.mulf %206, %214 : vector<2x32xf32>
    %223 = arith.addf %221, %222 : vector<2x32xf32>
    %224 = math.tanh %223 : vector<2x32xf32>
    %225 = arith.mulf %220, %224 : vector<2x32xf32>
    %226 = arith.truncf %200 : vector<2x32xf32> to vector<2x32xbf16>
    %227 = arith.index_cast %c1_i32_62 : i32 to index
    %c0_75 = arith.constant 0 : index
    %c0_76 = arith.constant 0 : index
    %228 = vector.load %arg5[%227, %c0_75, %c0_76] : memref<8x2x64xbf16, #tpu.memory_space<vmem>>, vector<1x2x32xbf16>
    %229 = vector.shape_cast %228 : vector<1x2x32xbf16> to vector<2x32xbf16>
    %230 = vector.shape_cast %226 : vector<2x32xbf16> to vector<1x2x32xbf16>
    tpu.vector_store %arg5[%227, %c0_75, %c0_76], %230 {strides = array<i32>} : memref<8x2x64xbf16, #tpu.memory_space<vmem>>, vector<1x2x32xbf16>,
    %231 = arith.truncf %225 : vector<2x32xf32> to vector<2x32xbf16>
    %232 = arith.index_cast %161 : i32 to index
    %c0_77 = arith.constant 0 : index
    %c32_78 = arith.constant 32 : index
    %233 = vector.load %arg5[%232, %c0_77, %c32_78] : memref<8x2x64xbf16, #tpu.memory_space<vmem>>, vector<1x2x32xbf16>
    %234 = vector.shape_cast %233 : vector<1x2x32xbf16> to vector<2x32xbf16>
    %235 = vector.shape_cast %231 : vector<2x32xbf16> to vector<1x2x32xbf16>
    tpu.vector_store %arg5[%232, %c0_77, %c32_78], %235 {strides = array<i32>} : memref<8x2x64xbf16, #tpu.memory_space<vmem>>, vector<1x2x32xbf16>,
    %236 = tpu.concatenate %200, %225 in 1 : vector<2x32xf32>, vector<2x32xf32> -> vector<2x64xf32>
    %c2_i32_79 = arith.constant 2 : i32
    %c7_i32_80 = arith.constant 7 : i32
    %237 = arith.subi %c7_i32_80, %c2_i32_79 : i32
    %238 = arith.truncf %236 : vector<2x64xf32> to vector<2x64xbf16>
    %cst_81 = arith.constant dense<0.000000e+00> : vector<2x256xf32>
    %239 = tpu.matmul %238, %2, %cst_81 {dimension_numbers = #tpu.dot_dimension_numbers<[1], [0], [0], [1], [0, 0, 1, 1], [], []>} : vector<2x64xbf16>, vector<64x256xbf16>, vector<2x256xf32> -> vector<2x256xf32>
    %240 = arith.index_cast %c2_i32_79 : i32 to index
    %c0_82 = arith.constant 0 : index
    %c0_83 = arith.constant 0 : index
    %241 = vector.load %arg6[%240, %c0_82, %c0_83] : memref<8x2x256xf32, #tpu.memory_space<vmem>>, vector<1x2x256xf32>
    %242 = vector.shape_cast %241 : vector<1x2x256xf32> to vector<2x256xf32>
    %243 = vector.extract_strided_slice %242 {offsets = [0, 0], sizes = [2, 128], strides = [1, 1]} : vector<2x256xf32> to vector<2x128xf32>
    %244 = vector.extract_strided_slice %239 {offsets = [0, 0], sizes = [2, 128], strides = [1, 1]} : vector<2x256xf32> to vector<2x128xf32>
    %245 = arith.addf %243, %244 : vector<2x128xf32>
    %246 = arith.index_cast %237 : i32 to index
    %c0_84 = arith.constant 0 : index
    %c0_85 = arith.constant 0 : index
    %247 = vector.load %arg6[%246, %c0_84, %c0_85] : memref<8x2x256xf32, #tpu.memory_space<vmem>>, vector<1x2x256xf32>
    %248 = vector.shape_cast %247 : vector<1x2x256xf32> to vector<2x256xf32>
    %249 = vector.extract_strided_slice %248 {offsets = [0, 128], sizes = [2, 128], strides = [1, 1]} : vector<2x256xf32> to vector<2x128xf32>
    %250 = vector.extract_strided_slice %239 {offsets = [0, 128], sizes = [2, 128], strides = [1, 1]} : vector<2x256xf32> to vector<2x128xf32>
    %251 = arith.addf %249, %250 : vector<2x128xf32>
    %252 = vector.extract_strided_slice %245 {offsets = [0, 0], sizes = [2, 32], strides = [1, 1]} : vector<2x128xf32> to vector<2x32xf32>
    %253 = arith.negf %252 : vector<2x32xf32>
    %254 = math.exp %253 : vector<2x32xf32>
    %cst_86 = arith.constant 1.000000e+00 : f32
    %255 = vector.broadcast %cst_86 : f32 to vector<2x32xf32>
    %256 = arith.addf %255, %254 : vector<2x32xf32>
    %257 = arith.divf %255, %256 : vector<2x32xf32>
    %258 = vector.extract_strided_slice %245 {offsets = [0, 32], sizes = [2, 32], strides = [1, 1]} : vector<2x128xf32> to vector<2x32xf32>
    %259 = arith.negf %258 : vector<2x32xf32>
    %260 = math.exp %259 : vector<2x32xf32>
    %cst_87 = arith.constant 1.000000e+00 : f32
    %261 = vector.broadcast %cst_87 : f32 to vector<2x32xf32>
    %262 = arith.addf %261, %260 : vector<2x32xf32>
    %263 = arith.divf %261, %262 : vector<2x32xf32>
    %264 = vector.extract_strided_slice %245 {offsets = [0, 64], sizes = [2, 32], strides = [1, 1]} : vector<2x128xf32> to vector<2x32xf32>
    %265 = math.tanh %264 : vector<2x32xf32>
    %266 = vector.extract_strided_slice %245 {offsets = [0, 96], sizes = [2, 32], strides = [1, 1]} : vector<2x128xf32> to vector<2x32xf32>
    %267 = arith.negf %266 : vector<2x32xf32>
    %268 = math.exp %267 : vector<2x32xf32>
    %cst_88 = arith.constant 1.000000e+00 : f32
    %269 = vector.broadcast %cst_88 : f32 to vector<2x32xf32>
    %270 = arith.addf %269, %268 : vector<2x32xf32>
    %271 = arith.divf %269, %270 : vector<2x32xf32>
    %272 = arith.mulf %263, %198 : vector<2x32xf32>
    %273 = arith.mulf %257, %265 : vector<2x32xf32>
    %274 = arith.addf %272, %273 : vector<2x32xf32>
    %275 = math.tanh %274 : vector<2x32xf32>
    %276 = arith.mulf %271, %275 : vector<2x32xf32>
    %277 = vector.extract_strided_slice %251 {offsets = [0, 0], sizes = [2, 32], strides = [1, 1]} : vector<2x128xf32> to vector<2x32xf32>
    %278 = arith.negf %277 : vector<2x32xf32>
    %279 = math.exp %278 : vector<2x32xf32>
    %cst_89 = arith.constant 1.000000e+00 : f32
    %280 = vector.broadcast %cst_89 : f32 to vector<2x32xf32>
    %281 = arith.addf %280, %279 : vector<2x32xf32>
    %282 = arith.divf %280, %281 : vector<2x32xf32>
    %283 = vector.extract_strided_slice %251 {offsets = [0, 32], sizes = [2, 32], strides = [1, 1]} : vector<2x128xf32> to vector<2x32xf32>
    %284 = arith.negf %283 : vector<2x32xf32>
    %285 = math.exp %284 : vector<2x32xf32>
    %cst_90 = arith.constant 1.000000e+00 : f32
    %286 = vector.broadcast %cst_90 : f32 to vector<2x32xf32>
    %287 = arith.addf %286, %285 : vector<2x32xf32>
    %288 = arith.divf %286, %287 : vector<2x32xf32>
    %289 = vector.extract_strided_slice %251 {offsets = [0, 64], sizes = [2, 32], strides = [1, 1]} : vector<2x128xf32> to vector<2x32xf32>
    %290 = math.tanh %289 : vector<2x32xf32>
    %291 = vector.extract_strided_slice %251 {offsets = [0, 96], sizes = [2, 32], strides = [1, 1]} : vector<2x128xf32> to vector<2x32xf32>
    %292 = arith.negf %291 : vector<2x32xf32>
    %293 = math.exp %292 : vector<2x32xf32>
    %cst_91 = arith.constant 1.000000e+00 : f32
    %294 = vector.broadcast %cst_91 : f32 to vector<2x32xf32>
    %295 = arith.addf %294, %293 : vector<2x32xf32>
    %296 = arith.divf %294, %295 : vector<2x32xf32>
    %297 = arith.mulf %288, %223 : vector<2x32xf32>
    %298 = arith.mulf %282, %290 : vector<2x32xf32>
    %299 = arith.addf %297, %298 : vector<2x32xf32>
    %300 = math.tanh %299 : vector<2x32xf32>
    %301 = arith.mulf %296, %300 : vector<2x32xf32>
    %302 = arith.truncf %276 : vector<2x32xf32> to vector<2x32xbf16>
    %303 = arith.index_cast %c2_i32_79 : i32 to index
    %c0_92 = arith.constant 0 : index
    %c0_93 = arith.constant 0 : index
    %304 = vector.load %arg5[%303, %c0_92, %c0_93] : memref<8x2x64xbf16, #tpu.memory_space<vmem>>, vector<1x2x32xbf16>
    %305 = vector.shape_cast %304 : vector<1x2x32xbf16> to vector<2x32xbf16>
    %306 = vector.shape_cast %302 : vector<2x32xbf16> to vector<1x2x32xbf16>
    tpu.vector_store %arg5[%303, %c0_92, %c0_93], %306 {strides = array<i32>} : memref<8x2x64xbf16, #tpu.memory_space<vmem>>, vector<1x2x32xbf16>,
    %307 = arith.truncf %301 : vector<2x32xf32> to vector<2x32xbf16>
    %308 = arith.index_cast %237 : i32 to index
    %c0_94 = arith.constant 0 : index
    %c32_95 = arith.constant 32 : index
    %309 = vector.load %arg5[%308, %c0_94, %c32_95] : memref<8x2x64xbf16, #tpu.memory_space<vmem>>, vector<1x2x32xbf16>
    %310 = vector.shape_cast %309 : vector<1x2x32xbf16> to vector<2x32xbf16>
    %311 = vector.shape_cast %307 : vector<2x32xbf16> to vector<1x2x32xbf16>
    tpu.vector_store %arg5[%308, %c0_94, %c32_95], %311 {strides = array<i32>} : memref<8x2x64xbf16, #tpu.memory_space<vmem>>, vector<1x2x32xbf16>,
    %312 = tpu.concatenate %276, %301 in 1 : vector<2x32xf32>, vector<2x32xf32> -> vector<2x64xf32>
    %c3_i32_96 = arith.constant 3 : i32
    %c7_i32_97 = arith.constant 7 : i32
    %313 = arith.subi %c7_i32_97, %c3_i32_96 : i32
    %314 = arith.truncf %312 : vector<2x64xf32> to vector<2x64xbf16>
    %cst_98 = arith.constant dense<0.000000e+00> : vector<2x256xf32>
    %315 = tpu.matmul %314, %2, %cst_98 {dimension_numbers = #tpu.dot_dimension_numbers<[1], [0], [0], [1], [0, 0, 1, 1], [], []>} : vector<2x64xbf16>, vector<64x256xbf16>, vector<2x256xf32> -> vector<2x256xf32>
    %316 = arith.index_cast %c3_i32_96 : i32 to index
    %c0_99 = arith.constant 0 : index
    %c0_100 = arith.constant 0 : index
    %317 = vector.load %arg6[%316, %c0_99, %c0_100] : memref<8x2x256xf32, #tpu.memory_space<vmem>>, vector<1x2x256xf32>
    %318 = vector.shape_cast %317 : vector<1x2x256xf32> to vector<2x256xf32>
    %319 = vector.extract_strided_slice %318 {offsets = [0, 0], sizes = [2, 128], strides = [1, 1]} : vector<2x256xf32> to vector<2x128xf32>
    %320 = vector.extract_strided_slice %315 {offsets = [0, 0], sizes = [2, 128], strides = [1, 1]} : vector<2x256xf32> to vector<2x128xf32>
    %321 = arith.addf %319, %320 : vector<2x128xf32>
    %322 = arith.index_cast %313 : i32 to index
    %c0_101 = arith.constant 0 : index
    %c0_102 = arith.constant 0 : index
    %323 = vector.load %arg6[%322, %c0_101, %c0_102] : memref<8x2x256xf32, #tpu.memory_space<vmem>>, vector<1x2x256xf32>
    %324 = vector.shape_cast %323 : vector<1x2x256xf32> to vector<2x256xf32>
    %325 = vector.extract_strided_slice %324 {offsets = [0, 128], sizes = [2, 128], strides = [1, 1]} : vector<2x256xf32> to vector<2x128xf32>
    %326 = vector.extract_strided_slice %315 {offsets = [0, 128], sizes = [2, 128], strides = [1, 1]} : vector<2x256xf32> to vector<2x128xf32>
    %327 = arith.addf %325, %326 : vector<2x128xf32>
    %328 = vector.extract_strided_slice %321 {offsets = [0, 0], sizes = [2, 32], strides = [1, 1]} : vector<2x128xf32> to vector<2x32xf32>
    %329 = arith.negf %328 : vector<2x32xf32>
    %330 = math.exp %329 : vector<2x32xf32>
    %cst_103 = arith.constant 1.000000e+00 : f32
    %331 = vector.broadcast %cst_103 : f32 to vector<2x32xf32>
    %332 = arith.addf %331, %330 : vector<2x32xf32>
    %333 = arith.divf %331, %332 : vector<2x32xf32>
    %334 = vector.extract_strided_slice %321 {offsets = [0, 32], sizes = [2, 32], strides = [1, 1]} : vector<2x128xf32> to vector<2x32xf32>
    %335 = arith.negf %334 : vector<2x32xf32>
    %336 = math.exp %335 : vector<2x32xf32>
    %cst_104 = arith.constant 1.000000e+00 : f32
    %337 = vector.broadcast %cst_104 : f32 to vector<2x32xf32>
    %338 = arith.addf %337, %336 : vector<2x32xf32>
    %339 = arith.divf %337, %338 : vector<2x32xf32>
    %340 = vector.extract_strided_slice %321 {offsets = [0, 64], sizes = [2, 32], strides = [1, 1]} : vector<2x128xf32> to vector<2x32xf32>
    %341 = math.tanh %340 : vector<2x32xf32>
    %342 = vector.extract_strided_slice %321 {offsets = [0, 96], sizes = [2, 32], strides = [1, 1]} : vector<2x128xf32> to vector<2x32xf32>
    %343 = arith.negf %342 : vector<2x32xf32>
    %344 = math.exp %343 : vector<2x32xf32>
    %cst_105 = arith.constant 1.000000e+00 : f32
    %345 = vector.broadcast %cst_105 : f32 to vector<2x32xf32>
    %346 = arith.addf %345, %344 : vector<2x32xf32>
    %347 = arith.divf %345, %346 : vector<2x32xf32>
    %348 = arith.mulf %339, %274 : vector<2x32xf32>
    %349 = arith.mulf %333, %341 : vector<2x32xf32>
    %350 = arith.addf %348, %349 : vector<2x32xf32>
    %351 = math.tanh %350 : vector<2x32xf32>
    %352 = arith.mulf %347, %351 : vector<2x32xf32>
    %353 = vector.extract_strided_slice %327 {offsets = [0, 0], sizes = [2, 32], strides = [1, 1]} : vector<2x128xf32> to vector<2x32xf32>
    %354 = arith.negf %353 : vector<2x32xf32>
    %355 = math.exp %354 : vector<2x32xf32>
    %cst_106 = arith.constant 1.000000e+00 : f32
    %356 = vector.broadcast %cst_106 : f32 to vector<2x32xf32>
    %357 = arith.addf %356, %355 : vector<2x32xf32>
    %358 = arith.divf %356, %357 : vector<2x32xf32>
    %359 = vector.extract_strided_slice %327 {offsets = [0, 32], sizes = [2, 32], strides = [1, 1]} : vector<2x128xf32> to vector<2x32xf32>
    %360 = arith.negf %359 : vector<2x32xf32>
    %361 = math.exp %360 : vector<2x32xf32>
    %cst_107 = arith.constant 1.000000e+00 : f32
    %362 = vector.broadcast %cst_107 : f32 to vector<2x32xf32>
    %363 = arith.addf %362, %361 : vector<2x32xf32>
    %364 = arith.divf %362, %363 : vector<2x32xf32>
    %365 = vector.extract_strided_slice %327 {offsets = [0, 64], sizes = [2, 32], strides = [1, 1]} : vector<2x128xf32> to vector<2x32xf32>
    %366 = math.tanh %365 : vector<2x32xf32>
    %367 = vector.extract_strided_slice %327 {offsets = [0, 96], sizes = [2, 32], strides = [1, 1]} : vector<2x128xf32> to vector<2x32xf32>
    %368 = arith.negf %367 : vector<2x32xf32>
    %369 = math.exp %368 : vector<2x32xf32>
    %cst_108 = arith.constant 1.000000e+00 : f32
    %370 = vector.broadcast %cst_108 : f32 to vector<2x32xf32>
    %371 = arith.addf %370, %369 : vector<2x32xf32>
    %372 = arith.divf %370, %371 : vector<2x32xf32>
    %373 = arith.mulf %364, %299 : vector<2x32xf32>
    %374 = arith.mulf %358, %366 : vector<2x32xf32>
    %375 = arith.addf %373, %374 : vector<2x32xf32>
    %376 = math.tanh %375 : vector<2x32xf32>
    %377 = arith.mulf %372, %376 : vector<2x32xf32>
    %378 = arith.truncf %352 : vector<2x32xf32> to vector<2x32xbf16>
    %379 = arith.index_cast %c3_i32_96 : i32 to index
    %c0_109 = arith.constant 0 : index
    %c0_110 = arith.constant 0 : index
    %380 = vector.load %arg5[%379, %c0_109, %c0_110] : memref<8x2x64xbf16, #tpu.memory_space<vmem>>, vector<1x2x32xbf16>
    %381 = vector.shape_cast %380 : vector<1x2x32xbf16> to vector<2x32xbf16>
    %382 = vector.shape_cast %378 : vector<2x32xbf16> to vector<1x2x32xbf16>
    tpu.vector_store %arg5[%379, %c0_109, %c0_110], %382 {strides = array<i32>} : memref<8x2x64xbf16, #tpu.memory_space<vmem>>, vector<1x2x32xbf16>,
    %383 = arith.truncf %377 : vector<2x32xf32> to vector<2x32xbf16>
    %384 = arith.index_cast %313 : i32 to index
    %c0_111 = arith.constant 0 : index
    %c32_112 = arith.constant 32 : index
    %385 = vector.load %arg5[%384, %c0_111, %c32_112] : memref<8x2x64xbf16, #tpu.memory_space<vmem>>, vector<1x2x32xbf16>
    %386 = vector.shape_cast %385 : vector<1x2x32xbf16> to vector<2x32xbf16>
    %387 = vector.shape_cast %383 : vector<2x32xbf16> to vector<1x2x32xbf16>
    tpu.vector_store %arg5[%384, %c0_111, %c32_112], %387 {strides = array<i32>} : memref<8x2x64xbf16, #tpu.memory_space<vmem>>, vector<1x2x32xbf16>,
    %388 = tpu.concatenate %352, %377 in 1 : vector<2x32xf32>, vector<2x32xf32> -> vector<2x64xf32>
    %c4_i32_113 = arith.constant 4 : i32
    %c7_i32_114 = arith.constant 7 : i32
    %389 = arith.subi %c7_i32_114, %c4_i32_113 : i32
    %390 = arith.truncf %388 : vector<2x64xf32> to vector<2x64xbf16>
    %cst_115 = arith.constant dense<0.000000e+00> : vector<2x256xf32>
    %391 = tpu.matmul %390, %2, %cst_115 {dimension_numbers = #tpu.dot_dimension_numbers<[1], [0], [0], [1], [0, 0, 1, 1], [], []>} : vector<2x64xbf16>, vector<64x256xbf16>, vector<2x256xf32> -> vector<2x256xf32>
    %392 = arith.index_cast %c4_i32_113 : i32 to index
    %c0_116 = arith.constant 0 : index
    %c0_117 = arith.constant 0 : index
    %393 = vector.load %arg6[%392, %c0_116, %c0_117] : memref<8x2x256xf32, #tpu.memory_space<vmem>>, vector<1x2x256xf32>
    %394 = vector.shape_cast %393 : vector<1x2x256xf32> to vector<2x256xf32>
    %395 = vector.extract_strided_slice %394 {offsets = [0, 0], sizes = [2, 128], strides = [1, 1]} : vector<2x256xf32> to vector<2x128xf32>
    %396 = vector.extract_strided_slice %391 {offsets = [0, 0], sizes = [2, 128], strides = [1, 1]} : vector<2x256xf32> to vector<2x128xf32>
    %397 = arith.addf %395, %396 : vector<2x128xf32>
    %398 = arith.index_cast %389 : i32 to index
    %c0_118 = arith.constant 0 : index
    %c0_119 = arith.constant 0 : index
    %399 = vector.load %arg6[%398, %c0_118, %c0_119] : memref<8x2x256xf32, #tpu.memory_space<vmem>>, vector<1x2x256xf32>
    %400 = vector.shape_cast %399 : vector<1x2x256xf32> to vector<2x256xf32>
    %401 = vector.extract_strided_slice %400 {offsets = [0, 128], sizes = [2, 128], strides = [1, 1]} : vector<2x256xf32> to vector<2x128xf32>
    %402 = vector.extract_strided_slice %391 {offsets = [0, 128], sizes = [2, 128], strides = [1, 1]} : vector<2x256xf32> to vector<2x128xf32>
    %403 = arith.addf %401, %402 : vector<2x128xf32>
    %404 = vector.extract_strided_slice %397 {offsets = [0, 0], sizes = [2, 32], strides = [1, 1]} : vector<2x128xf32> to vector<2x32xf32>
    %405 = arith.negf %404 : vector<2x32xf32>
    %406 = math.exp %405 : vector<2x32xf32>
    %cst_120 = arith.constant 1.000000e+00 : f32
    %407 = vector.broadcast %cst_120 : f32 to vector<2x32xf32>
    %408 = arith.addf %407, %406 : vector<2x32xf32>
    %409 = arith.divf %407, %408 : vector<2x32xf32>
    %410 = vector.extract_strided_slice %397 {offsets = [0, 32], sizes = [2, 32], strides = [1, 1]} : vector<2x128xf32> to vector<2x32xf32>
    %411 = arith.negf %410 : vector<2x32xf32>
    %412 = math.exp %411 : vector<2x32xf32>
    %cst_121 = arith.constant 1.000000e+00 : f32
    %413 = vector.broadcast %cst_121 : f32 to vector<2x32xf32>
    %414 = arith.addf %413, %412 : vector<2x32xf32>
    %415 = arith.divf %413, %414 : vector<2x32xf32>
    %416 = vector.extract_strided_slice %397 {offsets = [0, 64], sizes = [2, 32], strides = [1, 1]} : vector<2x128xf32> to vector<2x32xf32>
    %417 = math.tanh %416 : vector<2x32xf32>
    %418 = vector.extract_strided_slice %397 {offsets = [0, 96], sizes = [2, 32], strides = [1, 1]} : vector<2x128xf32> to vector<2x32xf32>
    %419 = arith.negf %418 : vector<2x32xf32>
    %420 = math.exp %419 : vector<2x32xf32>
    %cst_122 = arith.constant 1.000000e+00 : f32
    %421 = vector.broadcast %cst_122 : f32 to vector<2x32xf32>
    %422 = arith.addf %421, %420 : vector<2x32xf32>
    %423 = arith.divf %421, %422 : vector<2x32xf32>
    %424 = arith.mulf %415, %350 : vector<2x32xf32>
    %425 = arith.mulf %409, %417 : vector<2x32xf32>
    %426 = arith.addf %424, %425 : vector<2x32xf32>
    %427 = math.tanh %426 : vector<2x32xf32>
    %428 = arith.mulf %423, %427 : vector<2x32xf32>
    %429 = vector.extract_strided_slice %403 {offsets = [0, 0], sizes = [2, 32], strides = [1, 1]} : vector<2x128xf32> to vector<2x32xf32>
    %430 = arith.negf %429 : vector<2x32xf32>
    %431 = math.exp %430 : vector<2x32xf32>
    %cst_123 = arith.constant 1.000000e+00 : f32
    %432 = vector.broadcast %cst_123 : f32 to vector<2x32xf32>
    %433 = arith.addf %432, %431 : vector<2x32xf32>
    %434 = arith.divf %432, %433 : vector<2x32xf32>
    %435 = vector.extract_strided_slice %403 {offsets = [0, 32], sizes = [2, 32], strides = [1, 1]} : vector<2x128xf32> to vector<2x32xf32>
    %436 = arith.negf %435 : vector<2x32xf32>
    %437 = math.exp %436 : vector<2x32xf32>
    %cst_124 = arith.constant 1.000000e+00 : f32
    %438 = vector.broadcast %cst_124 : f32 to vector<2x32xf32>
    %439 = arith.addf %438, %437 : vector<2x32xf32>
    %440 = arith.divf %438, %439 : vector<2x32xf32>
    %441 = vector.extract_strided_slice %403 {offsets = [0, 64], sizes = [2, 32], strides = [1, 1]} : vector<2x128xf32> to vector<2x32xf32>
    %442 = math.tanh %441 : vector<2x32xf32>
    %443 = vector.extract_strided_slice %403 {offsets = [0, 96], sizes = [2, 32], strides = [1, 1]} : vector<2x128xf32> to vector<2x32xf32>
    %444 = arith.negf %443 : vector<2x32xf32>
    %445 = math.exp %444 : vector<2x32xf32>
    %cst_125 = arith.constant 1.000000e+00 : f32
    %446 = vector.broadcast %cst_125 : f32 to vector<2x32xf32>
    %447 = arith.addf %446, %445 : vector<2x32xf32>
    %448 = arith.divf %446, %447 : vector<2x32xf32>
    %449 = arith.mulf %440, %375 : vector<2x32xf32>
    %450 = arith.mulf %434, %442 : vector<2x32xf32>
    %451 = arith.addf %449, %450 : vector<2x32xf32>
    %452 = math.tanh %451 : vector<2x32xf32>
    %453 = arith.mulf %448, %452 : vector<2x32xf32>
    %454 = arith.truncf %428 : vector<2x32xf32> to vector<2x32xbf16>
    %455 = arith.index_cast %c4_i32_113 : i32 to index
    %c0_126 = arith.constant 0 : index
    %c0_127 = arith.constant 0 : index
    %456 = vector.load %arg5[%455, %c0_126, %c0_127] : memref<8x2x64xbf16, #tpu.memory_space<vmem>>, vector<1x2x32xbf16>
    %457 = vector.shape_cast %456 : vector<1x2x32xbf16> to vector<2x32xbf16>
    %458 = vector.shape_cast %454 : vector<2x32xbf16> to vector<1x2x32xbf16>
    tpu.vector_store %arg5[%455, %c0_126, %c0_127], %458 {strides = array<i32>} : memref<8x2x64xbf16, #tpu.memory_space<vmem>>, vector<1x2x32xbf16>,
    %459 = arith.truncf %453 : vector<2x32xf32> to vector<2x32xbf16>
    %460 = arith.index_cast %389 : i32 to index
    %c0_128 = arith.constant 0 : index
    %c32_129 = arith.constant 32 : index
    %461 = vector.load %arg5[%460, %c0_128, %c32_129] : memref<8x2x64xbf16, #tpu.memory_space<vmem>>, vector<1x2x32xbf16>
    %462 = vector.shape_cast %461 : vector<1x2x32xbf16> to vector<2x32xbf16>
    %463 = vector.shape_cast %459 : vector<2x32xbf16> to vector<1x2x32xbf16>
    tpu.vector_store %arg5[%460, %c0_128, %c32_129], %463 {strides = array<i32>} : memref<8x2x64xbf16, #tpu.memory_space<vmem>>, vector<1x2x32xbf16>,
    %464 = tpu.concatenate %428, %453 in 1 : vector<2x32xf32>, vector<2x32xf32> -> vector<2x64xf32>
    %c5_i32_130 = arith.constant 5 : i32
    %c7_i32_131 = arith.constant 7 : i32
    %465 = arith.subi %c7_i32_131, %c5_i32_130 : i32
    %466 = arith.truncf %464 : vector<2x64xf32> to vector<2x64xbf16>
    %cst_132 = arith.constant dense<0.000000e+00> : vector<2x256xf32>
    %467 = tpu.matmul %466, %2, %cst_132 {dimension_numbers = #tpu.dot_dimension_numbers<[1], [0], [0], [1], [0, 0, 1, 1], [], []>} : vector<2x64xbf16>, vector<64x256xbf16>, vector<2x256xf32> -> vector<2x256xf32>
    %468 = arith.index_cast %c5_i32_130 : i32 to index
    %c0_133 = arith.constant 0 : index
    %c0_134 = arith.constant 0 : index
    %469 = vector.load %arg6[%468, %c0_133, %c0_134] : memref<8x2x256xf32, #tpu.memory_space<vmem>>, vector<1x2x256xf32>
    %470 = vector.shape_cast %469 : vector<1x2x256xf32> to vector<2x256xf32>
    %471 = vector.extract_strided_slice %470 {offsets = [0, 0], sizes = [2, 128], strides = [1, 1]} : vector<2x256xf32> to vector<2x128xf32>
    %472 = vector.extract_strided_slice %467 {offsets = [0, 0], sizes = [2, 128], strides = [1, 1]} : vector<2x256xf32> to vector<2x128xf32>
    %473 = arith.addf %471, %472 : vector<2x128xf32>
    %474 = arith.index_cast %465 : i32 to index
    %c0_135 = arith.constant 0 : index
    %c0_136 = arith.constant 0 : index
    %475 = vector.load %arg6[%474, %c0_135, %c0_136] : memref<8x2x256xf32, #tpu.memory_space<vmem>>, vector<1x2x256xf32>
    %476 = vector.shape_cast %475 : vector<1x2x256xf32> to vector<2x256xf32>
    %477 = vector.extract_strided_slice %476 {offsets = [0, 128], sizes = [2, 128], strides = [1, 1]} : vector<2x256xf32> to vector<2x128xf32>
    %478 = vector.extract_strided_slice %467 {offsets = [0, 128], sizes = [2, 128], strides = [1, 1]} : vector<2x256xf32> to vector<2x128xf32>
    %479 = arith.addf %477, %478 : vector<2x128xf32>
    %480 = vector.extract_strided_slice %473 {offsets = [0, 0], sizes = [2, 32], strides = [1, 1]} : vector<2x128xf32> to vector<2x32xf32>
    %481 = arith.negf %480 : vector<2x32xf32>
    %482 = math.exp %481 : vector<2x32xf32>
    %cst_137 = arith.constant 1.000000e+00 : f32
    %483 = vector.broadcast %cst_137 : f32 to vector<2x32xf32>
    %484 = arith.addf %483, %482 : vector<2x32xf32>
    %485 = arith.divf %483, %484 : vector<2x32xf32>
    %486 = vector.extract_strided_slice %473 {offsets = [0, 32], sizes = [2, 32], strides = [1, 1]} : vector<2x128xf32> to vector<2x32xf32>
    %487 = arith.negf %486 : vector<2x32xf32>
    %488 = math.exp %487 : vector<2x32xf32>
    %cst_138 = arith.constant 1.000000e+00 : f32
    %489 = vector.broadcast %cst_138 : f32 to vector<2x32xf32>
    %490 = arith.addf %489, %488 : vector<2x32xf32>
    %491 = arith.divf %489, %490 : vector<2x32xf32>
    %492 = vector.extract_strided_slice %473 {offsets = [0, 64], sizes = [2, 32], strides = [1, 1]} : vector<2x128xf32> to vector<2x32xf32>
    %493 = math.tanh %492 : vector<2x32xf32>
    %494 = vector.extract_strided_slice %473 {offsets = [0, 96], sizes = [2, 32], strides = [1, 1]} : vector<2x128xf32> to vector<2x32xf32>
    %495 = arith.negf %494 : vector<2x32xf32>
    %496 = math.exp %495 : vector<2x32xf32>
    %cst_139 = arith.constant 1.000000e+00 : f32
    %497 = vector.broadcast %cst_139 : f32 to vector<2x32xf32>
    %498 = arith.addf %497, %496 : vector<2x32xf32>
    %499 = arith.divf %497, %498 : vector<2x32xf32>
    %500 = arith.mulf %491, %426 : vector<2x32xf32>
    %501 = arith.mulf %485, %493 : vector<2x32xf32>
    %502 = arith.addf %500, %501 : vector<2x32xf32>
    %503 = math.tanh %502 : vector<2x32xf32>
    %504 = arith.mulf %499, %503 : vector<2x32xf32>
    %505 = vector.extract_strided_slice %479 {offsets = [0, 0], sizes = [2, 32], strides = [1, 1]} : vector<2x128xf32> to vector<2x32xf32>
    %506 = arith.negf %505 : vector<2x32xf32>
    %507 = math.exp %506 : vector<2x32xf32>
    %cst_140 = arith.constant 1.000000e+00 : f32
    %508 = vector.broadcast %cst_140 : f32 to vector<2x32xf32>
    %509 = arith.addf %508, %507 : vector<2x32xf32>
    %510 = arith.divf %508, %509 : vector<2x32xf32>
    %511 = vector.extract_strided_slice %479 {offsets = [0, 32], sizes = [2, 32], strides = [1, 1]} : vector<2x128xf32> to vector<2x32xf32>
    %512 = arith.negf %511 : vector<2x32xf32>
    %513 = math.exp %512 : vector<2x32xf32>
    %cst_141 = arith.constant 1.000000e+00 : f32
    %514 = vector.broadcast %cst_141 : f32 to vector<2x32xf32>
    %515 = arith.addf %514, %513 : vector<2x32xf32>
    %516 = arith.divf %514, %515 : vector<2x32xf32>
    %517 = vector.extract_strided_slice %479 {offsets = [0, 64], sizes = [2, 32], strides = [1, 1]} : vector<2x128xf32> to vector<2x32xf32>
    %518 = math.tanh %517 : vector<2x32xf32>
    %519 = vector.extract_strided_slice %479 {offsets = [0, 96], sizes = [2, 32], strides = [1, 1]} : vector<2x128xf32> to vector<2x32xf32>
    %520 = arith.negf %519 : vector<2x32xf32>
    %521 = math.exp %520 : vector<2x32xf32>
    %cst_142 = arith.constant 1.000000e+00 : f32
    %522 = vector.broadcast %cst_142 : f32 to vector<2x32xf32>
    %523 = arith.addf %522, %521 : vector<2x32xf32>
    %524 = arith.divf %522, %523 : vector<2x32xf32>
    %525 = arith.mulf %516, %451 : vector<2x32xf32>
    %526 = arith.mulf %510, %518 : vector<2x32xf32>
    %527 = arith.addf %525, %526 : vector<2x32xf32>
    %528 = math.tanh %527 : vector<2x32xf32>
    %529 = arith.mulf %524, %528 : vector<2x32xf32>
    %530 = arith.truncf %504 : vector<2x32xf32> to vector<2x32xbf16>
    %531 = arith.index_cast %c5_i32_130 : i32 to index
    %c0_143 = arith.constant 0 : index
    %c0_144 = arith.constant 0 : index
    %532 = vector.load %arg5[%531, %c0_143, %c0_144] : memref<8x2x64xbf16, #tpu.memory_space<vmem>>, vector<1x2x32xbf16>
    %533 = vector.shape_cast %532 : vector<1x2x32xbf16> to vector<2x32xbf16>
    %534 = vector.shape_cast %530 : vector<2x32xbf16> to vector<1x2x32xbf16>
    tpu.vector_store %arg5[%531, %c0_143, %c0_144], %534 {strides = array<i32>} : memref<8x2x64xbf16, #tpu.memory_space<vmem>>, vector<1x2x32xbf16>,
    %535 = arith.truncf %529 : vector<2x32xf32> to vector<2x32xbf16>
    %536 = arith.index_cast %465 : i32 to index
    %c0_145 = arith.constant 0 : index
    %c32_146 = arith.constant 32 : index
    %537 = vector.load %arg5[%536, %c0_145, %c32_146] : memref<8x2x64xbf16, #tpu.memory_space<vmem>>, vector<1x2x32xbf16>
    %538 = vector.shape_cast %537 : vector<1x2x32xbf16> to vector<2x32xbf16>
    %539 = vector.shape_cast %535 : vector<2x32xbf16> to vector<1x2x32xbf16>
    tpu.vector_store %arg5[%536, %c0_145, %c32_146], %539 {strides = array<i32>} : memref<8x2x64xbf16, #tpu.memory_space<vmem>>, vector<1x2x32xbf16>,
    %540 = tpu.concatenate %504, %529 in 1 : vector<2x32xf32>, vector<2x32xf32> -> vector<2x64xf32>
    %c6_i32_147 = arith.constant 6 : i32
    %c7_i32_148 = arith.constant 7 : i32
    %541 = arith.subi %c7_i32_148, %c6_i32_147 : i32
    %542 = arith.truncf %540 : vector<2x64xf32> to vector<2x64xbf16>
    %cst_149 = arith.constant dense<0.000000e+00> : vector<2x256xf32>
    %543 = tpu.matmul %542, %2, %cst_149 {dimension_numbers = #tpu.dot_dimension_numbers<[1], [0], [0], [1], [0, 0, 1, 1], [], []>} : vector<2x64xbf16>, vector<64x256xbf16>, vector<2x256xf32> -> vector<2x256xf32>
    %544 = arith.index_cast %c6_i32_147 : i32 to index
    %c0_150 = arith.constant 0 : index
    %c0_151 = arith.constant 0 : index
    %545 = vector.load %arg6[%544, %c0_150, %c0_151] : memref<8x2x256xf32, #tpu.memory_space<vmem>>, vector<1x2x256xf32>
    %546 = vector.shape_cast %545 : vector<1x2x256xf32> to vector<2x256xf32>
    %547 = vector.extract_strided_slice %546 {offsets = [0, 0], sizes = [2, 128], strides = [1, 1]} : vector<2x256xf32> to vector<2x128xf32>
    %548 = vector.extract_strided_slice %543 {offsets = [0, 0], sizes = [2, 128], strides = [1, 1]} : vector<2x256xf32> to vector<2x128xf32>
    %549 = arith.addf %547, %548 : vector<2x128xf32>
    %550 = arith.index_cast %541 : i32 to index
    %c0_152 = arith.constant 0 : index
    %c0_153 = arith.constant 0 : index
    %551 = vector.load %arg6[%550, %c0_152, %c0_153] : memref<8x2x256xf32, #tpu.memory_space<vmem>>, vector<1x2x256xf32>
    %552 = vector.shape_cast %551 : vector<1x2x256xf32> to vector<2x256xf32>
    %553 = vector.extract_strided_slice %552 {offsets = [0, 128], sizes = [2, 128], strides = [1, 1]} : vector<2x256xf32> to vector<2x128xf32>
    %554 = vector.extract_strided_slice %543 {offsets = [0, 128], sizes = [2, 128], strides = [1, 1]} : vector<2x256xf32> to vector<2x128xf32>
    %555 = arith.addf %553, %554 : vector<2x128xf32>
    %556 = vector.extract_strided_slice %549 {offsets = [0, 0], sizes = [2, 32], strides = [1, 1]} : vector<2x128xf32> to vector<2x32xf32>
    %557 = arith.negf %556 : vector<2x32xf32>
    %558 = math.exp %557 : vector<2x32xf32>
    %cst_154 = arith.constant 1.000000e+00 : f32
    %559 = vector.broadcast %cst_154 : f32 to vector<2x32xf32>
    %560 = arith.addf %559, %558 : vector<2x32xf32>
    %561 = arith.divf %559, %560 : vector<2x32xf32>
    %562 = vector.extract_strided_slice %549 {offsets = [0, 32], sizes = [2, 32], strides = [1, 1]} : vector<2x128xf32> to vector<2x32xf32>
    %563 = arith.negf %562 : vector<2x32xf32>
    %564 = math.exp %563 : vector<2x32xf32>
    %cst_155 = arith.constant 1.000000e+00 : f32
    %565 = vector.broadcast %cst_155 : f32 to vector<2x32xf32>
    %566 = arith.addf %565, %564 : vector<2x32xf32>
    %567 = arith.divf %565, %566 : vector<2x32xf32>
    %568 = vector.extract_strided_slice %549 {offsets = [0, 64], sizes = [2, 32], strides = [1, 1]} : vector<2x128xf32> to vector<2x32xf32>
    %569 = math.tanh %568 : vector<2x32xf32>
    %570 = vector.extract_strided_slice %549 {offsets = [0, 96], sizes = [2, 32], strides = [1, 1]} : vector<2x128xf32> to vector<2x32xf32>
    %571 = arith.negf %570 : vector<2x32xf32>
    %572 = math.exp %571 : vector<2x32xf32>
    %cst_156 = arith.constant 1.000000e+00 : f32
    %573 = vector.broadcast %cst_156 : f32 to vector<2x32xf32>
    %574 = arith.addf %573, %572 : vector<2x32xf32>
    %575 = arith.divf %573, %574 : vector<2x32xf32>
    %576 = arith.mulf %567, %502 : vector<2x32xf32>
    %577 = arith.mulf %561, %569 : vector<2x32xf32>
    %578 = arith.addf %576, %577 : vector<2x32xf32>
    %579 = math.tanh %578 : vector<2x32xf32>
    %580 = arith.mulf %575, %579 : vector<2x32xf32>
    %581 = vector.extract_strided_slice %555 {offsets = [0, 0], sizes = [2, 32], strides = [1, 1]} : vector<2x128xf32> to vector<2x32xf32>
    %582 = arith.negf %581 : vector<2x32xf32>
    %583 = math.exp %582 : vector<2x32xf32>
    %cst_157 = arith.constant 1.000000e+00 : f32
    %584 = vector.broadcast %cst_157 : f32 to vector<2x32xf32>
    %585 = arith.addf %584, %583 : vector<2x32xf32>
    %586 = arith.divf %584, %585 : vector<2x32xf32>
    %587 = vector.extract_strided_slice %555 {offsets = [0, 32], sizes = [2, 32], strides = [1, 1]} : vector<2x128xf32> to vector<2x32xf32>
    %588 = arith.negf %587 : vector<2x32xf32>
    %589 = math.exp %588 : vector<2x32xf32>
    %cst_158 = arith.constant 1.000000e+00 : f32
    %590 = vector.broadcast %cst_158 : f32 to vector<2x32xf32>
    %591 = arith.addf %590, %589 : vector<2x32xf32>
    %592 = arith.divf %590, %591 : vector<2x32xf32>
    %593 = vector.extract_strided_slice %555 {offsets = [0, 64], sizes = [2, 32], strides = [1, 1]} : vector<2x128xf32> to vector<2x32xf32>
    %594 = math.tanh %593 : vector<2x32xf32>
    %595 = vector.extract_strided_slice %555 {offsets = [0, 96], sizes = [2, 32], strides = [1, 1]} : vector<2x128xf32> to vector<2x32xf32>
    %596 = arith.negf %595 : vector<2x32xf32>
    %597 = math.exp %596 : vector<2x32xf32>
    %cst_159 = arith.constant 1.000000e+00 : f32
    %598 = vector.broadcast %cst_159 : f32 to vector<2x32xf32>
    %599 = arith.addf %598, %597 : vector<2x32xf32>
    %600 = arith.divf %598, %599 : vector<2x32xf32>
    %601 = arith.mulf %592, %527 : vector<2x32xf32>
    %602 = arith.mulf %586, %594 : vector<2x32xf32>
    %603 = arith.addf %601, %602 : vector<2x32xf32>
    %604 = math.tanh %603 : vector<2x32xf32>
    %605 = arith.mulf %600, %604 : vector<2x32xf32>
    %606 = arith.truncf %580 : vector<2x32xf32> to vector<2x32xbf16>
    %607 = arith.index_cast %c6_i32_147 : i32 to index
    %c0_160 = arith.constant 0 : index
    %c0_161 = arith.constant 0 : index
    %608 = vector.load %arg5[%607, %c0_160, %c0_161] : memref<8x2x64xbf16, #tpu.memory_space<vmem>>, vector<1x2x32xbf16>
    %609 = vector.shape_cast %608 : vector<1x2x32xbf16> to vector<2x32xbf16>
    %610 = vector.shape_cast %606 : vector<2x32xbf16> to vector<1x2x32xbf16>
    tpu.vector_store %arg5[%607, %c0_160, %c0_161], %610 {strides = array<i32>} : memref<8x2x64xbf16, #tpu.memory_space<vmem>>, vector<1x2x32xbf16>,
    %611 = arith.truncf %605 : vector<2x32xf32> to vector<2x32xbf16>
    %612 = arith.index_cast %541 : i32 to index
    %c0_162 = arith.constant 0 : index
    %c32_163 = arith.constant 32 : index
    %613 = vector.load %arg5[%612, %c0_162, %c32_163] : memref<8x2x64xbf16, #tpu.memory_space<vmem>>, vector<1x2x32xbf16>
    %614 = vector.shape_cast %613 : vector<1x2x32xbf16> to vector<2x32xbf16>
    %615 = vector.shape_cast %611 : vector<2x32xbf16> to vector<1x2x32xbf16>
    tpu.vector_store %arg5[%612, %c0_162, %c32_163], %615 {strides = array<i32>} : memref<8x2x64xbf16, #tpu.memory_space<vmem>>, vector<1x2x32xbf16>,
    %616 = tpu.concatenate %580, %605 in 1 : vector<2x32xf32>, vector<2x32xf32> -> vector<2x64xf32>
    %c7_i32_164 = arith.constant 7 : i32
    %c7_i32_165 = arith.constant 7 : i32
    %617 = arith.subi %c7_i32_165, %c7_i32_164 : i32
    %618 = arith.truncf %616 : vector<2x64xf32> to vector<2x64xbf16>
    %cst_166 = arith.constant dense<0.000000e+00> : vector<2x256xf32>
    %619 = tpu.matmul %618, %2, %cst_166 {dimension_numbers = #tpu.dot_dimension_numbers<[1], [0], [0], [1], [0, 0, 1, 1], [], []>} : vector<2x64xbf16>, vector<64x256xbf16>, vector<2x256xf32> -> vector<2x256xf32>
    %620 = arith.index_cast %c7_i32_164 : i32 to index
    %c0_167 = arith.constant 0 : index
    %c0_168 = arith.constant 0 : index
    %621 = vector.load %arg6[%620, %c0_167, %c0_168] : memref<8x2x256xf32, #tpu.memory_space<vmem>>, vector<1x2x256xf32>
    %622 = vector.shape_cast %621 : vector<1x2x256xf32> to vector<2x256xf32>
    %623 = vector.extract_strided_slice %622 {offsets = [0, 0], sizes = [2, 128], strides = [1, 1]} : vector<2x256xf32> to vector<2x128xf32>
    %624 = vector.extract_strided_slice %619 {offsets = [0, 0], sizes = [2, 128], strides = [1, 1]} : vector<2x256xf32> to vector<2x128xf32>
    %625 = arith.addf %623, %624 : vector<2x128xf32>
    %626 = arith.index_cast %617 : i32 to index
    %c0_169 = arith.constant 0 : index
    %c0_170 = arith.constant 0 : index
    %627 = vector.load %arg6[%626, %c0_169, %c0_170] : memref<8x2x256xf32, #tpu.memory_space<vmem>>, vector<1x2x256xf32>
    %628 = vector.shape_cast %627 : vector<1x2x256xf32> to vector<2x256xf32>
    %629 = vector.extract_strided_slice %628 {offsets = [0, 128], sizes = [2, 128], strides = [1, 1]} : vector<2x256xf32> to vector<2x128xf32>
    %630 = vector.extract_strided_slice %619 {offsets = [0, 128], sizes = [2, 128], strides = [1, 1]} : vector<2x256xf32> to vector<2x128xf32>
    %631 = arith.addf %629, %630 : vector<2x128xf32>
    %632 = vector.extract_strided_slice %625 {offsets = [0, 0], sizes = [2, 32], strides = [1, 1]} : vector<2x128xf32> to vector<2x32xf32>
    %633 = arith.negf %632 : vector<2x32xf32>
    %634 = math.exp %633 : vector<2x32xf32>
    %cst_171 = arith.constant 1.000000e+00 : f32
    %635 = vector.broadcast %cst_171 : f32 to vector<2x32xf32>
    %636 = arith.addf %635, %634 : vector<2x32xf32>
    %637 = arith.divf %635, %636 : vector<2x32xf32>
    %638 = vector.extract_strided_slice %625 {offsets = [0, 32], sizes = [2, 32], strides = [1, 1]} : vector<2x128xf32> to vector<2x32xf32>
    %639 = arith.negf %638 : vector<2x32xf32>
    %640 = math.exp %639 : vector<2x32xf32>
    %cst_172 = arith.constant 1.000000e+00 : f32
    %641 = vector.broadcast %cst_172 : f32 to vector<2x32xf32>
    %642 = arith.addf %641, %640 : vector<2x32xf32>
    %643 = arith.divf %641, %642 : vector<2x32xf32>
    %644 = vector.extract_strided_slice %625 {offsets = [0, 64], sizes = [2, 32], strides = [1, 1]} : vector<2x128xf32> to vector<2x32xf32>
    %645 = math.tanh %644 : vector<2x32xf32>
    %646 = vector.extract_strided_slice %625 {offsets = [0, 96], sizes = [2, 32], strides = [1, 1]} : vector<2x128xf32> to vector<2x32xf32>
    %647 = arith.negf %646 : vector<2x32xf32>
    %648 = math.exp %647 : vector<2x32xf32>
    %cst_173 = arith.constant 1.000000e+00 : f32
    %649 = vector.broadcast %cst_173 : f32 to vector<2x32xf32>
    %650 = arith.addf %649, %648 : vector<2x32xf32>
    %651 = arith.divf %649, %650 : vector<2x32xf32>
    %652 = arith.mulf %643, %578 : vector<2x32xf32>
    %653 = arith.mulf %637, %645 : vector<2x32xf32>
    %654 = arith.addf %652, %653 : vector<2x32xf32>
    %655 = math.tanh %654 : vector<2x32xf32>
    %656 = arith.mulf %651, %655 : vector<2x32xf32>
    %657 = vector.extract_strided_slice %631 {offsets = [0, 0], sizes = [2, 32], strides = [1, 1]} : vector<2x128xf32> to vector<2x32xf32>
    %658 = arith.negf %657 : vector<2x32xf32>
    %659 = math.exp %658 : vector<2x32xf32>
    %cst_174 = arith.constant 1.000000e+00 : f32
    %660 = vector.broadcast %cst_174 : f32 to vector<2x32xf32>
    %661 = arith.addf %660, %659 : vector<2x32xf32>
    %662 = arith.divf %660, %661 : vector<2x32xf32>
    %663 = vector.extract_strided_slice %631 {offsets = [0, 32], sizes = [2, 32], strides = [1, 1]} : vector<2x128xf32> to vector<2x32xf32>
    %664 = arith.negf %663 : vector<2x32xf32>
    %665 = math.exp %664 : vector<2x32xf32>
    %cst_175 = arith.constant 1.000000e+00 : f32
    %666 = vector.broadcast %cst_175 : f32 to vector<2x32xf32>
    %667 = arith.addf %666, %665 : vector<2x32xf32>
    %668 = arith.divf %666, %667 : vector<2x32xf32>
    %669 = vector.extract_strided_slice %631 {offsets = [0, 64], sizes = [2, 32], strides = [1, 1]} : vector<2x128xf32> to vector<2x32xf32>
    %670 = math.tanh %669 : vector<2x32xf32>
    %671 = vector.extract_strided_slice %631 {offsets = [0, 96], sizes = [2, 32], strides = [1, 1]} : vector<2x128xf32> to vector<2x32xf32>
    %672 = arith.negf %671 : vector<2x32xf32>
    %673 = math.exp %672 : vector<2x32xf32>
    %cst_176 = arith.constant 1.000000e+00 : f32
    %674 = vector.broadcast %cst_176 : f32 to vector<2x32xf32>
    %675 = arith.addf %674, %673 : vector<2x32xf32>
    %676 = arith.divf %674, %675 : vector<2x32xf32>
    %677 = arith.mulf %668, %603 : vector<2x32xf32>
    %678 = arith.mulf %662, %670 : vector<2x32xf32>
    %679 = arith.addf %677, %678 : vector<2x32xf32>
    %680 = math.tanh %679 : vector<2x32xf32>
    %681 = arith.mulf %676, %680 : vector<2x32xf32>
    %682 = arith.truncf %656 : vector<2x32xf32> to vector<2x32xbf16>
    %683 = arith.index_cast %c7_i32_164 : i32 to index
    %c0_177 = arith.constant 0 : index
    %c0_178 = arith.constant 0 : index
    %684 = vector.load %arg5[%683, %c0_177, %c0_178] : memref<8x2x64xbf16, #tpu.memory_space<vmem>>, vector<1x2x32xbf16>
    %685 = vector.shape_cast %684 : vector<1x2x32xbf16> to vector<2x32xbf16>
    %686 = vector.shape_cast %682 : vector<2x32xbf16> to vector<1x2x32xbf16>
    tpu.vector_store %arg5[%683, %c0_177, %c0_178], %686 {strides = array<i32>} : memref<8x2x64xbf16, #tpu.memory_space<vmem>>, vector<1x2x32xbf16>,
    %687 = arith.truncf %681 : vector<2x32xf32> to vector<2x32xbf16>
    %688 = arith.index_cast %617 : i32 to index
    %c0_179 = arith.constant 0 : index
    %c32_180 = arith.constant 32 : index
    %689 = vector.load %arg5[%688, %c0_179, %c32_180] : memref<8x2x64xbf16, #tpu.memory_space<vmem>>, vector<1x2x32xbf16>
    %690 = vector.shape_cast %689 : vector<1x2x32xbf16> to vector<2x32xbf16>
    %691 = vector.shape_cast %687 : vector<2x32xbf16> to vector<1x2x32xbf16>
    tpu.vector_store %arg5[%688, %c0_179, %c32_180], %691 {strides = array<i32>} : memref<8x2x64xbf16, #tpu.memory_space<vmem>>, vector<1x2x32xbf16>,
    %692 = tpu.concatenate %656, %681 in 1 : vector<2x32xf32>, vector<2x32xf32> -> vector<2x64xf32>
    %c8_i32_181 = arith.constant 8 : i32
    return
  }
  func.func @transform_0(%arg0: i32) -> (i32, i32, i32) {
    %c0_i32 = arith.constant 0 : i32
    %c0_i32_0 = arith.constant 0 : i32
    %c0_i32_1 = arith.constant 0 : i32
    return %c0_i32, %arg0, %c0_i32_0 : i32, i32, i32
  }
  func.func @transform_1(%arg0: i32) -> (i32, i32) {
    %c0_i32 = arith.constant 0 : i32
    %c0_i32_0 = arith.constant 0 : i32
    %c0_i32_1 = arith.constant 0 : i32
    return %c0_i32, %c0_i32_0 : i32, i32
  }
  func.func @transform_2(%arg0: i32) -> (i32, i32) {
    %c0_i32 = arith.constant 0 : i32
    %c0_i32_0 = arith.constant 0 : i32
    %c0_i32_1 = arith.constant 0 : i32
    return %c0_i32, %c0_i32_0 : i32, i32
  }
  func.func @transform_3(%arg0: i32) -> (i32, i32) {
    %c0_i32 = arith.constant 0 : i32
    %c0_i32_0 = arith.constant 0 : i32
    %c0_i32_1 = arith.constant 0 : i32
    return %c0_i32, %c0_i32_0 : i32, i32
  }
  func.func @transform_4(%arg0: i32) -> (i32, i32, i32) {
    %c0_i32 = arith.constant 0 : i32
    %c0_i32_0 = arith.constant 0 : i32
    %c0_i32_1 = arith.constant 0 : i32
    return %c0_i32, %arg0, %c0_i32_0 : i32, i32, i32
  }
}

module attributes {stable_mosaic.version = 11 : i64} {
  func.func @fused_fc_kernel(%arg0: i32, %arg1: i32, %arg2: memref<16x64xbf16, #tpu.memory_space<vmem>>, %arg3: memref<16x64xbf16, #tpu.memory_space<vmem>>, %arg4: memref<64x32xbf16, #tpu.memory_space<vmem>>, %arg5: memref<64x32xbf16, #tpu.memory_space<vmem>>, %arg6: memref<1x32xf32, #tpu.memory_space<vmem>>, %arg7: memref<16x32xf32, #tpu.memory_space<vmem>>) attributes {dimension_semantics = [#tpu.dimension_semantics<parallel>, #tpu.dimension_semantics<parallel>], iteration_bounds = array<i64: 1, 1>, scalar_prefetch = 0 : i64, scratch_operands = 0 : i64, tpu.core_type = #tpu.core_type<tc>, window_params = [{transform_indices = @transform_0, window_bounds = array<i64: 16, 64>}, {transform_indices = @transform_1, window_bounds = array<i64: 16, 64>}, {transform_indices = @transform_2, window_bounds = array<i64: 64, 32>}, {transform_indices = @transform_3, window_bounds = array<i64: 64, 32>}, {transform_indices = @transform_4, window_bounds = array<i64: 1, 32>}, {transform_indices = @transform_5, window_bounds = array<i64: 16, 32>}]} {
    %c0 = arith.constant 0 : index
    %c0_0 = arith.constant 0 : index
    %0 = vector.load %arg2[%c0, %c0_0] : memref<16x64xbf16, #tpu.memory_space<vmem>>, vector<16x64xbf16>
    %c0_1 = arith.constant 0 : index
    %c0_2 = arith.constant 0 : index
    %1 = vector.load %arg4[%c0_1, %c0_2] : memref<64x32xbf16, #tpu.memory_space<vmem>>, vector<64x32xbf16>
    %cst = arith.constant dense<0.000000e+00> : vector<16x32xf32>
    %2 = tpu.matmul %0, %1, %cst {dimension_numbers = #tpu.dot_dimension_numbers<[1], [0], [0], [1], [0, 0, 1, 1], [], []>} : vector<16x64xbf16>, vector<64x32xbf16>, vector<16x32xf32> -> vector<16x32xf32>
    %c0_3 = arith.constant 0 : index
    %c0_4 = arith.constant 0 : index
    %3 = vector.load %arg3[%c0_3, %c0_4] : memref<16x64xbf16, #tpu.memory_space<vmem>>, vector<16x64xbf16>
    %c0_5 = arith.constant 0 : index
    %c0_6 = arith.constant 0 : index
    %4 = vector.load %arg5[%c0_5, %c0_6] : memref<64x32xbf16, #tpu.memory_space<vmem>>, vector<64x32xbf16>
    %cst_7 = arith.constant dense<0.000000e+00> : vector<16x32xf32>
    %5 = tpu.matmul %3, %4, %cst_7 {dimension_numbers = #tpu.dot_dimension_numbers<[1], [0], [0], [1], [0, 0, 1, 1], [], []>} : vector<16x64xbf16>, vector<64x32xbf16>, vector<16x32xf32> -> vector<16x32xf32>
    %6 = arith.addf %2, %5 : vector<16x32xf32>
    %c0_8 = arith.constant 0 : index
    %c0_9 = arith.constant 0 : index
    %7 = vector.load %arg6[%c0_8, %c0_9] : memref<1x32xf32, #tpu.memory_space<vmem>>, vector<1x32xf32>
    %8 = vector.broadcast %7 : vector<1x32xf32> to vector<16x32xf32>
    %9 = arith.addf %6, %8 : vector<16x32xf32>
    %c0_10 = arith.constant 0 : index
    %c0_11 = arith.constant 0 : index
    %10 = vector.load %arg7[%c0_10, %c0_11] : memref<16x32xf32, #tpu.memory_space<vmem>>, vector<16x32xf32>
    tpu.vector_store %arg7[%c0_10, %c0_11], %9 {strides = array<i32>} : memref<16x32xf32, #tpu.memory_space<vmem>>, vector<16x32xf32>,
    return
  }
  func.func @transform_0(%arg0: i32, %arg1: i32) -> (i32, i32) {
    %c0_i32 = arith.constant 0 : i32
    %c0_i32_0 = arith.constant 0 : i32
    return %arg1, %c0_i32 : i32, i32
  }
  func.func @transform_1(%arg0: i32, %arg1: i32) -> (i32, i32) {
    %c0_i32 = arith.constant 0 : i32
    %c0_i32_0 = arith.constant 0 : i32
    return %arg1, %c0_i32 : i32, i32
  }
  func.func @transform_2(%arg0: i32, %arg1: i32) -> (i32, i32) {
    %c0_i32 = arith.constant 0 : i32
    %c0_i32_0 = arith.constant 0 : i32
    return %c0_i32, %arg0 : i32, i32
  }
  func.func @transform_3(%arg0: i32, %arg1: i32) -> (i32, i32) {
    %c0_i32 = arith.constant 0 : i32
    %c0_i32_0 = arith.constant 0 : i32
    return %c0_i32, %arg0 : i32, i32
  }
  func.func @transform_4(%arg0: i32, %arg1: i32) -> (i32, i32) {
    %c0_i32 = arith.constant 0 : i32
    %c0_i32_0 = arith.constant 0 : i32
    return %c0_i32, %arg0 : i32, i32
  }
  func.func @transform_5(%arg0: i32, %arg1: i32) -> (i32, i32) {
    %c0_i32 = arith.constant 0 : i32
    return %arg1, %arg0 : i32, i32
  }
}

</mosaic_0001>

<bundles_post_ra>
// kernel: forward.7
= control target key start
LH: loop header
LB: loop body
LE: loop exit
PB: predicated region body
PF: predicated region fallthrough
CT: control target
= control target key end

     0   :  { %v301_v1 = vmov 0.0   ;;  %vm302_vm0 = vmmov 0   ;;  %s372_s0 = inlined_call_operand.vmem [shape: bf16[16,64], index: 0, kind: input, shape index: {}]   ;;  %s373_s1 = inlined_call_operand.vmem [shape: bf16[16,64], index: 1, kind: input, shape index: {}]   ;;  %s374_s2 = inlined_call_operand.vmem [shape: bf16[64,32], index: 2, kind: input, shape index: {}]   ;;  %s375_s3 = inlined_call_operand.vmem [shape: bf16[64,32], index: 3, kind: input, shape index: {}]   ;;  %s376_s4 = inlined_call_operand.vmem [shape: f32[1,32], index: 4, kind: input, shape index: {}]   ;;  %s377_s5 = inlined_call_operand.hbm [shape: f32[16,32], index: 5, kind: output, shape index: {}]  }
   0x1   :  { %v269_v0 = vld [vmem:[%s375_s3 + $0x18] sm:$0xff]   ;;  %240 = vmatprep.subr.bf16.mxu0 %v301_v1  ;;  %252 = vmatprep.subr.bf16.mxu1 %v301_v1  ;;  %v271_v3 = vld [vmem:[%s375_s3 + $0x10] sm:$0xff]   ;;  %v273_v5 = vld [vmem:[%s375_s3 + $0x8] sm:$0xff]  }
   0x2   :  { %v270_v2 = vld [vmem:[%s374_s2 + $0x18] sm:$0xff]   ;;  %241 = vmatpush3.bf16.msra.mxu0 %v269_v0  ;;  %248 = vmatprep.mubr.msk.bf16.mxu0 %vm302_vm0, %v301_v1  ;;  %v272_v4 = vld [vmem:[%s374_s2 + $0x10] sm:$0xff]   ;;  %v274_v6 = vld [vmem:[%s374_s2 + $0x8] sm:$0xff]  }
   0x3   :  { %253 = vmatpush3.bf16.msra.mxu1 %v270_v2  ;;  %242 = vmatprep.subr.bf16.mxu0 %v301_v1  ;;  %v275_v7 = vld [vmem:[%s375_s3] sm:$0xff]  }
   0x4   :  { %254 = vmatprep.subr.bf16.mxu1 %v301_v1  ;;  %260 = vmatprep.mubr.msk.bf16.mxu1 %vm302_vm0, %v301_v1 }
   0x6   :  { %243 = vmatpush3.bf16.msra.mxu0 %v271_v3 }
   0x7   :  { %255 = vmatpush3.bf16.msra.mxu1 %v272_v4  ;;  %244 = vmatprep.subr.bf16.mxu0 %v301_v1 }
   0x8   :  { %256 = vmatprep.subr.bf16.mxu1 %v301_v1 }
   0xa   :  { %245 = vmatpush3.bf16.msra.mxu0 %v273_v5 }
   0xb   :  { %10 = vsyncpa [#allocation3], 0  ;;  %257 = vmatpush3.bf16.msra.mxu1 %v274_v6  ;;  %246 = vmatprep.subr.bf16.mxu0 %v301_v1  ;;  %v276_v8 = vld [vmem:[%s374_s2] sm:$0xff]   ;;  %vm71_vm1 = vcmask 523264   ;;  %vm198_vm2 = vcmask 261120  }
   0xc   :  { %258 = vmatprep.subr.bf16.mxu1 %v301_v1  ;;  %v277_v9 = vld [vmem:[%s373_s1] sm:$0xff]   ;;  %s303_s1 = smov [#allocation2]  }
   0xd   :  { %v278_v10 = vld [vmem:[%s372_s0] sm:$0xff]   ;;  %s206_s2 = sshll.u32 %s303_s1, 4  ;;  %s207_s2 = int_to_ptr.vmem [resolvable:$true] %s206_s2 }
   0xe   :  { %247 = vmatpush3.bf16.msra.mxu0 %v275_v7  ;;  %v229_v13 = vld [vmem:[%s376_s4] ss:$0 sm:$0xff]  ;;  %s279_s0 = scalar_lea.vmem %s207_s2, 256  ;;  %p284_p1 = scmp.lt.s32.totalorder %s207_s2, %s207_s2 }
   0xf   :  { %259 = vmatpush3.bf16.msra.mxu1 %v276_v8  ;;  %p280_p0 = scmp.ne.s32.totalorder %s207_s2, %s279_s0  ;;  %p285_p2 = scmp.lt.s32.totalorder %s279_s0, %s279_s0 }
  0x11   :  { %249 = vmatmul.mubr.msk.bf16.vlgmr.msra.gmra.mxu0 %vm71_vm1, %v277_v9  ;;  %p286_p3 = por %p285_p2, %p284_p1 }
  0x12   :  { %261 = vmatmul.mubr.msk.bf16.vlgmr.msra.gmra.mxu1 %vm71_vm1, %v278_v10 }
  0x13   :  { %p287_p4 = pnand %p286_p3, %p280_p0 }
  0xd1   :  { %v109_v11 = vpop.f32.mrf.mxu0 }
  0xd2   :  { %v182_v12 = vpop.f32.mrf.mxu1 }
  0xd3   :  { %v183_v14 = vadd.f32 %v182_v12, %v109_v11  ;;  %v250_v15 = vpop.f32.mrf.mxu0 }
  0xd4   :  { %v262_v16 = vpop.f32.mrf.mxu1 }
  0xd5   :  { %v196_v17 = vadd.f32 %v229_v13, %v183_v14  ;;  %v112_v18 = vpop.f32.mrf.mxu0 }
  0xd6   :  { %v185_v19 = vpop.f32.mrf.mxu1 }
  0xd7   :  { %199 = vst.msk [vmem:[#allocation2] sm:$0xff] %vm198_vm2, %v196_v17  ;;  %v186_v20 = vadd.f32 %v185_v19, %v112_v18  ;;  %v251_v21 = vpop.f32.mrf.mxu0 }
  0xd8   :  { %v263_v22 = vpop.f32.mrf.mxu1 }
  0xd9   :  { %v197_v23 = vadd.f32 %v229_v13, %v186_v20 }
  0xdb   :  { %200 = vst.msk [vmem:[#allocation2 + $0x8] sm:$0xff] %vm198_vm2, %v197_v23 }
  0xdc   :  { %290 = shalt.err (!%p287_p4)
}
  0xdd   :  { %s304_s4 = smov 128   ;;  %s305_s14 = smov 8  }
  0xde   :  { %212 = dma.vmem_to_hbm [thread:$0]  %s207_s2, 256, %s377_s5, [#allocation3], %s304_s4, %s304_s4, %s305_s14  }
  0xdf   :  { %299 = dma.done.wait [#allocation3], 256  }
  0xe0   :  { %300 = vsyncadd [#allocation3], 4294967040 }
  0xe1   :  { %216 = vsyncpa [#allocation3], 1 }

// kernel: forward.6
= control target key start
LH: loop header
LB: loop body
LE: loop exit
PB: predicated region body
PF: predicated region fallthrough
CT: control target
= control target key end

     0   :  { %s853_s18 = smov 0   ;;  %s956_s0 = inlined_call_operand.vmem [shape: bf16[2,8,64], index: 0, kind: input, shape index: {}]   ;;  %s957_s1 = inlined_call_operand.vmem [shape: bf16[64,192], index: 1, kind: input, shape index: {}]   ;;  %s958_s2 = inlined_call_operand.vmem [shape: f32[1,192], index: 2, kind: input, shape index: {}]   ;;  %s959_s3 = inlined_call_operand.vmem [shape: bf16[64,64], index: 3, kind: input, shape index: {}]   ;;  %s960_s4 = inlined_call_operand.vmem [shape: f32[1,64], index: 4, kind: input, shape index: {}]   ;;  %s961_s5 = inlined_call_operand.vmem [shape: bf16[2,8,64], index: 5, kind: output, shape index: {}]  }
   0x1 LB: > { %s694_s19 = sadd.s32 4294967295, %s815_s18   ;;  %p698_p0 = scmp.ge.s32.totalorder %s815_s18, 1  ;;  %s815_s18 = sphi %s853_s18, %s15_s18  }
   0x2   : > { %p186_p1 = scmp.lt.s32.totalorder %s815_s18, 3 }
   0x4   : > { %p187_p2 = pnand %p698_p0, %p186_p1 }
   0x5   : > { %p212_p3 = scmp.lt.s32.totalorder (!%p187_p2), %s694_s19, 1  ;;  %s820_s17 = smov (!%p187_p2), 64  }
   0x6   : > { %190 = sbr.rel (%p187_p2) target bundleno = 1880 (0x758), region = 40  ;;  %s821_s20 = smov (!%p187_p2), 32  }
   0x7   : > { %s822_s21 = smov (!%p187_p2), 96  }
   0xb   : > { %v785_v0 = vld [vmem:[%s957_s1 + $0x34] ss:$8 sps:$4 sm:$0xff]   ;;  %v787_v1 = vld [vmem:[%s957_s1 + $0x30] ss:$8 sps:$4 sm:$0xff]   ;;  %v817_v2 = vmov 0   ;;  %s963_s19 = smov (!%p212_p3, %s694_s19), 1  ;;  %v232_v10 = vlaneseq }
   0xc   : > { %318 = vmatprep.mubr.bf16.mxu0 %v817_v2  ;;  %294 = vmatprep.subr.bf16.mxu0 %v785_v0  ;;  %v788_v3 = vld [vmem:[%s957_s1 + $0x24] ss:$8 sps:$4 sm:$0xff]   ;;  %v790_v4 = vld [vmem:[%s957_s1 + $0x20] ss:$8 sps:$4 sm:$0xff]   ;;  %v791_v5 = vld [vmem:[%s957_s1 + $0x14] ss:$8 sps:$4 sm:$0xff]  }
   0xd   : > { %295 = vmatpush1.bf16.msra.mxu0 %v787_v1  ;;  %v793_v6 = vld [vmem:[%s957_s1 + $0x10] ss:$8 sps:$4 sm:$0xff]   ;;  %v794_v7 = vld [vmem:[%s957_s1 + $0x4] ss:$8 sps:$4 sm:$0xff]   ;;  %s699_s9 = sshll.u32 %s963_s19, 2  ;;  %vm282_vm0 = vcmask 523264  }
   0xe   : > { %296 = vmatprep.subr.bf16.mxu0 %v788_v3  ;;  %v796_v8 = vld [vmem:[%s957_s1] ss:$8 sps:$4 sm:$0xff]   ;;  %s215_s14 = scalar_lea.vmem %s956_s0, %s699_s9  ;;  %v233_v11 = vshrl.u32 %v232_v10, 7  ;;  %v818_v12 = vmov 0.0   ;;  %vm819_vm1 = vmmov 0   ;;  %vm332_vm2 = vcmask 261120   ;;  %s219_s10 = scalar_lea.vmem %s961_s5, %s699_s9 }
   0xf   : > { %v221_v9 = vld [vmem:[%s215_s14] sm:$0xf]  ;;  %735 = vmatprep.subr.bf16.mxu1 %v818_v12  ;;  %737 = vmatprep.mubr.msk.bf16.mxu1 %vm819_vm1, %v818_v12  ;;  %vm395_vm3 = vcmask 1043456   ;;  %vm379_vm4 = vcmask 64512   ;;  %v797_v2 = vld [vmem:[%s959_s3 + $0x18] sm:$0xff]   ;;  %v798_v3 = vld [vmem:[%s959_s3 + $0x10] sm:$0xff]  }
  0x10   : > { %v234_v13 = vsub.s32 0, %v233_v11  ;;  %v230_v14 = vld [vmem:[%s958_s2] sm:$0x3]  ;;  %v238_v22 = vsub.s32 1, %v233_v11  ;;  %vm639_vm5 = vcmask 519168  }
  0x11   : > { %297 = vmatpush1.bf16.msra.mxu0 %v790_v4  ;;  %v799_v4 = vld [vmem:[%s959_s3 + $0x8] sm:$0xff]  }
  0x12   : > { %298 = vmatprep.subr.bf16.mxu0 %v791_v5  ;;  %v235_v15 = vrot.slane %v230_v14, %v234_v13  ;;  %v239_v23 = vrot.slane %v230_v14, %v238_v22  ;;  %v800_v5 = vld [vmem:[%s959_s3] sm:$0xff]  }
  0x15   : > { %299 = vmatpush1.bf16.msra.mxu0 %v793_v6 }
  0x16   : > { %300 = vmatprep.subr.bf16.mxu0 %v794_v7 }
  0x19   : > { %301 = vmatpush1.bf16.msra.mxu0 %v796_v8 }
  0x1a   : > { %759 = vmatprep.subr.bf16.mxu0 %v818_v12 }
  0x1c   : > { %709 = vmatmul.mubr.msk.bf16.vlgmr.msra.gmra.mxu0 %vm282_vm0, %v221_v9 }
  0x1d   : > { %767 = vmatprep.mubr.msk.bf16.mxu0 %vm819_vm1, %v818_v12  ;;  %760 = vmatpush3.bf16.msra.mxu0 %v797_v2 }
  0x1e   : > { %761 = vmatprep.subr.bf16.mxu0 %v818_v12 }
  0x21   : > { %762 = vmatpush3.bf16.msra.mxu0 %v798_v3 }
  0x22   : > { %763 = vmatprep.subr.bf16.mxu0 %v818_v12 }
  0x25   : > { %764 = vmatpush3.bf16.msra.mxu0 %v799_v4 }
  0x26   : > { %765 = vmatprep.subr.bf16.mxu0 %v818_v12 }
  0x29   : > { %766 = vmatpush3.bf16.msra.mxu0 %v800_v5 }
  0xdc   : > { %v320_v16 = vpop.f32.mrf.mxu0 }
  0xdd   : > { %v321_v17 = vadd.f32 %v320_v16, %v235_v15 }
  0xde   : > { %v322_v18 = vpop.f32.mrf.mxu0 }
  0xdf   : > { %v327_v19 = vpack.c.bf16 %v321_v17, %v321_v17  ;;  %v323_v25 = vadd.f32 %v322_v18, %v239_v23 }
  0xe0   : > { %v324_v20 = vpop.f32.mrf.mxu0 }
  0xe1   : > { %330 = vrot.lane.b32.xlu0 %v327_v19, %s820_s17  ;;  %v328_v27 = vpack.c.bf16 %v323_v25, %v323_v25 }
  0xe2   : > { %v325_v21 = vpop.f32.mrf.mxu0 }
  0xe3   : > { %v397_v28 = vsel %vm395_vm3, %v328_v27, 0 }
 0x153   : > { %v331_v24 = vpop.permute.xlu0 %330 }
 0x154   : > { %v337_v26 = vsel %vm332_vm2, %v331_v24, 0 }
 0x155   : > { %736 = vmatpush3.bf16.xpose.msra.mxu1 %v337_v26 }
 0x156   : > { %741 = vmatprep.subr.bf16.mxu1 %v818_v12 }
 0x15c   : > { %738 = vmatmul.mubr.msk.bf16.vlgmr.msra.gmra.mxu1 %vm332_vm2, %v327_v19 }
 0x15d   : > { %742 = vmatpush3.bf16.msra.mxu1 %v397_v28  ;;  %743 = vmatprep.mubr.msk.bf16.mxu1 %vm819_vm1, %v818_v12 }
 0x15e   : > { %747 = vmatprep.subr.bf16.mxu1 %v818_v12 }
 0x21c   : > { %v373_v29 = vpop.f32.mrf.mxu1 }
 0x21d   : > { %v380_v30 = vsel %vm379_vm4, %v373_v29, -inf }
 0x21e   : > { %381 = vmax.xlane.f32.xlu0 %v380_v30  ;;  %v739_v31 = vpop.f32.mrf.mxu1 }
 0x220   : > { %v376_v32 = vpop.f32.mrf.mxu1 }
 0x222   : > { %v740_v33 = vpop.f32.mrf.mxu1 }
 0x2a7   : > { %v382_v34 = vpop.xlane.xlu0 %381 }
 0x2a8   : > { %v383_v35 = vsub.f32 %v373_v29, %v382_v34 }
 0x2aa   : > { %v384_v36 = vmul.f32 1.442695, %v383_v35 }
 0x2ac   : > { %801 = vpow2.f32 %v384_v36 }
 0x2b9   : > { %v802_v37 = vpop.eup %801 }
 0x2ba   : > { %v386_v38 = vsel %vm379_vm4, %v802_v37, 0.0 }
 0x2bb   : > { %387 = vadd.xlane.f32.xlu1 %v386_v38 }
 0x2cc   : > { %441 = vrot.lane.b32.xlu1 %v327_v19, %s821_s20 }
 0x2d0   : > { %439 = vrot.lane.b32.xlu1 %v327_v19, %s822_s21 }
 0x344   : > { %v388_v39 = vpop.xlane.xlu1 %387 }
 0x345   : > { %803 = vrcp.f32 %v388_v39 }
 0x348   : > { %v442_v42 = vpop.permute.xlu1 %441 }
 0x349   : > { %v447_v44 = vsel %vm332_vm2, %v442_v42, 0 }
 0x34c   : > { %v440_v45 = vpop.permute.xlu1 %439 }
 0x352   : > { %v804_v40 = vpop.eup %803 }
 0x353   : > { %v390_v41 = vmul.f32 %v804_v40, %v802_v37 }
 0x355   : > { %v391_v43 = vpack.c.bf16 %v390_v41, %v390_v41 }
 0x357   : > { %744 = vmatmul.mubr.msk.bf16.vlgmr.msra.gmra.mxu1 %vm379_vm4, %v391_v43 }
 0x358   : > { %748 = vmatpush3.bf16.xpose.msra.mxu1 %v447_v44  ;;  %749 = vmatprep.mubr.msk.bf16.mxu1 %vm819_vm1, %v818_v12 }
 0x359   : > { %753 = vmatprep.subr.bf16.mxu1 %v818_v12 }
 0x35f   : > { %750 = vmatmul.mubr.msk.bf16.vlgmr.msra.gmra.mxu1 %vm332_vm2, %v440_v45 }
 0x360   : > { %755 = vmatprep.mubr.msk.bf16.mxu1 %vm819_vm1, %v818_v12  ;;  %v714_v12 = vld [vmem:[%s960_s4] ss:$0 sm:$0xff] }
 0x417   : > { %v433_v46 = vpop.f32.mrf.mxu1 }
 0x419   : > { %v745_v47 = vpop.f32.mrf.mxu1 }
 0x41b   : > { %v436_v48 = vpop.f32.mrf.mxu1 }
 0x41d   : > { %v746_v49 = vpop.f32.mrf.mxu1 }
 0x41f   : > { %v483_v50 = vpop.f32.mrf.mxu1 }
 0x420   : > { %v489_v51 = vsel %vm379_vm4, %v483_v50, -inf }
 0x421   : > { %490 = vmax.xlane.f32.xlu1 %v489_v51  ;;  %v751_v52 = vpop.f32.mrf.mxu1 }
 0x423   : > { %v486_v53 = vpop.f32.mrf.mxu1 }
 0x425   : > { %v752_v54 = vpop.f32.mrf.mxu1 }
 0x4aa   : > { %v491_v55 = vpop.xlane.xlu1 %490 }
 0x4ab   : > { %v492_v56 = vsub.f32 %v483_v50, %v491_v55 }
 0x4ad   : > { %v493_v57 = vmul.f32 1.442695, %v492_v56 }
 0x4af   : > { %805 = vpow2.f32 %v493_v57 }
 0x4bc   : > { %v806_v58 = vpop.eup %805 }
 0x4bd   : > { %v495_v59 = vsel %vm379_vm4, %v806_v58, 0.0 }
 0x4be   : > { %496 = vadd.xlane.f32.xlu0 %v495_v59 }
 0x4d4   : > { %502 = vrot.lane.b32.xlu0 %v328_v27, %s822_s21 }
 0x547   : > { %v497_v60 = vpop.xlane.xlu0 %496 }
 0x548   : > { %807 = vrcp.f32 %v497_v60 }
 0x54b   : > { %v503_v61 = vpop.permute.xlu0 %502 }
 0x54c   : > { %v508_v62 = vsel %vm395_vm3, %v503_v61, 0 }
 0x54d   : > { %754 = vmatpush3.bf16.msra.mxu1 %v508_v62 }
 0x555   : > { %v808_v63 = vpop.eup %807 }
 0x556   : > { %v499_v0 = vmul.f32 %v808_v63, %v806_v58 }
 0x558   : > { %v500_v1 = vpack.c.bf16 %v499_v0, %v499_v0 }
 0x55a   : > { %756 = vmatmul.mubr.msk.bf16.vlgmr.msra.gmra.mxu1 %vm379_vm4, %v500_v1 }
 0x61a   : > { %v544_v6 = vpop.f32.mrf.mxu1 }
 0x61b   : > { %551 = vrot.lane.b32.xlu0 %v544_v6, %s821_s20 }
 0x61c   : > { %v757_v7 = vpop.f32.mrf.mxu1 }
 0x61e   : > { %v547_v8 = vpop.f32.mrf.mxu1 }
 0x620   : > { %v758_v9 = vpop.f32.mrf.mxu1 }
 0x68d   : > { %v552_v10 = vpop.permute.xlu0 %551 }
 0x68e   : > { %v554_v11 = vsel %vm332_vm2, %v433_v46, %v552_v10 }
 0x68f   : > { %v555_v13 = vpack.c.bf16 %v554_v11, %v554_v11 }
 0x691   : > { %768 = vmatmul.mubr.msk.bf16.vlgmr.msra.gmra.mxu0 %vm282_vm0, %v555_v13 }
 0x751   : > { %v632_v14 = vpop.f32.mrf.mxu0 }
 0x752   : > { %v633_v15 = vadd.f32 %v714_v12, %v632_v14 }
 0x753   : > { %v769_v16 = vpop.f32.mrf.mxu0 }
 0x754   : > { %v638_v17 = vpack.c.bf16 %v633_v15, %v633_v15 }
 0x755   : > { %v635_v18 = vpop.f32.mrf.mxu0 }
 0x756   : > { %640 = vst.msk [vmem:[%s219_s10] sm:$0xf] %vm639_vm5, %v638_v17 }
 0x757   : > { %v770_v19 = vpop.f32.mrf.mxu0 }
 0x758 PF: > { %s15_s18 = sadd.s32 1, %s815_s18  }
 0x759   : > { %p12_p4 = scmp.ge.s32.totalorder %s15_s18, 4  }
 0x75b   :  { %14 = sbr.rel (!%p12_p4) target bundleno = 1 (0x1), region = 70 }

// kernel: forward.4
= control target key start
LH: loop header
LB: loop body
LE: loop exit
PB: predicated region body
PF: predicated region fallthrough
CT: control target
= control target key end

     0   :  { %v2074_v1 = vmov 0   ;;  %vm51_vm0 = vcmask 130048   ;;  %v31_v19 = vlaneseq  ;;  %s2076_s23 = smov 32   ;;  %vm726_vm1 = vcmask 261120   ;;  %s2598_s1 = inlined_call_operand.vmem [shape: bf16[16,256], index: 1, kind: input, shape index: {}]   ;;  %s2599_s0 = inlined_call_operand.vmem [shape: bf16[8,2,16], index: 0, kind: input, shape index: {}]   ;;  %s2600_s3 = inlined_call_operand.vmem [shape: bf16[64,256], index: 3, kind: input, shape index: {}]   ;;  %s2601_s2 = inlined_call_operand.vmem [shape: f32[1,256], index: 2, kind: input, shape index: {}]   ;;  %s2602_s4 = inlined_call_operand.vmem [shape: bf16[8,2,64], index: 4, kind: output, shape index: {}]  }
   0x1   :  { %v1931_v0 = vld [vmem:[%s2598_s1 + $0x4] ss:$8 sps:$4 sm:$0xff]   ;;  %87 = vmatprep.mubr.bf16.mxu0 %v2074_v1  ;;  %145 = vmatprep.mubr.bf16.mxu1 %v2074_v1  ;;  %v1933_v2 = vld [vmem:[%s2598_s1] ss:$8 sps:$4 sm:$0xff]   ;;  %v2141_v9 = vld [vmem:[%s2600_s3 + $0x34] ss:$8 sps:$4 sm:$0xff]  }
   0x2   :  { %69 = vmatprep.subr.bf16.mxu0 %v1931_v0  ;;  %127 = vmatprep.subr.bf16.mxu1 %v1931_v0  ;;  %v29_v3 = vld [vmem:[%s2599_s0] sm:$0x1]  ;;  %v1860_v4 = vld [vmem:[%s2599_s0 + $0x1] sm:$0x1]  ;;  %v1863_v5 = vld [vmem:[%s2599_s0 + $0x2] sm:$0x1] }
   0x3   :  { %70 = vmatpush1.bf16.msra.mxu0 %v1933_v2  ;;  %128 = vmatpush1.bf16.msra.mxu1 %v1933_v2  ;;  %v1866_v6 = vld [vmem:[%s2599_s0 + $0x3] sm:$0x1]  ;;  %v1869_v7 = vld [vmem:[%s2599_s0 + $0x4] sm:$0x1]  ;;  %v1872_v8 = vld [vmem:[%s2599_s0 + $0x5] sm:$0x1] }
   0x4   :  { %186 = vmatprep.subr.bf16.mxu0 %v1931_v0  ;;  %245 = vmatprep.subr.bf16.mxu1 %v1931_v0  ;;  %v1875_v10 = vld [vmem:[%s2599_s0 + $0x6] sm:$0x1]  ;;  %v1878_v11 = vld [vmem:[%s2599_s0 + $0x7] sm:$0x1]  ;;  %v2158_v12 = vld [vmem:[%s2600_s3 + $0x30] ss:$8 sps:$4 sm:$0xff]  }
   0x5   :  { %v2163_v13 = vld [vmem:[%s2600_s3 + $0x24] ss:$8 sps:$4 sm:$0xff]   ;;  %v2171_v14 = vld [vmem:[%s2600_s3 + $0x20] ss:$8 sps:$4 sm:$0xff]   ;;  %v2178_v15 = vld [vmem:[%s2600_s3 + $0x14] ss:$8 sps:$4 sm:$0xff]  }
   0x6   :  { %1858 = vmatmul.mubr.msk.bf16.vlgmr.msra.gmra.mxu0 %vm51_vm0, %v29_v3  ;;  %1861 = vmatmul.mubr.msk.bf16.vlgmr.msra.gmra.mxu1 %vm51_vm0, %v1860_v4  ;;  %v2187_v16 = vld [vmem:[%s2600_s3 + $0x10] ss:$8 sps:$4 sm:$0xff]   ;;  %v2193_v17 = vld [vmem:[%s2600_s3 + $0x4] ss:$8 sps:$4 sm:$0xff]   ;;  %v2201_v18 = vld [vmem:[%s2600_s3] ss:$8 sps:$4 sm:$0xff]  }
   0x7   :  { %187 = vmatpush1.bf16.msra.mxu0 %v1933_v2  ;;  %246 = vmatpush1.bf16.msra.mxu1 %v1933_v2  ;;  %v2220_v20 = vshrl.u32 %v31_v19, 7  ;;  %v20_v23 = vld [vmem:[%s2601_s2] sm:$0x3]  ;;  %s2075_s2 = smov 64   ;;  %vm561_vm2 = vcmask 523264   ;;  %vm680_vm3 = vcmask 253952  }
   0x8   :  { %204 = vmatprep.mubr.bf16.mxu0 %v2074_v1  ;;  %263 = vmatprep.mubr.bf16.mxu1 %v2074_v1  ;;  %vm702_vm4 = vcmask 516352  }
   0x9   :  { %304 = vmatprep.subr.bf16.mxu0 %v1931_v0  ;;  %363 = vmatprep.subr.bf16.mxu1 %v1931_v0  ;;  %v33_v21 = vsub.s32 0, %v2220_v20  ;;  %v37_v22 = vsub.s32 1, %v2220_v20 }
   0xb   :  { %v34_v24 = vrot.slane %v20_v23, %v33_v21  ;;  %v38_v25 = vrot.slane %v20_v23, %v37_v22 }
   0xe   :  { %1864 = vmatmul.mubr.msk.bf16.vlgmr.msra.gmra.mxu0 %vm51_vm0, %v1863_v5  ;;  %1867 = vmatmul.mubr.msk.bf16.vlgmr.msra.gmra.mxu1 %vm51_vm0, %v1866_v6 }
   0xf   :  { %305 = vmatpush1.bf16.msra.mxu0 %v1933_v2  ;;  %364 = vmatpush1.bf16.msra.mxu1 %v1933_v2 }
  0x10   :  { %322 = vmatprep.mubr.bf16.mxu0 %v2074_v1  ;;  %381 = vmatprep.mubr.bf16.mxu1 %v2074_v1 }
  0x11   :  { %422 = vmatprep.subr.bf16.mxu0 %v1931_v0  ;;  %481 = vmatprep.subr.bf16.mxu1 %v1931_v0 }
  0x16   :  { %1870 = vmatmul.mubr.msk.bf16.vlgmr.msra.gmra.mxu0 %vm51_vm0, %v1869_v7  ;;  %1873 = vmatmul.mubr.msk.bf16.vlgmr.msra.gmra.mxu1 %vm51_vm0, %v1872_v8 }
  0x17   :  { %423 = vmatpush1.bf16.msra.mxu0 %v1933_v2  ;;  %482 = vmatpush1.bf16.msra.mxu1 %v1933_v2 }
  0x18   :  { %440 = vmatprep.mubr.bf16.mxu0 %v2074_v1  ;;  %499 = vmatprep.mubr.bf16.mxu1 %v2074_v1 }
  0x19   :  { %573 = vmatprep.subr.bf16.mxu0 %v2141_v9  ;;  %740 = vmatprep.subr.bf16.mxu1 %v2141_v9 }
  0x1e   :  { %1876 = vmatmul.mubr.msk.bf16.vlgmr.msra.gmra.mxu0 %vm51_vm0, %v1875_v10  ;;  %1879 = vmatmul.mubr.msk.bf16.vlgmr.msra.gmra.mxu1 %vm51_vm0, %v1878_v11 }
  0x1f   :  { %574 = vmatpush1.bf16.msra.mxu0 %v2158_v12  ;;  %597 = vmatprep.mubr.bf16.mxu0 %v2074_v1 }
  0x20   :  { %575 = vmatprep.subr.bf16.mxu0 %v2163_v13  ;;  %741 = vmatpush1.bf16.msra.mxu1 %v2158_v12 }
  0x21   :  { %742 = vmatprep.subr.bf16.mxu1 %v2163_v13  ;;  %764 = vmatprep.mubr.bf16.mxu1 %v2074_v1 }
  0x23   :  { %576 = vmatpush1.bf16.msra.mxu0 %v2171_v14 }
  0x24   :  { %577 = vmatprep.subr.bf16.mxu0 %v2178_v15  ;;  %743 = vmatpush1.bf16.msra.mxu1 %v2171_v14 }
  0x25   :  { %744 = vmatprep.subr.bf16.mxu1 %v2178_v15 }
  0x27   :  { %578 = vmatpush1.bf16.msra.mxu0 %v2187_v16 }
  0x28   :  { %579 = vmatprep.subr.bf16.mxu0 %v2193_v17  ;;  %745 = vmatpush1.bf16.msra.mxu1 %v2187_v16 }
  0x29   :  { %746 = vmatprep.subr.bf16.mxu1 %v2193_v17 }
  0x2b   :  { %580 = vmatpush1.bf16.msra.mxu0 %v2201_v18 }
  0x2c   :  { %747 = vmatpush1.bf16.msra.mxu1 %v2201_v18  ;;  %905 = vmatprep.subr.bf16.mxu0 %v2141_v9 }
  0x2d   :  { %1070 = vmatprep.subr.bf16.mxu1 %v2141_v9 }
  0x2e   :  { %598 = vmatmul.mubr.bf16.vlgmr.msra.gmra.mxu0 %v2074_v1 }
  0x2f   :  { %906 = vmatpush1.bf16.msra.mxu0 %v2158_v12  ;;  %929 = vmatprep.mubr.bf16.mxu0 %v2074_v1 }
  0x30   :  { %907 = vmatprep.subr.bf16.mxu0 %v2163_v13 }
  0x33   :  { %908 = vmatpush1.bf16.msra.mxu0 %v2171_v14 }
  0x34   :  { %909 = vmatprep.subr.bf16.mxu0 %v2178_v15 }
  0x37   :  { %910 = vmatpush1.bf16.msra.mxu0 %v2187_v16 }
  0x38   :  { %911 = vmatprep.subr.bf16.mxu0 %v2193_v17 }
  0x3b   :  { %912 = vmatpush1.bf16.msra.mxu0 %v2201_v18 }
  0x3c   :  { %1235 = vmatprep.subr.bf16.mxu0 %v2141_v9 }
  0xc6   :  { %v89_v26 = vpop.f32.mrf.mxu0  ;;  %v147_v27 = vpop.f32.mrf.mxu1 }
  0xc7   :  { %v148_v28 = vadd.f32 %v147_v27, %v34_v24  ;;  %v90_v31 = vadd.f32 %v89_v26, %v34_v24 }
  0xc8   :  { %v91_v29 = vpop.f32.mrf.mxu0  ;;  %v149_v30 = vpop.f32.mrf.mxu1 }
  0xc9   :  { %v92_v32 = vadd.f32 %v91_v29, %v38_v25  ;;  %v150_v33 = vadd.f32 %v149_v30, %v38_v25 }
  0xca   :  { %v93_v34 = vpop.f32.mrf.mxu0  ;;  %v151_v35 = vpop.f32.mrf.mxu1 }
  0xcb   :  { %v98_v36 = vcombine.low %v90_v31, %v92_v32  ;;  %v156_v37 = vcombine.low %v148_v28, %v150_v33 }
  0xcc   :  { %v94_v38 = vpop.f32.mrf.mxu0  ;;  %v152_v39 = vpop.f32.mrf.mxu1 }
  0xcd   :  { %1859 = vst.sshfl [vmem:[#allocation2] sm:$0x33 pattern:$0x76325410] %v98_v36 }
  0xce   :  { %1862 = vst.sshfl [vmem:[#allocation2 + $0x4] sm:$0x33 pattern:$0x76325410] %v156_v37  ;;  %v206_v40 = vpop.f32.mrf.mxu0  ;;  %v265_v41 = vpop.f32.mrf.mxu1 }
  0xcf   :  { %v266_v42 = vadd.f32 %v265_v41, %v34_v24  ;;  %v207_v45 = vadd.f32 %v206_v40, %v34_v24 }
  0xd0   :  { %v208_v43 = vpop.f32.mrf.mxu0  ;;  %v267_v44 = vpop.f32.mrf.mxu1 }
  0xd1   :  { %v209_v46 = vadd.f32 %v208_v43, %v38_v25  ;;  %v268_v47 = vadd.f32 %v267_v44, %v38_v25 }
  0xd2   :  { %v210_v48 = vpop.f32.mrf.mxu0  ;;  %v269_v49 = vpop.f32.mrf.mxu1 }
  0xd3   :  { %v215_v50 = vcombine.low %v207_v45, %v209_v46  ;;  %v274_v51 = vcombine.low %v266_v42, %v268_v47 }
  0xd4   :  { %v211_v52 = vpop.f32.mrf.mxu0  ;;  %v270_v53 = vpop.f32.mrf.mxu1  ;;  %v606_v33 = vld [vmem:[#allocation2] sm:$0xf] }
  0xd5   :  { %1865 = vst.sshfl [vmem:[#allocation2 + $0x8] sm:$0x33 pattern:$0x76325410] %v215_v50 }
  0xd6   :  { %1868 = vst.sshfl [vmem:[#allocation2 + $0xc] sm:$0x33 pattern:$0x76325410] %v274_v51  ;;  %v324_v54 = vpop.f32.mrf.mxu0  ;;  %v383_v55 = vpop.f32.mrf.mxu1 }
  0xd7   :  { %v384_v56 = vadd.f32 %v383_v55, %v34_v24  ;;  %v325_v59 = vadd.f32 %v324_v54, %v34_v24 }
  0xd8   :  { %v326_v57 = vpop.f32.mrf.mxu0  ;;  %v385_v58 = vpop.f32.mrf.mxu1 }
  0xd9   :  { %v327_v60 = vadd.f32 %v326_v57, %v38_v25  ;;  %v386_v61 = vadd.f32 %v385_v58, %v38_v25 }
  0xda   :  { %v328_v62 = vpop.f32.mrf.mxu0  ;;  %v387_v63 = vpop.f32.mrf.mxu1 }
  0xdb   :  { %v333_v0 = vcombine.low %v325_v59, %v327_v60  ;;  %v392_v2 = vcombine.low %v384_v56, %v386_v61  ;;  %v2077_v59 = vmov 1983009808  }
  0xdc   :  { %v329_v3 = vpop.f32.mrf.mxu0  ;;  %v388_v4 = vpop.f32.mrf.mxu1  ;;  %v706_v60 = vunpack.c.l.s4 %v2077_v59 }
  0xdd   :  { %1871 = vst.sshfl [vmem:[#allocation2 + $0x10] sm:$0x33 pattern:$0x76325410] %v333_v0 }
  0xde   :  { %1874 = vst.sshfl [vmem:[#allocation2 + $0x14] sm:$0x33 pattern:$0x76325410] %v392_v2  ;;  %v442_v5 = vpop.f32.mrf.mxu0  ;;  %v501_v6 = vpop.f32.mrf.mxu1  ;;  %v707_v61 = vunpack.c.0.s8 %v706_v60 }
  0xdf   :  { %v502_v7 = vadd.f32 %v501_v6, %v34_v24  ;;  %v443_v11 = vadd.f32 %v442_v5, %v34_v24 }
  0xe0   :  { %v444_v8 = vpop.f32.mrf.mxu0  ;;  %v503_v10 = vpop.f32.mrf.mxu1  ;;  %v2240_v62 = vsub.s32 %v707_v61, %v2220_v20 }
  0xe1   :  { %v445_v19 = vadd.f32 %v444_v8, %v38_v25  ;;  %v504_v21 = vadd.f32 %v503_v10, %v38_v25 }
  0xe2   :  { %v446_v22 = vpop.f32.mrf.mxu0  ;;  %v505_v23 = vpop.f32.mrf.mxu1 }
  0xe3   :  { %v451_v26 = vcombine.low %v443_v11, %v445_v19  ;;  %v510_v27 = vcombine.low %v502_v7, %v504_v21  ;;  %v773_v21 = vld [vmem:[#allocation2 + $0x4] sm:$0xf] }
  0xe4   :  { %v447_v28 = vpop.f32.mrf.mxu0  ;;  %v506_v29 = vpop.f32.mrf.mxu1 }
  0xe5   :  { %1877 = vst.sshfl [vmem:[#allocation2 + $0x18] sm:$0x33 pattern:$0x76325410] %v451_v26  ;;  %v940_v60 = vld [vmem:[#allocation2 + $0x14] sm:$0xf] }
  0xe6   :  { %1880 = vst.sshfl [vmem:[#allocation2 + $0x1c] sm:$0x33 pattern:$0x76325410] %v510_v27 }
  0xec   :  { %v775_v11 = vld [vmem:[#allocation2 + $0x18] sm:$0xf] }
  0xed   :  { %v608_v30 = vld [vmem:[#allocation2 + $0x1c] sm:$0xf]  ;;  %v777_v23 = vrot.slane %v775_v11, 2 }
  0xee   :  { %v610_v31 = vrot.slane %v608_v30, 2  ;;  %v599_v32 = vpop.f32.mrf.mxu0 }
  0xef   :  { %v607_v34 = vadd.f32 %v606_v33, %v599_v32 }
  0xf0   :  { %v601_v35 = vpop.f32.mrf.mxu0 }
  0xf1   :  { %1946 = vtanh.f32 %v607_v34  ;;  %v612_v36 = vadd.f32 %v610_v31, %v601_v35  ;;  %v1889_v39 = vmul.f32 -1.442695, %v607_v34 }
  0xf2   :  { %v603_v37 = vpop.f32.mrf.mxu0 }
  0xf3   :  { %1948 = vtanh.f32 %v612_v36  ;;  %v1890_v40 = vmul.f32 -1.442695, %v612_v36 }
  0xf4   :  { %v604_v24 = vpop.f32.mrf.mxu0  ;;  %1950 = vpow2.f32 %v1889_v39 }
  0xf5   :  { %1952 = vpow2.f32 %v1890_v40 }
  0xfe   :  { %v1947_v25 = vpop.eup %1946 }
  0xff   :  { %622 = vrot.lane.b32.xlu0 %v1947_v25, %s2075_s2 }
 0x100   :  { %v1949_v38 = vpop.eup %1948 }
 0x101   :  { %v1951_v41 = vpop.eup %1950 }
 0x102   :  { %v616_v42 = vadd.f32 1.0, %v1951_v41  ;;  %v1953_v43 = vpop.eup %1952 }
 0x103   :  { %646 = vrot.lane.b32.xlu0 %v1949_v38, %s2075_s2  ;;  %v640_v44 = vadd.f32 1.0, %v1953_v43 }
 0x104   :  { %1954 = vrcp.f32 %v616_v42 }
 0x105   :  { %1956 = vrcp.f32 %v640_v44 }
 0x111   :  { %v1955_v45 = vpop.eup %1954 }
 0x112   :  { %v1957_v48 = vpop.eup %1956  ;;  %v620_v51 = vmul.f32 0.0, %v1955_v45 }
 0x113   :  { %v644_v54 = vmul.f32 0.0, %v1957_v48 }
 0x171   :  { %v623_v46 = vpop.permute.xlu0 %622 }
 0x172   :  { %v625_v47 = vmul.f32 %v1955_v45, %v623_v46 }
 0x174   :  { %627 = vrot.lane.b32.xlu1 %v625_v47, %s2076_s23 }
 0x175   :  { %v647_v49 = vpop.permute.xlu0 %646 }
 0x176   :  { %v649_v50 = vmul.f32 %v1957_v48, %v647_v49 }
 0x178   :  { %651 = vrot.lane.b32.xlu1 %v649_v50, %s2076_s23 }
 0x1e6   :  { %v628_v52 = vpop.permute.xlu1 %627 }
 0x1e7   :  { %v2231_v53 = vadd.f32 %v628_v52, %v620_v51 }
 0x1e9   :  { %1958 = vtanh.f32 %v2231_v53 }
 0x1ea   :  { %v652_v55 = vpop.permute.xlu1 %651 }
 0x1eb   :  { %v2234_v56 = vadd.f32 %v652_v55, %v644_v54 }
 0x1ed   :  { %1960 = vtanh.f32 %v2234_v56 }
 0x1f6   :  { %v1959_v57 = vpop.eup %1958 }
 0x1f7   :  { %633 = vrot.lane.b32.xlu0 %v1959_v57, %s2075_s2 }
 0x1fa   :  { %v1961_v58 = vpop.eup %1960 }
 0x1fb   :  { %657 = vrot.lane.b32.xlu1 %v1961_v58, %s2075_s2 }
 0x269   :  { %v634_v63 = vpop.permute.xlu0 %633 }
 0x26a   :  { %v2242_v0 = vmul.f32 %v1955_v45, %v634_v63  ;;  %v938_v63 = vld [vmem:[#allocation2 + $0x8] sm:$0xf] }
 0x26c   :  { %v711_v2 = vrot.slane %v2242_v0, %v2240_v62 }
 0x26d   :  { %v658_v3 = vpop.permute.xlu1 %657 }
 0x26e   :  { %v2246_v4 = vmul.f32 %v1957_v48, %v658_v3  ;;  %712 = vrot.lane.b32.xlu0 %v711_v2, %s2076_s23  ;;  %v942_v3 = vrot.slane %v940_v60, 2 }
 0x270   :  { %v722_v5 = vrot.slane %v2246_v4, %v2240_v62 }
 0x272   :  { %723 = vrot.lane.b32.xlu1 %v722_v5, %s2075_s2 }
 0x2e0   :  { %v713_v6 = vpop.permute.xlu0 %712 }
 0x2e4   :  { %v724_v7 = vpop.permute.xlu1 %723 }
 0x2e5   :  { %v727_v8 = vsel %vm726_vm1, %v713_v6, %v724_v7 }
 0x2e6   :  { %v728_v10 = vpack.c.bf16 %v727_v8, %v727_v8 }
 0x2e8   :  { %1892 = vmatmul.mubr.msk.bf16.vlgmr.msra.gmra.mxu1 %vm561_vm2, %v728_v10 }
 0x2e9   :  { %1071 = vmatpush1.bf16.msra.mxu1 %v2158_v12  ;;  %1094 = vmatprep.mubr.bf16.mxu1 %v2074_v1 }
 0x2ea   :  { %1072 = vmatprep.subr.bf16.mxu1 %v2163_v13 }
 0x2ed   :  { %1073 = vmatpush1.bf16.msra.mxu1 %v2171_v14 }
 0x2ee   :  { %1074 = vmatprep.subr.bf16.mxu1 %v2178_v15 }
 0x2f1   :  { %1075 = vmatpush1.bf16.msra.mxu1 %v2187_v16 }
 0x2f2   :  { %1076 = vmatprep.subr.bf16.mxu1 %v2193_v17 }
 0x2f5   :  { %1077 = vmatpush1.bf16.msra.mxu1 %v2201_v18 }
 0x2f6   :  { %1398 = vmatprep.subr.bf16.mxu1 %v2141_v9 }
 0x3a8   :  { %v766_v19 = vpop.f32.mrf.mxu1 }
 0x3a9   :  { %v774_v22 = vadd.f32 %v773_v21, %v766_v19 }
 0x3aa   :  { %v768_v26 = vpop.f32.mrf.mxu1 }
 0x3ab   :  { %1962 = vtanh.f32 %v774_v22  ;;  %v779_v27 = vadd.f32 %v777_v23, %v768_v26  ;;  %v1893_v32 = vmul.f32 -1.442695, %v774_v22 }
 0x3ac   :  { %v770_v28 = vpop.f32.mrf.mxu1 }
 0x3ad   :  { %1964 = vtanh.f32 %v779_v27  ;;  %v1894_v33 = vmul.f32 -1.442695, %v779_v27 }
 0x3ae   :  { %v771_v29 = vpop.f32.mrf.mxu1  ;;  %1966 = vpow2.f32 %v1893_v32 }
 0x3af   :  { %1968 = vpow2.f32 %v1894_v33 }
 0x3b8   :  { %v1963_v30 = vpop.eup %1962 }
 0x3b9   :  { %789 = vrot.lane.b32.xlu0 %v1963_v30, %s2075_s2 }
 0x3ba   :  { %v1965_v31 = vpop.eup %1964 }
 0x3bb   :  { %813 = vrot.lane.b32.xlu1 %v1965_v31, %s2075_s2  ;;  %v1967_v34 = vpop.eup %1966 }
 0x3bc   :  { %v1969_v35 = vpop.eup %1968  ;;  %v783_v36 = vadd.f32 1.0, %v1967_v34 }
 0x3bd   :  { %v807_v37 = vadd.f32 1.0, %v1969_v35 }
 0x3be   :  { %1970 = vrcp.f32 %v783_v36 }
 0x3bf   :  { %1972 = vrcp.f32 %v807_v37 }
 0x3cb   :  { %v1971_v24 = vpop.eup %1970 }
 0x3cc   :  { %v1973_v39 = vpop.eup %1972  ;;  %v787_v42 = vmul.f32 %v1971_v24, %v2231_v53 }
 0x3cd   :  { %v811_v45 = vmul.f32 %v1973_v39, %v2234_v56 }
 0x42b   :  { %v790_v25 = vpop.permute.xlu0 %789 }
 0x42c   :  { %v792_v38 = vmul.f32 %v1971_v24, %v790_v25 }
 0x42d   :  { %v814_v40 = vpop.permute.xlu1 %813 }
 0x42e   :  { %794 = vrot.lane.b32.xlu0 %v792_v38, %s2076_s23  ;;  %v816_v41 = vmul.f32 %v1973_v39, %v814_v40 }
 0x430   :  { %818 = vrot.lane.b32.xlu1 %v816_v41, %s2076_s23 }
 0x4a0   :  { %v795_v43 = vpop.permute.xlu0 %794 }
 0x4a1   :  { %v2268_v44 = vadd.f32 %v795_v43, %v787_v42 }
 0x4a2   :  { %v819_v46 = vpop.permute.xlu1 %818 }
 0x4a3   :  { %1974 = vtanh.f32 %v2268_v44  ;;  %v2272_v47 = vadd.f32 %v819_v46, %v811_v45 }
 0x4a5   :  { %1976 = vtanh.f32 %v2272_v47 }
 0x4b0   :  { %v1975_v48 = vpop.eup %1974 }
 0x4b1   :  { %800 = vrot.lane.b32.xlu0 %v1975_v48, %s2075_s2 }
 0x4b2   :  { %v1977_v49 = vpop.eup %1976 }
 0x4b3   :  { %824 = vrot.lane.b32.xlu1 %v1977_v49, %s2075_s2 }
 0x523   :  { %v801_v50 = vpop.permute.xlu0 %800 }
 0x524   :  { %v2277_v51 = vmul.f32 %v1971_v24, %v801_v50  ;;  %v1105_v50 = vld [vmem:[#allocation2 + $0x10] sm:$0xf] }
 0x525   :  { %v825_v53 = vpop.permute.xlu1 %824 }
 0x526   :  { %v877_v52 = vrot.slane %v2277_v51, %v2240_v62  ;;  %v2281_v54 = vmul.f32 %v1973_v39, %v825_v53  ;;  %v1103_v53 = vld [vmem:[#allocation2 + $0xc] sm:$0xf] }
 0x528   :  { %878 = vrot.lane.b32.xlu0 %v877_v52, %s2076_s23  ;;  %v888_v55 = vrot.slane %v2281_v54, %v2240_v62 }
 0x52a   :  { %889 = vrot.lane.b32.xlu1 %v888_v55, %s2075_s2 }
 0x59a   :  { %v879_v56 = vpop.permute.xlu0 %878 }
 0x59c   :  { %v890_v57 = vpop.permute.xlu1 %889 }
 0x59d   :  { %v892_v58 = vsel %vm726_vm1, %v879_v56, %v890_v57  ;;  %v1107_v56 = vrot.slane %v1105_v50, 2 }
 0x59e   :  { %v893_v59 = vpack.c.bf16 %v892_v58, %v892_v58 }
 0x5a0   :  { %1897 = vmatmul.mubr.msk.bf16.vlgmr.msra.gmra.mxu0 %vm561_vm2, %v893_v59 }
 0x5a1   :  { %1236 = vmatpush1.bf16.msra.mxu0 %v2158_v12  ;;  %1259 = vmatprep.mubr.bf16.mxu0 %v2074_v1 }
 0x5a2   :  { %1237 = vmatprep.subr.bf16.mxu0 %v2163_v13 }
 0x5a5   :  { %1238 = vmatpush1.bf16.msra.mxu0 %v2171_v14 }
 0x5a6   :  { %1239 = vmatprep.subr.bf16.mxu0 %v2178_v15 }
 0x5a9   :  { %1240 = vmatpush1.bf16.msra.mxu0 %v2187_v16 }
 0x5aa   :  { %1241 = vmatprep.subr.bf16.mxu0 %v2193_v17 }
 0x5ad   :  { %1242 = vmatpush1.bf16.msra.mxu0 %v2201_v18 }
 0x5ae   :  { %1561 = vmatprep.subr.bf16.mxu0 %v2141_v9 }
 0x660   :  { %v931_v61 = vpop.f32.mrf.mxu0 }
 0x661   :  { %v939_v2 = vadd.f32 %v938_v63, %v931_v61 }
 0x662   :  { %v933_v5 = vpop.f32.mrf.mxu0 }
 0x663   :  { %1978 = vtanh.f32 %v939_v2  ;;  %v944_v6 = vadd.f32 %v942_v3, %v933_v5  ;;  %v1898_v19 = vmul.f32 -1.442695, %v939_v2 }
 0x664   :  { %v935_v7 = vpop.f32.mrf.mxu0 }
 0x665   :  { %1980 = vtanh.f32 %v944_v6  ;;  %v1899_v21 = vmul.f32 -1.442695, %v944_v6 }
 0x666   :  { %v936_v8 = vpop.f32.mrf.mxu0  ;;  %1982 = vpow2.f32 %v1898_v19 }
 0x667   :  { %1984 = vpow2.f32 %v1899_v21 }
 0x670   :  { %v1979_v10 = vpop.eup %1978 }
 0x671   :  { %954 = vrot.lane.b32.xlu0 %v1979_v10, %s2075_s2 }
 0x672   :  { %v1981_v11 = vpop.eup %1980 }
 0x673   :  { %978 = vrot.lane.b32.xlu1 %v1981_v11, %s2075_s2  ;;  %v1983_v22 = vpop.eup %1982 }
 0x674   :  { %v1985_v23 = vpop.eup %1984  ;;  %v948_v26 = vadd.f32 1.0, %v1983_v22 }
 0x675   :  { %v972_v27 = vadd.f32 1.0, %v1985_v23 }
 0x676   :  { %1986 = vrcp.f32 %v948_v26 }
 0x677   :  { %1988 = vrcp.f32 %v972_v27 }
 0x683   :  { %v1987_v28 = vpop.eup %1986 }
 0x684   :  { %v1989_v31 = vpop.eup %1988  ;;  %v952_v34 = vmul.f32 %v1987_v28, %v2268_v44 }
 0x685   :  { %v976_v37 = vmul.f32 %v1989_v31, %v2272_v47 }
 0x6e3   :  { %v955_v29 = vpop.permute.xlu0 %954 }
 0x6e4   :  { %v957_v30 = vmul.f32 %v1987_v28, %v955_v29 }
 0x6e5   :  { %v979_v32 = vpop.permute.xlu1 %978 }
 0x6e6   :  { %959 = vrot.lane.b32.xlu0 %v957_v30, %s2076_s23  ;;  %v981_v33 = vmul.f32 %v1989_v31, %v979_v32 }
 0x6e8   :  { %983 = vrot.lane.b32.xlu1 %v981_v33, %s2076_s23 }
 0x758   :  { %v960_v35 = vpop.permute.xlu0 %959 }
 0x759   :  { %v2303_v36 = vadd.f32 %v960_v35, %v952_v34 }
 0x75a   :  { %v984_v24 = vpop.permute.xlu1 %983 }
 0x75b   :  { %1990 = vtanh.f32 %v2303_v36  ;;  %v2307_v25 = vadd.f32 %v984_v24, %v976_v37 }
 0x75d   :  { %1992 = vtanh.f32 %v2307_v25 }
 0x768   :  { %v1991_v38 = vpop.eup %1990 }
 0x769   :  { %965 = vrot.lane.b32.xlu0 %v1991_v38, %s2075_s2 }
 0x76a   :  { %v1993_v39 = vpop.eup %1992 }
 0x76b   :  { %989 = vrot.lane.b32.xlu1 %v1993_v39, %s2075_s2 }
 0x7db   :  { %v966_v40 = vpop.permute.xlu0 %965 }
 0x7dc   :  { %v2312_v41 = vmul.f32 %v1987_v28, %v966_v40 }
 0x7dd   :  { %v990_v43 = vpop.permute.xlu1 %989 }
 0x7de   :  { %v1042_v42 = vrot.slane %v2312_v41, %v2240_v62  ;;  %v2316_v44 = vmul.f32 %v1989_v31, %v990_v43 }
 0x7e0   :  { %1043 = vrot.lane.b32.xlu0 %v1042_v42, %s2076_s23  ;;  %v1053_v45 = vrot.slane %v2316_v44, %v2240_v62  ;;  %v1270_v42 = vld [vmem:[#allocation2 + $0xc] sm:$0xf] }
 0x7e2   :  { %1054 = vrot.lane.b32.xlu1 %v1053_v45, %s2075_s2  ;;  %v1268_v45 = vld [vmem:[#allocation2 + $0x10] sm:$0xf] }
 0x852   :  { %v1044_v46 = vpop.permute.xlu0 %1043 }
 0x854   :  { %v1055_v47 = vpop.permute.xlu1 %1054 }
 0x855   :  { %v1057_v48 = vsel %vm726_vm1, %v1044_v46, %v1055_v47  ;;  %v1272_v47 = vrot.slane %v1270_v42, 2 }
 0x856   :  { %v1058_v49 = vpack.c.bf16 %v1057_v48, %v1057_v48 }
 0x858   :  { %1902 = vmatmul.mubr.msk.bf16.vlgmr.msra.gmra.mxu1 %vm561_vm2, %v1058_v49 }
 0x859   :  { %1399 = vmatpush1.bf16.msra.mxu1 %v2158_v12  ;;  %1422 = vmatprep.mubr.bf16.mxu1 %v2074_v1 }
 0x85a   :  { %1400 = vmatprep.subr.bf16.mxu1 %v2163_v13 }
 0x85d   :  { %1401 = vmatpush1.bf16.msra.mxu1 %v2171_v14 }
 0x85e   :  { %1402 = vmatprep.subr.bf16.mxu1 %v2178_v15 }
 0x861   :  { %1403 = vmatpush1.bf16.msra.mxu1 %v2187_v16 }
 0x862   :  { %1404 = vmatprep.subr.bf16.mxu1 %v2193_v17 }
 0x865   :  { %1405 = vmatpush1.bf16.msra.mxu1 %v2201_v18 }
 0x866   :  { %1724 = vmatprep.subr.bf16.mxu1 %v2141_v9 }
 0x918   :  { %v1096_v52 = vpop.f32.mrf.mxu1 }
 0x919   :  { %v1104_v55 = vadd.f32 %v1103_v53, %v1096_v52 }
 0x91a   :  { %v1098_v57 = vpop.f32.mrf.mxu1 }
 0x91b   :  { %1994 = vtanh.f32 %v1104_v55  ;;  %v1109_v58 = vadd.f32 %v1107_v56, %v1098_v57  ;;  %v1903_v2 = vmul.f32 -1.442695, %v1104_v55 }
 0x91c   :  { %v1100_v59 = vpop.f32.mrf.mxu1 }
 0x91d   :  { %1996 = vtanh.f32 %v1109_v58  ;;  %v1904_v3 = vmul.f32 -1.442695, %v1109_v58 }
 0x91e   :  { %v1101_v60 = vpop.f32.mrf.mxu1  ;;  %1998 = vpow2.f32 %v1903_v2 }
 0x91f   :  { %2000 = vpow2.f32 %v1904_v3 }
 0x928   :  { %v1995_v61 = vpop.eup %1994 }
 0x929   :  { %1119 = vrot.lane.b32.xlu0 %v1995_v61, %s2075_s2 }
 0x92a   :  { %v1997_v63 = vpop.eup %1996 }
 0x92b   :  { %1143 = vrot.lane.b32.xlu1 %v1997_v63, %s2075_s2  ;;  %v1999_v9 = vpop.eup %1998 }
 0x92c   :  { %v2001_v5 = vpop.eup %2000  ;;  %v1113_v6 = vadd.f32 1.0, %v1999_v9 }
 0x92d   :  { %v1137_v7 = vadd.f32 1.0, %v2001_v5 }
 0x92e   :  { %2002 = vrcp.f32 %v1113_v6 }
 0x92f   :  { %2004 = vrcp.f32 %v1137_v7 }
 0x93b   :  { %v2003_v8 = vpop.eup %2002 }
 0x93c   :  { %v2005_v19 = vpop.eup %2004  ;;  %v1117_v23 = vmul.f32 %v2003_v8, %v2303_v36 }
 0x93d   :  { %v1141_v28 = vmul.f32 %v2005_v19, %v2307_v25 }
 0x99b   :  { %v1120_v10 = vpop.permute.xlu0 %1119 }
 0x99c   :  { %v1122_v11 = vmul.f32 %v2003_v8, %v1120_v10 }
 0x99d   :  { %v1144_v21 = vpop.permute.xlu1 %1143 }
 0x99e   :  { %1124 = vrot.lane.b32.xlu0 %v1122_v11, %s2076_s23  ;;  %v1146_v22 = vmul.f32 %v2005_v19, %v1144_v21 }
 0x9a0   :  { %1148 = vrot.lane.b32.xlu1 %v1146_v22, %s2076_s23 }
 0xa10   :  { %v1125_v26 = vpop.permute.xlu0 %1124 }
 0xa11   :  { %v2338_v27 = vadd.f32 %v1125_v26, %v1117_v23 }
 0xa12   :  { %v1149_v29 = vpop.permute.xlu1 %1148 }
 0xa13   :  { %2006 = vtanh.f32 %v2338_v27  ;;  %v2342_v30 = vadd.f32 %v1149_v29, %v1141_v28 }
 0xa15   :  { %2008 = vtanh.f32 %v2342_v30 }
 0xa20   :  { %v2007_v31 = vpop.eup %2006 }
 0xa21   :  { %1130 = vrot.lane.b32.xlu0 %v2007_v31, %s2075_s2 }
 0xa22   :  { %v2009_v32 = vpop.eup %2008 }
 0xa23   :  { %1154 = vrot.lane.b32.xlu1 %v2009_v32, %s2075_s2 }
 0xa93   :  { %v1131_v33 = vpop.permute.xlu0 %1130 }
 0xa94   :  { %v2347_v34 = vmul.f32 %v2003_v8, %v1131_v33 }
 0xa95   :  { %v1155_v36 = vpop.permute.xlu1 %1154 }
 0xa96   :  { %v1207_v35 = vrot.slane %v2347_v34, %v2240_v62  ;;  %v2351_v37 = vmul.f32 %v2005_v19, %v1155_v36 }
 0xa98   :  { %1208 = vrot.lane.b32.xlu0 %v1207_v35, %s2076_s23  ;;  %v1218_v24 = vrot.slane %v2351_v37, %v2240_v62 }
 0xa9a   :  { %1219 = vrot.lane.b32.xlu1 %v1218_v24, %s2075_s2  ;;  %v1433_v24 = vld [vmem:[#allocation2 + $0x8] sm:$0xf] }
 0xb0a   :  { %v1209_v25 = vpop.permute.xlu0 %1208 }
 0xb0c   :  { %v1220_v38 = vpop.permute.xlu1 %1219 }
 0xb0d   :  { %v1222_v39 = vsel %vm726_vm1, %v1209_v25, %v1220_v38  ;;  %v1431_v38 = vld [vmem:[#allocation2 + $0x14] sm:$0xf] }
 0xb0e   :  { %v1223_v40 = vpack.c.bf16 %v1222_v39, %v1222_v39 }
 0xb10   :  { %1907 = vmatmul.mubr.msk.bf16.vlgmr.msra.gmra.mxu0 %vm561_vm2, %v1223_v40  ;;  %v1435_v40 = vrot.slane %v1433_v24, 2 }
 0xb11   :  { %1562 = vmatpush1.bf16.msra.mxu0 %v2158_v12  ;;  %1585 = vmatprep.mubr.bf16.mxu0 %v2074_v1 }
 0xb12   :  { %1563 = vmatprep.subr.bf16.mxu0 %v2163_v13 }
 0xb15   :  { %1564 = vmatpush1.bf16.msra.mxu0 %v2171_v14 }
 0xb16   :  { %1565 = vmatprep.subr.bf16.mxu0 %v2178_v15 }
 0xb19   :  { %1566 = vmatpush1.bf16.msra.mxu0 %v2187_v16 }
 0xb1a   :  { %1567 = vmatprep.subr.bf16.mxu0 %v2193_v17 }
 0xb1d   :  { %1568 = vmatpush1.bf16.msra.mxu0 %v2201_v18 }
 0xbd0   :  { %v1261_v43 = vpop.f32.mrf.mxu0 }
 0xbd1   :  { %v1269_v46 = vadd.f32 %v1268_v45, %v1261_v43 }
 0xbd2   :  { %v1263_v48 = vpop.f32.mrf.mxu0 }
 0xbd3   :  { %2010 = vtanh.f32 %v1269_v46  ;;  %v1274_v49 = vadd.f32 %v1272_v47, %v1263_v48  ;;  %v1908_v56 = vmul.f32 -1.442695, %v1269_v46 }
 0xbd4   :  { %v1265_v50 = vpop.f32.mrf.mxu0 }
 0xbd5   :  { %2012 = vtanh.f32 %v1274_v49  ;;  %v1909_v57 = vmul.f32 -1.442695, %v1274_v49 }
 0xbd6   :  { %v1266_v52 = vpop.f32.mrf.mxu0  ;;  %2014 = vpow2.f32 %v1908_v56 }
 0xbd7   :  { %2016 = vpow2.f32 %v1909_v57 }
 0xbe0   :  { %v2011_v53 = vpop.eup %2010 }
 0xbe1   :  { %1284 = vrot.lane.b32.xlu0 %v2011_v53, %s2075_s2 }
 0xbe2   :  { %v2013_v55 = vpop.eup %2012 }
 0xbe3   :  { %1308 = vrot.lane.b32.xlu1 %v2013_v55, %s2075_s2  ;;  %v2015_v58 = vpop.eup %2014 }
 0xbe4   :  { %v2017_v59 = vpop.eup %2016  ;;  %v1278_v60 = vadd.f32 1.0, %v2015_v58 }
 0xbe5   :  { %v1302_v61 = vadd.f32 1.0, %v2017_v59 }
 0xbe6   :  { %2018 = vrcp.f32 %v1278_v60 }
 0xbe7   :  { %2020 = vrcp.f32 %v1302_v61 }
 0xbf3   :  { %v2019_v63 = vpop.eup %2018 }
 0xbf4   :  { %v2021_v9 = vpop.eup %2020  ;;  %v1282_v7 = vmul.f32 %v2019_v63, %v2338_v27 }
 0xbf5   :  { %v1306_v11 = vmul.f32 %v2021_v9, %v2342_v30 }
 0xc53   :  { %v1285_v2 = vpop.permute.xlu0 %1284 }
 0xc54   :  { %v1287_v3 = vmul.f32 %v2019_v63, %v1285_v2 }
 0xc55   :  { %v1309_v5 = vpop.permute.xlu1 %1308 }
 0xc56   :  { %1289 = vrot.lane.b32.xlu0 %v1287_v3, %s2076_s23  ;;  %v1311_v6 = vmul.f32 %v2021_v9, %v1309_v5 }
 0xc58   :  { %1313 = vrot.lane.b32.xlu1 %v1311_v6, %s2076_s23 }
 0xcc8   :  { %v1290_v8 = vpop.permute.xlu0 %1289 }
 0xcc9   :  { %v2372_v10 = vadd.f32 %v1290_v8, %v1282_v7 }
 0xcca   :  { %v1314_v19 = vpop.permute.xlu1 %1313 }
 0xccb   :  { %2022 = vtanh.f32 %v2372_v10  ;;  %v2376_v21 = vadd.f32 %v1314_v19, %v1306_v11 }
 0xccd   :  { %2024 = vtanh.f32 %v2376_v21 }
 0xcd8   :  { %v2023_v22 = vpop.eup %2022 }
 0xcd9   :  { %1295 = vrot.lane.b32.xlu0 %v2023_v22, %s2075_s2 }
 0xcda   :  { %v2025_v23 = vpop.eup %2024 }
 0xcdb   :  { %1319 = vrot.lane.b32.xlu1 %v2025_v23, %s2075_s2  ;;  %v1594_v23 = vld [vmem:[#allocation2 + $0x18] sm:$0xf] }
 0xd4b   :  { %v1296_v26 = vpop.permute.xlu0 %1295 }
 0xd4c   :  { %v2381_v27 = vmul.f32 %v2019_v63, %v1296_v26 }
 0xd4d   :  { %v1320_v29 = vpop.permute.xlu1 %1319 }
 0xd4e   :  { %v1370_v28 = vrot.slane %v2381_v27, %v2240_v62  ;;  %v2385_v30 = vmul.f32 %v2021_v9, %v1320_v29 }
 0xd50   :  { %1371 = vrot.lane.b32.xlu0 %v1370_v28, %s2076_s23  ;;  %v1381_v31 = vrot.slane %v2385_v30, %v2240_v62 }
 0xd52   :  { %1382 = vrot.lane.b32.xlu1 %v1381_v31, %s2075_s2 }
 0xdc2   :  { %v1372_v32 = vpop.permute.xlu0 %1371 }
 0xdc4   :  { %v1383_v33 = vpop.permute.xlu1 %1382 }
 0xdc5   :  { %v1385_v35 = vsel %vm726_vm1, %v1372_v32, %v1383_v33 }
 0xdc6   :  { %v1386_v36 = vpack.c.bf16 %v1385_v35, %v1385_v35 }
 0xdc8   :  { %1912 = vmatmul.mubr.msk.bf16.vlgmr.msra.gmra.mxu1 %vm561_vm2, %v1386_v36 }
 0xdc9   :  { %1725 = vmatpush1.bf16.msra.mxu1 %v2158_v12  ;;  %1748 = vmatprep.mubr.bf16.mxu1 %v2074_v1 }
 0xdca   :  { %1726 = vmatprep.subr.bf16.mxu1 %v2163_v13 }
 0xdcd   :  { %1727 = vmatpush1.bf16.msra.mxu1 %v2171_v14 }
 0xdce   :  { %1728 = vmatprep.subr.bf16.mxu1 %v2178_v15 }
 0xdd1   :  { %1729 = vmatpush1.bf16.msra.mxu1 %v2187_v16 }
 0xdd2   :  { %1730 = vmatprep.subr.bf16.mxu1 %v2193_v17 }
 0xdd5   :  { %1731 = vmatpush1.bf16.msra.mxu1 %v2201_v18 }
 0xe88   :  { %v1424_v25 = vpop.f32.mrf.mxu1 }
 0xe89   :  { %v1432_v39 = vadd.f32 %v1431_v38, %v1424_v25 }
 0xe8a   :  { %v1426_v12 = vpop.f32.mrf.mxu1 }
 0xe8b   :  { %2026 = vtanh.f32 %v1432_v39  ;;  %v1437_v1 = vadd.f32 %v1435_v40, %v1426_v12  ;;  %v1913_v16 = vmul.f32 -1.442695, %v1432_v39 }
 0xe8c   :  { %v1428_v42 = vpop.f32.mrf.mxu1 }
 0xe8d   :  { %2028 = vtanh.f32 %v1437_v1  ;;  %v1914_v17 = vmul.f32 -1.442695, %v1437_v1 }
 0xe8e   :  { %v1429_v13 = vpop.f32.mrf.mxu1  ;;  %2030 = vpow2.f32 %v1913_v16 }
 0xe8f   :  { %2032 = vpow2.f32 %v1914_v17 }
 0xe98   :  { %v2027_v14 = vpop.eup %2026 }
 0xe99   :  { %1447 = vrot.lane.b32.xlu0 %v2027_v14, %s2075_s2 }
 0xe9a   :  { %v2029_v15 = vpop.eup %2028 }
 0xe9b   :  { %1471 = vrot.lane.b32.xlu1 %v2029_v15, %s2075_s2  ;;  %v2031_v18 = vpop.eup %2030 }
 0xe9c   :  { %v2033_v43 = vpop.eup %2032  ;;  %v1441_v45 = vadd.f32 1.0, %v2031_v18 }
 0xe9d   :  { %v1465_v46 = vadd.f32 1.0, %v2033_v43 }
 0xe9e   :  { %2034 = vrcp.f32 %v1441_v45 }
 0xe9f   :  { %2036 = vrcp.f32 %v1465_v46 }
 0xeab   :  { %v2035_v47 = vpop.eup %2034 }
 0xeac   :  { %v2037_v50 = vpop.eup %2036  ;;  %v1445_v55 = vmul.f32 %v2035_v47, %v2372_v10 }
 0xead   :  { %v1469_v58 = vmul.f32 %v2037_v50, %v2376_v21  ;;  %v1596_v21 = vld [vmem:[#allocation2 + $0x4] sm:$0xf] }
 0xeae   :  { %v1598_v28 = vrot.slane %v1596_v21, 2 }
 0xf0b   :  { %v1448_v48 = vpop.permute.xlu0 %1447 }
 0xf0c   :  { %v1450_v49 = vmul.f32 %v2035_v47, %v1448_v48 }
 0xf0d   :  { %v1472_v52 = vpop.permute.xlu1 %1471 }
 0xf0e   :  { %1452 = vrot.lane.b32.xlu0 %v1450_v49, %s2076_s23  ;;  %v1474_v53 = vmul.f32 %v2037_v50, %v1472_v52 }
 0xf10   :  { %1476 = vrot.lane.b32.xlu1 %v1474_v53, %s2076_s23 }
 0xf80   :  { %v1453_v56 = vpop.permute.xlu0 %1452 }
 0xf81   :  { %v1455_v57 = vadd.f32 %v1453_v56, %v1445_v55 }
 0xf82   :  { %v1477_v59 = vpop.permute.xlu1 %1476 }
 0xf83   :  { %2038 = vtanh.f32 %v1455_v57  ;;  %v1479_v60 = vadd.f32 %v1477_v59, %v1469_v58 }
 0xf85   :  { %2040 = vtanh.f32 %v1479_v60 }
 0xf90   :  { %v2039_v61 = vpop.eup %2038 }
 0xf91   :  { %1458 = vrot.lane.b32.xlu0 %v2039_v61, %s2075_s2 }
 0xf92   :  { %v2041_v63 = vpop.eup %2040 }
 0xf93   :  { %1482 = vrot.lane.b32.xlu1 %v2041_v63, %s2075_s2  ;;  %v1759_v63 = vld [vmem:[#allocation2] sm:$0xf] }
0x1003   :  { %v1459_v2 = vpop.permute.xlu0 %1458 }
0x1004   :  { %v2409_v3 = vmul.f32 %v2035_v47, %v1459_v2 }
0x1005   :  { %v1483_v5 = vpop.permute.xlu1 %1482 }
0x1006   :  { %v1533_v9 = vrot.slane %v2409_v3, %v2240_v62  ;;  %v2413_v6 = vmul.f32 %v2037_v50, %v1483_v5 }
0x1008   :  { %1534 = vrot.lane.b32.xlu0 %v1533_v9, %s2076_s23  ;;  %v1544_v7 = vrot.slane %v2413_v6, %v2240_v62  ;;  %v1757_v9 = vld [vmem:[#allocation2 + $0x1c] sm:$0xf] }
0x100a   :  { %1545 = vrot.lane.b32.xlu1 %v1544_v7, %s2075_s2  ;;  %v1761_v7 = vrot.slane %v1759_v63, 2  ;;  %v1343_v63 = vpack.c.bf16 %v2385_v30, %v2385_v30 }
0x107a   :  { %v1535_v8 = vpop.permute.xlu0 %1534 }
0x107c   :  { %v1546_v10 = vpop.permute.xlu1 %1545 }
0x107d   :  { %v1548_v11 = vsel %vm726_vm1, %v1535_v8, %v1546_v10 }
0x107e   :  { %v1549_v19 = vpack.c.bf16 %v1548_v11, %v1548_v11 }
0x1080   :  { %1917 = vmatmul.mubr.msk.bf16.vlgmr.msra.gmra.mxu0 %vm561_vm2, %v1549_v19 }
0x1140   :  { %v1587_v22 = vpop.f32.mrf.mxu0 }
0x1141   :  { %v1595_v26 = vadd.f32 %v1594_v23, %v1587_v22 }
0x1142   :  { %v1589_v29 = vpop.f32.mrf.mxu0 }
0x1143   :  { %2042 = vtanh.f32 %v1595_v26  ;;  %v1600_v31 = vadd.f32 %v1598_v28, %v1589_v29  ;;  %v1918_v24 = vmul.f32 -1.442695, %v1595_v26 }
0x1144   :  { %v1591_v32 = vpop.f32.mrf.mxu0 }
0x1145   :  { %2044 = vtanh.f32 %v1600_v31  ;;  %v1919_v25 = vmul.f32 -1.442695, %v1600_v31 }
0x1146   :  { %v1592_v33 = vpop.f32.mrf.mxu0  ;;  %2046 = vpow2.f32 %v1918_v24 }
0x1147   :  { %2048 = vpow2.f32 %v1919_v25 }
0x1150   :  { %v2043_v35 = vpop.eup %2042 }
0x1151   :  { %1610 = vrot.lane.b32.xlu0 %v2043_v35, %s2075_s2 }
0x1152   :  { %v2045_v36 = vpop.eup %2044 }
0x1153   :  { %1634 = vrot.lane.b32.xlu1 %v2045_v36, %s2075_s2  ;;  %v2047_v38 = vpop.eup %2046 }
0x1154   :  { %v2049_v39 = vpop.eup %2048  ;;  %v1604_v40 = vadd.f32 1.0, %v2047_v38 }
0x1155   :  { %v1628_v12 = vadd.f32 1.0, %v2049_v39 }
0x1156   :  { %2050 = vrcp.f32 %v1604_v40 }
0x1157   :  { %2052 = vrcp.f32 %v1628_v12 }
0x1163   :  { %v2051_v1 = vpop.eup %2050 }
0x1164   :  { %v2053_v14 = vpop.eup %2052  ;;  %v1608_v17 = vmul.f32 %v2051_v1, %v1455_v57 }
0x1165   :  { %v1632_v45 = vmul.f32 %v2053_v14, %v1479_v60 }
0x11c3   :  { %v1611_v42 = vpop.permute.xlu0 %1610 }
0x11c4   :  { %v1613_v13 = vmul.f32 %v2051_v1, %v1611_v42 }
0x11c5   :  { %v1635_v15 = vpop.permute.xlu1 %1634 }
0x11c6   :  { %1615 = vrot.lane.b32.xlu0 %v1613_v13, %s2076_s23  ;;  %v1637_v16 = vmul.f32 %v2053_v14, %v1635_v15 }
0x11c8   :  { %1639 = vrot.lane.b32.xlu1 %v1637_v16, %s2076_s23 }
0x1238   :  { %v1616_v18 = vpop.permute.xlu0 %1615 }
0x1239   :  { %v1618_v43 = vadd.f32 %v1616_v18, %v1608_v17  ;;  %v661_v17 = vpack.c.bf16 %v2242_v0, %v2242_v0  ;;  %v682_v18 = vpack.c.bf16 %v2246_v4, %v2246_v4  ;;  %v993_v0 = vpack.c.bf16 %v2312_v41, %v2312_v41 }
0x123a   :  { %v1640_v46 = vpop.permute.xlu1 %1639 }
0x123b   :  { %2054 = vtanh.f32 %v1618_v43  ;;  %v1642_v47 = vadd.f32 %v1640_v46, %v1632_v45  ;;  %v828_v45 = vpack.c.bf16 %v2277_v51, %v2277_v51 }
0x123d   :  { %2056 = vtanh.f32 %v1642_v47 }
0x1248   :  { %v2055_v48 = vpop.eup %2054 }
0x1249   :  { %1621 = vrot.lane.b32.xlu0 %v2055_v48, %s2075_s2 }
0x124a   :  { %v2057_v49 = vpop.eup %2056 }
0x124b   :  { %1645 = vrot.lane.b32.xlu1 %v2057_v49, %s2075_s2 }
0x12bb   :  { %v1622_v50 = vpop.permute.xlu0 %1621 }
0x12bc   :  { %v2427_v52 = vmul.f32 %v2051_v1, %v1622_v50  ;;  %v2078_v1 = vmov 1966171168   ;;  %v1014_v50 = vpack.c.bf16 %v2316_v44, %v2316_v44 }
0x12bd   :  { %v1646_v55 = vpop.permute.xlu1 %1645  ;;  %v664_v42 = vunpack.c.l.s4 %v2078_v1 }
0x12be   :  { %v1696_v53 = vrot.slane %v2427_v52, %v2240_v62  ;;  %v2431_v56 = vmul.f32 %v2053_v14, %v1646_v55  ;;  %v1158_v55 = vpack.c.bf16 %v2347_v34, %v2347_v34 }
0x12bf   :  { %v665_v15 = vunpack.c.0.s8 %v664_v42 }
0x12c0   :  { %1697 = vrot.lane.b32.xlu0 %v1696_v53, %s2076_s23  ;;  %v1707_v57 = vrot.slane %v2431_v56, %v2240_v62 }
0x12c1   :  { %v2452_v16 = vsub.s32 %v665_v15, %v2220_v20  ;;  %v849_v20 = vpack.c.bf16 %v2281_v54, %v2281_v54 }
0x12c2   :  { %1708 = vrot.lane.b32.xlu1 %v1707_v57, %s2075_s2 }
0x12c3   :  { %v836_v49 = vrot.slane %v828_v45, %v2452_v16  ;;  %v857_v51 = vrot.slane %v849_v20, %v2452_v16  ;;  %v1001_v54 = vrot.slane %v993_v0, %v2452_v16  ;;  %v1022_v57 = vrot.slane %v1014_v50, %v2452_v16 }
0x12c5   :  { %v843_v41 = vrot.slane %v836_v49, %v2452_v16  ;;  %v864_v44 = vrot.slane %v857_v51, %v2452_v16  ;;  %v1008_v34 = vrot.slane %v1001_v54, %v2452_v16 }
0x1332   :  { %v1698_v58 = vpop.permute.xlu0 %1697 }
0x1334   :  { %v1709_v59 = vpop.permute.xlu1 %1708 }
0x1335   :  { %v1711_v60 = vsel %vm726_vm1, %v1698_v58, %v1709_v59  ;;  %v1179_v58 = vpack.c.bf16 %v2351_v37, %v2351_v37  ;;  %v1166_v59 = vrot.slane %v1158_v55, %v2452_v16  ;;  %v1029_v37 = vrot.slane %v1022_v57, %v2452_v16 }
0x1336   :  { %v1712_v61 = vpack.c.bf16 %v1711_v60, %v1711_v60  ;;  %v1323_v60 = vpack.c.bf16 %v2381_v27, %v2381_v27 }
0x1337   :  { %v1173_v27 = vrot.slane %v1166_v59, %v2452_v16 }
0x1338   :  { %1922 = vmatmul.mubr.msk.bf16.vlgmr.msra.gmra.mxu1 %vm561_vm2, %v1712_v61  ;;  %v1187_v61 = vrot.slane %v1179_v58, %v2452_v16 }
0x133a   :  { %v1194_v30 = vrot.slane %v1187_v61, %v2452_v16 }
0x13f8   :  { %v1750_v2 = vpop.f32.mrf.mxu1 }
0x13f9   :  { %v1758_v5 = vadd.f32 %v1757_v9, %v1750_v2  ;;  %v1331_v2 = vrot.slane %v1323_v60, %v2452_v16  ;;  %v1486_v9 = vpack.c.bf16 %v2409_v3, %v2409_v3 }
0x13fa   :  { %v1752_v8 = vpop.f32.mrf.mxu1 }
0x13fb   :  { %2058 = vtanh.f32 %v1758_v5  ;;  %v1763_v10 = vadd.f32 %v1761_v7, %v1752_v8  ;;  %v1923_v22 = vmul.f32 -1.442695, %v1758_v5  ;;  %v1351_v5 = vrot.slane %v1343_v63, %v2452_v16 }
0x13fc   :  { %v1754_v11 = vpop.f32.mrf.mxu1  ;;  %v1506_v7 = vpack.c.bf16 %v2413_v6, %v2413_v6  ;;  %v1494_v8 = vrot.slane %v1486_v9, %v2452_v16  ;;  %v1338_v3 = vrot.slane %v1331_v2, %v2452_v16 }
0x13fd   :  { %2060 = vtanh.f32 %v1763_v10  ;;  %v1924_v23 = vmul.f32 -1.442695, %v1763_v10  ;;  %v1649_v10 = vpack.c.bf16 %v2427_v52, %v2427_v52  ;;  %v1358_v6 = vrot.slane %v1351_v5, %v2452_v16 }
0x13fe   :  { %v1755_v62 = vpop.f32.mrf.mxu1  ;;  %2062 = vpow2.f32 %v1923_v22  ;;  %v1514_v11 = vrot.slane %v1506_v7, %v2452_v16 }
0x13ff   :  { %2064 = vpow2.f32 %v1924_v23  ;;  %v1669_v62 = vpack.c.bf16 %v2431_v56, %v2431_v56 }
0x1400   :  { %v1521_v22 = vrot.slane %v1514_v11, %v2452_v16 }
0x1401   :  { %v1677_v52 = vrot.slane %v1669_v62, %v2452_v16 }
0x1403   :  { %v1684_v56 = vrot.slane %v1677_v52, %v2452_v16 }
0x1408   :  { %v2059_v19 = vpop.eup %2058 }
0x1409   :  { %1773 = vrot.lane.b32.xlu0 %v2059_v19, %s2075_s2  ;;  %v1657_v19 = vrot.slane %v1649_v10, %v2452_v16 }
0x140a   :  { %v2061_v21 = vpop.eup %2060 }
0x140b   :  { %1797 = vrot.lane.b32.xlu1 %v2061_v21, %s2075_s2  ;;  %v2063_v26 = vpop.eup %2062  ;;  %v1501_v21 = vrot.slane %v1494_v8, %v2452_v16  ;;  %v1664_v23 = vrot.slane %v1657_v19, %v2452_v16 }
0x140c   :  { %v2065_v28 = vpop.eup %2064  ;;  %v1767_v29 = vadd.f32 1.0, %v2063_v26 }
0x140d   :  { %v1791_v31 = vadd.f32 1.0, %v2065_v28 }
0x140e   :  { %2066 = vrcp.f32 %v1767_v29 }
0x140f   :  { %2068 = vrcp.f32 %v1791_v31 }
0x141b   :  { %v2441_v32 = vpop.eup %2066 }
0x141c   :  { %v2444_v36 = vpop.eup %2068  ;;  %v1771_v38 = vmul.f32 %v2441_v32, %v1618_v43  ;;  %v669_v43 = vrot.slane %v661_v17, %v2452_v16 }
0x141d   :  { %v1795_v12 = vmul.f32 %v2444_v36, %v1642_v47  ;;  %v690_v47 = vrot.slane %v682_v18, %v2452_v16 }
0x141e   :  { %v676_v4 = vrot.slane %v669_v43, %v2452_v16 }
0x141f   :  { %v697_v53 = vrot.slane %v690_v47, %v2452_v16 }
0x147b   :  { %v1774_v33 = vpop.permute.xlu0 %1773 }
0x147c   :  { %v1776_v35 = vmul.f32 %v2441_v32, %v1774_v33 }
0x147d   :  { %v1798_v24 = vpop.permute.xlu1 %1797 }
0x147e   :  { %1778 = vrot.lane.b32.xlu0 %v1776_v35, %s2076_s23  ;;  %v1800_v25 = vmul.f32 %v2444_v36, %v1798_v24 }
0x1480   :  { %1802 = vrot.lane.b32.xlu1 %v1800_v25, %s2076_s23 }
0x14f0   :  { %v1779_v39 = vpop.permute.xlu0 %1778 }
0x14f1   :  { %v1781_v40 = vadd.f32 %v1779_v39, %v1771_v38 }
0x14f2   :  { %v1803_v13 = vpop.permute.xlu1 %1802 }
0x14f3   :  { %2070 = vtanh.f32 %v1781_v40  ;;  %v1805_v14 = vadd.f32 %v1803_v13, %v1795_v12 }
0x14f5   :  { %2072 = vtanh.f32 %v1805_v14 }
0x1500   :  { %v2071_v46 = vpop.eup %2070 }
0x1501   :  { %1784 = vrot.lane.b32.xlu0 %v2071_v46, %s2075_s2 }
0x1502   :  { %v2073_v48 = vpop.eup %2072 }
0x1503   :  { %1808 = vrot.lane.b32.xlu1 %v2073_v48, %s2075_s2 }
0x1505   :  { %677 = vrot.lane.b32.xlu0 %v676_v4, %s2076_s23 }
0x1507   :  { %698 = vrot.lane.b32.xlu1 %v697_v53, %s2075_s2 }
0x1509   :  { %844 = vrot.lane.b32.xlu0 %v843_v41, %s2076_s23 }
0x150b   :  { %865 = vrot.lane.b32.xlu1 %v864_v44, %s2075_s2 }
0x150d   :  { %1009 = vrot.lane.b32.xlu0 %v1008_v34, %s2076_s23 }
0x150f   :  { %1030 = vrot.lane.b32.xlu1 %v1029_v37, %s2075_s2 }
0x1511   :  { %1174 = vrot.lane.b32.xlu0 %v1173_v27, %s2076_s23 }
0x1513   :  { %1195 = vrot.lane.b32.xlu1 %v1194_v30, %s2075_s2 }
0x1515   :  { %1339 = vrot.lane.b32.xlu0 %v1338_v3, %s2076_s23 }
0x1517   :  { %1359 = vrot.lane.b32.xlu1 %v1358_v6, %s2075_s2 }
0x1519   :  { %1502 = vrot.lane.b32.xlu0 %v1501_v21, %s2076_s23 }
0x151b   :  { %1522 = vrot.lane.b32.xlu1 %v1521_v22, %s2075_s2 }
0x151d   :  { %1665 = vrot.lane.b32.xlu0 %v1664_v23, %s2076_s23 }
0x151f   :  { %1685 = vrot.lane.b32.xlu1 %v1684_v56, %s2075_s2 }
0x1573   :  { %v1785_v26 = vpop.permute.xlu0 %1784 }
0x1574   :  { %v1787_v28 = vmul.f32 %v2441_v32, %v1785_v26 }
0x1575   :  { %v1809_v31 = vpop.permute.xlu1 %1808 }
0x1576   :  { %v1812_v29 = vpack.c.bf16 %v1787_v28, %v1787_v28  ;;  %v1811_v33 = vmul.f32 %v2444_v36, %v1809_v31 }
0x1577   :  { %v678_v35 = vpop.permute.xlu0 %677 }
0x1578   :  { %v1820_v24 = vrot.slane %v1812_v29, %v2452_v16  ;;  %681 = vst.msk [vmem:[%s2602_s4] sm:$0x1] %vm680_vm3, %v678_v35  ;;  %v1832_v25 = vpack.c.bf16 %v1811_v33, %v1811_v33 }
0x1579   :  { %v699_v38 = vpop.permute.xlu1 %698 }
0x157a   :  { %v1827_v39 = vrot.slane %v1820_v24, %v2452_v16  ;;  %v1840_v32 = vrot.slane %v1832_v25, %v2452_v16  ;;  %1891 = vst.msk [vmem:[%s2602_s4 + $0x7] sm:$0x1] %vm702_vm4, %v699_v38 }
0x157b   :  { %v845_v36 = vpop.permute.xlu0 %844 }
0x157c   :  { %1895 = vst.msk [vmem:[%s2602_s4 + $0x1] sm:$0x1] %vm680_vm3, %v845_v36  ;;  %1828 = vrot.lane.b32.xlu0 %v1827_v39, %s2076_s23  ;;  %v1847_v40 = vrot.slane %v1840_v32, %v2452_v16 }
0x157d   :  { %v866_v12 = vpop.permute.xlu1 %865 }
0x157e   :  { %1896 = vst.msk [vmem:[%s2602_s4 + $0x6] sm:$0x1] %vm702_vm4, %v866_v12  ;;  %1848 = vrot.lane.b32.xlu1 %v1847_v40, %s2075_s2 }
0x157f   :  { %v1010_v1 = vpop.permute.xlu0 %1009 }
0x1580   :  { %1900 = vst.msk [vmem:[%s2602_s4 + $0x2] sm:$0x1] %vm680_vm3, %v1010_v1 }
0x1581   :  { %v1031_v42 = vpop.permute.xlu1 %1030 }
0x1582   :  { %1901 = vst.msk [vmem:[%s2602_s4 + $0x5] sm:$0x1] %vm702_vm4, %v1031_v42 }
0x1583   :  { %v1175_v13 = vpop.permute.xlu0 %1174 }
0x1584   :  { %1905 = vst.msk [vmem:[%s2602_s4 + $0x3] sm:$0x1] %vm680_vm3, %v1175_v13 }
0x1585   :  { %v1196_v14 = vpop.permute.xlu1 %1195 }
0x1586   :  { %1906 = vst.msk [vmem:[%s2602_s4 + $0x4] sm:$0x1] %vm702_vm4, %v1196_v14 }
0x1587   :  { %v1340_v15 = vpop.permute.xlu0 %1339 }
0x1588   :  { %1910 = vst.msk [vmem:[%s2602_s4 + $0x4] sm:$0x1] %vm680_vm3, %v1340_v15 }
0x1589   :  { %v1360_v16 = vpop.permute.xlu1 %1359 }
0x158a   :  { %1911 = vst.msk [vmem:[%s2602_s4 + $0x3] sm:$0x1] %vm702_vm4, %v1360_v16 }
0x158b   :  { %v1503_v17 = vpop.permute.xlu0 %1502 }
0x158c   :  { %1915 = vst.msk [vmem:[%s2602_s4 + $0x5] sm:$0x1] %vm680_vm3, %v1503_v17 }
0x158d   :  { %v1523_v18 = vpop.permute.xlu1 %1522 }
0x158e   :  { %1916 = vst.msk [vmem:[%s2602_s4 + $0x2] sm:$0x1] %vm702_vm4, %v1523_v18 }
0x158f   :  { %v1666_v43 = vpop.permute.xlu0 %1665 }
0x1590   :  { %1920 = vst.msk [vmem:[%s2602_s4 + $0x6] sm:$0x1] %vm680_vm3, %v1666_v43 }
0x1591   :  { %v1686_v45 = vpop.permute.xlu1 %1685 }
0x1592   :  { %1921 = vst.msk [vmem:[%s2602_s4 + $0x1] sm:$0x1] %vm702_vm4, %v1686_v45 }
0x15ee   :  { %v1829_v46 = vpop.permute.xlu0 %1828 }
0x15ef   :  { %1925 = vst.msk [vmem:[%s2602_s4 + $0x7] sm:$0x1] %vm680_vm3, %v1829_v46 }
0x15f0   :  { %v1849_v47 = vpop.permute.xlu1 %1848 }
0x15f1   :  { %1851 = vst.msk [vmem:[%s2602_s4] sm:$0x1] %vm702_vm4, %v1849_v47 }

// kernel: forward.5
= control target key start
LH: loop header
LB: loop body
LE: loop exit
PB: predicated region body
PF: predicated region fallthrough
CT: control target
= control target key end

     0   :  { %v2124_v1 = vmov 0   ;;  %vm87_vm0 = vcmask 523264   ;;  %v37_v25 = vlaneseq  ;;  %s2126_s9 = smov 32   ;;  %vm761_vm1 = vcmask 261120   ;;  %s2746_s1 = inlined_call_operand.vmem [shape: bf16[64,256], index: 1, kind: input, shape index: {}]   ;;  %s2747_s3 = inlined_call_operand.vmem [shape: bf16[64,256], index: 3, kind: input, shape index: {}]   ;;  %s2748_s0 = inlined_call_operand.vmem [shape: bf16[8,2,64], index: 0, kind: input, shape index: {}]   ;;  %s2749_s2 = inlined_call_operand.vmem [shape: f32[1,256], index: 2, kind: input, shape index: {}]   ;;  %s2750_s4 = inlined_call_operand.vmem [shape: bf16[8,2,64], index: 4, kind: output, shape index: {}]  }
   0x1   :  { %v2157_v0 = vld [vmem:[%s2746_s1 + $0x34] ss:$8 sps:$4 sm:$0xff]   ;;  %123 = vmatprep.mubr.bf16.mxu0 %v2124_v1  ;;  %181 = vmatprep.mubr.bf16.mxu1 %v2124_v1  ;;  %v2164_v2 = vld [vmem:[%s2746_s1 + $0x30] ss:$8 sps:$4 sm:$0xff]   ;;  %v2171_v3 = vld [vmem:[%s2746_s1 + $0x24] ss:$8 sps:$4 sm:$0xff]  }
   0x2   :  { %99 = vmatprep.subr.bf16.mxu0 %v2157_v0  ;;  %157 = vmatprep.subr.bf16.mxu1 %v2157_v0  ;;  %v2178_v4 = vld [vmem:[%s2746_s1 + $0x20] ss:$8 sps:$4 sm:$0xff]   ;;  %v2185_v5 = vld [vmem:[%s2746_s1 + $0x14] ss:$8 sps:$4 sm:$0xff]   ;;  %v2192_v6 = vld [vmem:[%s2746_s1 + $0x10] ss:$8 sps:$4 sm:$0xff]  }
   0x3   :  { %100 = vmatpush1.bf16.msra.mxu0 %v2164_v2  ;;  %158 = vmatpush1.bf16.msra.mxu1 %v2164_v2  ;;  %v2199_v7 = vld [vmem:[%s2746_s1 + $0x4] ss:$8 sps:$4 sm:$0xff]   ;;  %v2206_v8 = vld [vmem:[%s2746_s1] ss:$8 sps:$4 sm:$0xff]   ;;  %v2291_v15 = vld [vmem:[%s2747_s3 + $0x34] ss:$8 sps:$4 sm:$0xff]  }
   0x4   :  { %101 = vmatprep.subr.bf16.mxu0 %v2171_v3  ;;  %159 = vmatprep.subr.bf16.mxu1 %v2171_v3  ;;  %v35_v9 = vld [vmem:[%s2748_s0] sm:$0x1]  ;;  %v1901_v10 = vld [vmem:[%s2748_s0 + $0x1] sm:$0x1]  ;;  %v1904_v11 = vld [vmem:[%s2748_s0 + $0x2] sm:$0x1] }
   0x5   :  { %v1907_v12 = vld [vmem:[%s2748_s0 + $0x3] sm:$0x1]  ;;  %v1910_v13 = vld [vmem:[%s2748_s0 + $0x4] sm:$0x1]  ;;  %v1913_v14 = vld [vmem:[%s2748_s0 + $0x5] sm:$0x1] }
   0x6   :  { %v1916_v16 = vld [vmem:[%s2748_s0 + $0x6] sm:$0x1]  ;;  %v1919_v17 = vld [vmem:[%s2748_s0 + $0x7] sm:$0x1]  ;;  %v2304_v18 = vld [vmem:[%s2747_s3 + $0x30] ss:$8 sps:$4 sm:$0xff]  }
   0x7   :  { %102 = vmatpush1.bf16.msra.mxu0 %v2178_v4  ;;  %160 = vmatpush1.bf16.msra.mxu1 %v2178_v4  ;;  %v2310_v19 = vld [vmem:[%s2747_s3 + $0x24] ss:$8 sps:$4 sm:$0xff]   ;;  %v2319_v20 = vld [vmem:[%s2747_s3 + $0x20] ss:$8 sps:$4 sm:$0xff]   ;;  %v2326_v21 = vld [vmem:[%s2747_s3 + $0x14] ss:$8 sps:$4 sm:$0xff]  }
   0x8   :  { %103 = vmatprep.subr.bf16.mxu0 %v2185_v5  ;;  %161 = vmatprep.subr.bf16.mxu1 %v2185_v5  ;;  %v2335_v22 = vld [vmem:[%s2747_s3 + $0x10] ss:$8 sps:$4 sm:$0xff]   ;;  %v2341_v23 = vld [vmem:[%s2747_s3 + $0x4] ss:$8 sps:$4 sm:$0xff]   ;;  %v2349_v24 = vld [vmem:[%s2747_s3] ss:$8 sps:$4 sm:$0xff]  }
   0x9   :  { %v2368_v26 = vshrl.u32 %v37_v25, 7  ;;  %v26_v28 = vld [vmem:[%s2749_s2] sm:$0x3]  ;;  %s2125_s2 = smov 64   ;;  %vm715_vm2 = vcmask 253952   ;;  %vm737_vm3 = vcmask 516352  }
   0xb   :  { %104 = vmatpush1.bf16.msra.mxu0 %v2192_v6  ;;  %162 = vmatpush1.bf16.msra.mxu1 %v2192_v6  ;;  %v39_v27 = vsub.s32 0, %v2368_v26  ;;  %v43_v29 = vsub.s32 1, %v2368_v26 }
   0xc   :  { %105 = vmatprep.subr.bf16.mxu0 %v2199_v7  ;;  %163 = vmatprep.subr.bf16.mxu1 %v2199_v7 }
   0xd   :  { %v40_v30 = vrot.slane %v26_v28, %v39_v27  ;;  %v44_v31 = vrot.slane %v26_v28, %v43_v29 }
   0xf   :  { %106 = vmatpush1.bf16.msra.mxu0 %v2206_v8  ;;  %164 = vmatpush1.bf16.msra.mxu1 %v2206_v8 }
  0x10   :  { %216 = vmatprep.subr.bf16.mxu0 %v2157_v0  ;;  %275 = vmatprep.subr.bf16.mxu1 %v2157_v0 }
  0x12   :  { %1899 = vmatmul.mubr.msk.bf16.vlgmr.msra.gmra.mxu0 %vm87_vm0, %v35_v9  ;;  %1902 = vmatmul.mubr.msk.bf16.vlgmr.msra.gmra.mxu1 %vm87_vm0, %v1901_v10 }
  0x13   :  { %217 = vmatpush1.bf16.msra.mxu0 %v2164_v2  ;;  %276 = vmatpush1.bf16.msra.mxu1 %v2164_v2 }
  0x14   :  { %218 = vmatprep.subr.bf16.mxu0 %v2171_v3  ;;  %277 = vmatprep.subr.bf16.mxu1 %v2171_v3 }
  0x15   :  { %240 = vmatprep.mubr.bf16.mxu0 %v2124_v1  ;;  %299 = vmatprep.mubr.bf16.mxu1 %v2124_v1 }
  0x17   :  { %219 = vmatpush1.bf16.msra.mxu0 %v2178_v4  ;;  %278 = vmatpush1.bf16.msra.mxu1 %v2178_v4 }
  0x18   :  { %220 = vmatprep.subr.bf16.mxu0 %v2185_v5  ;;  %279 = vmatprep.subr.bf16.mxu1 %v2185_v5 }
  0x1b   :  { %221 = vmatpush1.bf16.msra.mxu0 %v2192_v6  ;;  %280 = vmatpush1.bf16.msra.mxu1 %v2192_v6 }
  0x1c   :  { %222 = vmatprep.subr.bf16.mxu0 %v2199_v7  ;;  %281 = vmatprep.subr.bf16.mxu1 %v2199_v7 }
  0x1f   :  { %223 = vmatpush1.bf16.msra.mxu0 %v2206_v8  ;;  %282 = vmatpush1.bf16.msra.mxu1 %v2206_v8 }
  0x20   :  { %334 = vmatprep.subr.bf16.mxu0 %v2157_v0  ;;  %393 = vmatprep.subr.bf16.mxu1 %v2157_v0 }
  0x22   :  { %1905 = vmatmul.mubr.msk.bf16.vlgmr.msra.gmra.mxu0 %vm87_vm0, %v1904_v11  ;;  %1908 = vmatmul.mubr.msk.bf16.vlgmr.msra.gmra.mxu1 %vm87_vm0, %v1907_v12 }
  0x23   :  { %335 = vmatpush1.bf16.msra.mxu0 %v2164_v2  ;;  %394 = vmatpush1.bf16.msra.mxu1 %v2164_v2 }
  0x24   :  { %336 = vmatprep.subr.bf16.mxu0 %v2171_v3  ;;  %395 = vmatprep.subr.bf16.mxu1 %v2171_v3 }
  0x25   :  { %358 = vmatprep.mubr.bf16.mxu0 %v2124_v1  ;;  %417 = vmatprep.mubr.bf16.mxu1 %v2124_v1 }
  0x27   :  { %337 = vmatpush1.bf16.msra.mxu0 %v2178_v4  ;;  %396 = vmatpush1.bf16.msra.mxu1 %v2178_v4 }
  0x28   :  { %338 = vmatprep.subr.bf16.mxu0 %v2185_v5  ;;  %397 = vmatprep.subr.bf16.mxu1 %v2185_v5 }
  0x2b   :  { %339 = vmatpush1.bf16.msra.mxu0 %v2192_v6  ;;  %398 = vmatpush1.bf16.msra.mxu1 %v2192_v6 }
  0x2c   :  { %340 = vmatprep.subr.bf16.mxu0 %v2199_v7  ;;  %399 = vmatprep.subr.bf16.mxu1 %v2199_v7 }
  0x2f   :  { %341 = vmatpush1.bf16.msra.mxu0 %v2206_v8  ;;  %400 = vmatpush1.bf16.msra.mxu1 %v2206_v8 }
  0x30   :  { %452 = vmatprep.subr.bf16.mxu0 %v2157_v0  ;;  %511 = vmatprep.subr.bf16.mxu1 %v2157_v0 }
  0x32   :  { %1911 = vmatmul.mubr.msk.bf16.vlgmr.msra.gmra.mxu0 %vm87_vm0, %v1910_v13  ;;  %1914 = vmatmul.mubr.msk.bf16.vlgmr.msra.gmra.mxu1 %vm87_vm0, %v1913_v14 }
  0x33   :  { %453 = vmatpush1.bf16.msra.mxu0 %v2164_v2  ;;  %512 = vmatpush1.bf16.msra.mxu1 %v2164_v2 }
  0x34   :  { %454 = vmatprep.subr.bf16.mxu0 %v2171_v3  ;;  %513 = vmatprep.subr.bf16.mxu1 %v2171_v3 }
  0x35   :  { %476 = vmatprep.mubr.bf16.mxu0 %v2124_v1  ;;  %535 = vmatprep.mubr.bf16.mxu1 %v2124_v1 }
  0x37   :  { %455 = vmatpush1.bf16.msra.mxu0 %v2178_v4  ;;  %514 = vmatpush1.bf16.msra.mxu1 %v2178_v4 }
  0x38   :  { %456 = vmatprep.subr.bf16.mxu0 %v2185_v5  ;;  %515 = vmatprep.subr.bf16.mxu1 %v2185_v5 }
  0x3b   :  { %457 = vmatpush1.bf16.msra.mxu0 %v2192_v6  ;;  %516 = vmatpush1.bf16.msra.mxu1 %v2192_v6 }
  0x3c   :  { %458 = vmatprep.subr.bf16.mxu0 %v2199_v7  ;;  %517 = vmatprep.subr.bf16.mxu1 %v2199_v7 }
  0x3f   :  { %459 = vmatpush1.bf16.msra.mxu0 %v2206_v8  ;;  %518 = vmatpush1.bf16.msra.mxu1 %v2206_v8 }
  0x40   :  { %608 = vmatprep.subr.bf16.mxu0 %v2291_v15  ;;  %775 = vmatprep.subr.bf16.mxu1 %v2291_v15 }
  0x42   :  { %1917 = vmatmul.mubr.msk.bf16.vlgmr.msra.gmra.mxu0 %vm87_vm0, %v1916_v16  ;;  %1920 = vmatmul.mubr.msk.bf16.vlgmr.msra.gmra.mxu1 %vm87_vm0, %v1919_v17 }
  0x43   :  { %609 = vmatpush1.bf16.msra.mxu0 %v2304_v18  ;;  %632 = vmatprep.mubr.bf16.mxu0 %v2124_v1 }
  0x44   :  { %610 = vmatprep.subr.bf16.mxu0 %v2310_v19  ;;  %776 = vmatpush1.bf16.msra.mxu1 %v2304_v18 }
  0x45   :  { %777 = vmatprep.subr.bf16.mxu1 %v2310_v19  ;;  %799 = vmatprep.mubr.bf16.mxu1 %v2124_v1 }
  0x47   :  { %611 = vmatpush1.bf16.msra.mxu0 %v2319_v20 }
  0x48   :  { %612 = vmatprep.subr.bf16.mxu0 %v2326_v21  ;;  %778 = vmatpush1.bf16.msra.mxu1 %v2319_v20 }
  0x49   :  { %779 = vmatprep.subr.bf16.mxu1 %v2326_v21 }
  0x4b   :  { %613 = vmatpush1.bf16.msra.mxu0 %v2335_v22 }
  0x4c   :  { %614 = vmatprep.subr.bf16.mxu0 %v2341_v23  ;;  %780 = vmatpush1.bf16.msra.mxu1 %v2335_v22 }
  0x4d   :  { %781 = vmatprep.subr.bf16.mxu1 %v2341_v23 }
  0x4f   :  { %615 = vmatpush1.bf16.msra.mxu0 %v2349_v24 }
  0x50   :  { %782 = vmatpush1.bf16.msra.mxu1 %v2349_v24  ;;  %940 = vmatprep.subr.bf16.mxu0 %v2291_v15 }
  0x51   :  { %1105 = vmatprep.subr.bf16.mxu1 %v2291_v15 }
  0x52   :  { %633 = vmatmul.mubr.bf16.vlgmr.msra.gmra.mxu0 %v2124_v1 }
  0x53   :  { %941 = vmatpush1.bf16.msra.mxu0 %v2304_v18  ;;  %964 = vmatprep.mubr.bf16.mxu0 %v2124_v1 }
  0x54   :  { %942 = vmatprep.subr.bf16.mxu0 %v2310_v19 }
  0x57   :  { %943 = vmatpush1.bf16.msra.mxu0 %v2319_v20 }
  0x58   :  { %944 = vmatprep.subr.bf16.mxu0 %v2326_v21 }
  0x5b   :  { %945 = vmatpush1.bf16.msra.mxu0 %v2335_v22 }
  0x5c   :  { %946 = vmatprep.subr.bf16.mxu0 %v2341_v23 }
  0x5f   :  { %947 = vmatpush1.bf16.msra.mxu0 %v2349_v24 }
  0x60   :  { %1270 = vmatprep.subr.bf16.mxu0 %v2291_v15 }
  0xd2   :  { %v125_v32 = vpop.f32.mrf.mxu0  ;;  %v183_v33 = vpop.f32.mrf.mxu1 }
  0xd3   :  { %v126_v34 = vadd.f32 %v125_v32, %v40_v30  ;;  %v184_v35 = vadd.f32 %v183_v33, %v40_v30 }
  0xd4   :  { %v127_v36 = vpop.f32.mrf.mxu0  ;;  %v185_v37 = vpop.f32.mrf.mxu1 }
  0xd5   :  { %v128_v38 = vadd.f32 %v127_v36, %v44_v31  ;;  %v186_v39 = vadd.f32 %v185_v37, %v44_v31 }
  0xd6   :  { %v129_v40 = vpop.f32.mrf.mxu0  ;;  %v187_v41 = vpop.f32.mrf.mxu1 }
  0xd7   :  { %v134_v42 = vcombine.low %v126_v34, %v128_v38  ;;  %v192_v43 = vcombine.low %v184_v35, %v186_v39 }
  0xd8   :  { %v130_v44 = vpop.f32.mrf.mxu0  ;;  %v188_v45 = vpop.f32.mrf.mxu1 }
  0xd9   :  { %1900 = vst.sshfl [vmem:[#allocation2] sm:$0x33 pattern:$0x76325410] %v134_v42 }
  0xda   :  { %1903 = vst.sshfl [vmem:[#allocation2 + $0x4] sm:$0x33 pattern:$0x76325410] %v192_v43 }
  0xe0   :  { %v641_v39 = vld [vmem:[#allocation2] sm:$0xf] }
  0xe2   :  { %v242_v46 = vpop.f32.mrf.mxu0  ;;  %v301_v47 = vpop.f32.mrf.mxu1 }
  0xe3   :  { %v243_v48 = vadd.f32 %v242_v46, %v40_v30  ;;  %v302_v49 = vadd.f32 %v301_v47, %v40_v30 }
  0xe4   :  { %v244_v50 = vpop.f32.mrf.mxu0  ;;  %v303_v51 = vpop.f32.mrf.mxu1 }
  0xe5   :  { %v245_v52 = vadd.f32 %v244_v50, %v44_v31  ;;  %v304_v53 = vadd.f32 %v303_v51, %v44_v31 }
  0xe6   :  { %v246_v54 = vpop.f32.mrf.mxu0  ;;  %v305_v55 = vpop.f32.mrf.mxu1 }
  0xe7   :  { %v251_v56 = vcombine.low %v243_v48, %v245_v52  ;;  %v310_v57 = vcombine.low %v302_v49, %v304_v53 }
  0xe8   :  { %v247_v58 = vpop.f32.mrf.mxu0  ;;  %v306_v59 = vpop.f32.mrf.mxu1 }
  0xe9   :  { %1906 = vst.sshfl [vmem:[#allocation2 + $0x8] sm:$0x33 pattern:$0x76325410] %v251_v56 }
  0xea   :  { %1909 = vst.sshfl [vmem:[#allocation2 + $0xc] sm:$0x33 pattern:$0x76325410] %v310_v57 }
  0xf2   :  { %v360_v60 = vpop.f32.mrf.mxu0  ;;  %v419_v61 = vpop.f32.mrf.mxu1 }
  0xf3   :  { %v361_v62 = vadd.f32 %v360_v60, %v40_v30  ;;  %v420_v63 = vadd.f32 %v419_v61, %v40_v30 }
  0xf4   :  { %v362_v0 = vpop.f32.mrf.mxu0  ;;  %v421_v2 = vpop.f32.mrf.mxu1 }
  0xf5   :  { %v363_v3 = vadd.f32 %v362_v0, %v44_v31  ;;  %v422_v4 = vadd.f32 %v421_v2, %v44_v31  ;;  %v2127_v2 = vmov 1983009808  }
  0xf6   :  { %v364_v5 = vpop.f32.mrf.mxu0  ;;  %v423_v6 = vpop.f32.mrf.mxu1 }
  0xf7   :  { %v369_v7 = vcombine.low %v361_v62, %v363_v3  ;;  %v428_v8 = vcombine.low %v420_v63, %v422_v4  ;;  %v741_v3 = vunpack.c.l.s4 %v2127_v2 }
  0xf8   :  { %v365_v9 = vpop.f32.mrf.mxu0  ;;  %v424_v10 = vpop.f32.mrf.mxu1 }
  0xf9   :  { %1912 = vst.sshfl [vmem:[#allocation2 + $0x10] sm:$0x33 pattern:$0x76325410] %v369_v7  ;;  %v742_v4 = vunpack.c.0.s8 %v741_v3 }
  0xfa   :  { %1915 = vst.sshfl [vmem:[#allocation2 + $0x14] sm:$0x33 pattern:$0x76325410] %v428_v8 }
  0xfb   :  { %v2388_v5 = vsub.s32 %v742_v4, %v2368_v26 }
 0x101   :  { %v975_v3 = vld [vmem:[#allocation2 + $0x14] sm:$0xf] }
 0x102   :  { %v478_v11 = vpop.f32.mrf.mxu0  ;;  %v537_v12 = vpop.f32.mrf.mxu1 }
 0x103   :  { %v479_v13 = vadd.f32 %v478_v11, %v40_v30  ;;  %v538_v14 = vadd.f32 %v537_v12, %v40_v30 }
 0x104   :  { %v480_v16 = vpop.f32.mrf.mxu0  ;;  %v539_v17 = vpop.f32.mrf.mxu1 }
 0x105   :  { %v481_v25 = vadd.f32 %v480_v16, %v44_v31  ;;  %v540_v27 = vadd.f32 %v539_v17, %v44_v31 }
 0x106   :  { %v482_v28 = vpop.f32.mrf.mxu0  ;;  %v541_v29 = vpop.f32.mrf.mxu1 }
 0x107   :  { %v487_v32 = vcombine.low %v479_v13, %v481_v25  ;;  %v546_v33 = vcombine.low %v538_v14, %v540_v27  ;;  %v808_v27 = vld [vmem:[#allocation2 + $0x4] sm:$0xf] }
 0x108   :  { %v483_v34 = vpop.f32.mrf.mxu0  ;;  %v542_v35 = vpop.f32.mrf.mxu1 }
 0x109   :  { %1918 = vst.sshfl [vmem:[#allocation2 + $0x18] sm:$0x33 pattern:$0x76325410] %v487_v32 }
 0x10a   :  { %1921 = vst.sshfl [vmem:[#allocation2 + $0x1c] sm:$0x33 pattern:$0x76325410] %v546_v33 }
 0x110   :  { %v810_v17 = vld [vmem:[#allocation2 + $0x18] sm:$0xf] }
 0x111   :  { %v643_v36 = vld [vmem:[#allocation2 + $0x1c] sm:$0xf]  ;;  %v812_v29 = vrot.slane %v810_v17, 2 }
 0x112   :  { %v645_v37 = vrot.slane %v643_v36, 2  ;;  %v634_v38 = vpop.f32.mrf.mxu0 }
 0x113   :  { %v642_v40 = vadd.f32 %v641_v39, %v634_v38 }
 0x114   :  { %v636_v41 = vpop.f32.mrf.mxu0 }
 0x115   :  { %1996 = vtanh.f32 %v642_v40  ;;  %v647_v30 = vadd.f32 %v645_v37, %v636_v41  ;;  %v1930_v45 = vmul.f32 -1.442695, %v642_v40 }
 0x116   :  { %v638_v42 = vpop.f32.mrf.mxu0 }
 0x117   :  { %1998 = vtanh.f32 %v647_v30  ;;  %v1931_v46 = vmul.f32 -1.442695, %v647_v30 }
 0x118   :  { %v639_v43 = vpop.f32.mrf.mxu0  ;;  %2000 = vpow2.f32 %v1930_v45 }
 0x119   :  { %2002 = vpow2.f32 %v1931_v46 }
 0x122   :  { %v1997_v31 = vpop.eup %1996 }
 0x123   :  { %657 = vrot.lane.b32.xlu0 %v1997_v31, %s2125_s2 }
 0x124   :  { %v1999_v44 = vpop.eup %1998 }
 0x125   :  { %v2001_v47 = vpop.eup %2000 }
 0x126   :  { %v651_v48 = vadd.f32 1.0, %v2001_v47  ;;  %v2003_v49 = vpop.eup %2002 }
 0x127   :  { %681 = vrot.lane.b32.xlu0 %v1999_v44, %s2125_s2  ;;  %v675_v50 = vadd.f32 1.0, %v2003_v49 }
 0x128   :  { %2004 = vrcp.f32 %v651_v48 }
 0x129   :  { %2006 = vrcp.f32 %v675_v50 }
 0x135   :  { %v2005_v51 = vpop.eup %2004 }
 0x136   :  { %v2007_v54 = vpop.eup %2006  ;;  %v655_v57 = vmul.f32 0.0, %v2005_v51 }
 0x137   :  { %v679_v60 = vmul.f32 0.0, %v2007_v54 }
 0x195   :  { %v658_v52 = vpop.permute.xlu0 %657 }
 0x196   :  { %v660_v53 = vmul.f32 %v2005_v51, %v658_v52 }
 0x198   :  { %662 = vrot.lane.b32.xlu1 %v660_v53, %s2126_s9 }
 0x199   :  { %v682_v55 = vpop.permute.xlu0 %681 }
 0x19a   :  { %v684_v56 = vmul.f32 %v2007_v54, %v682_v55 }
 0x19c   :  { %686 = vrot.lane.b32.xlu1 %v684_v56, %s2126_s9 }
 0x20a   :  { %v663_v58 = vpop.permute.xlu1 %662 }
 0x20b   :  { %v2379_v59 = vadd.f32 %v663_v58, %v655_v57 }
 0x20d   :  { %2008 = vtanh.f32 %v2379_v59 }
 0x20e   :  { %v687_v61 = vpop.permute.xlu1 %686 }
 0x20f   :  { %v2382_v62 = vadd.f32 %v687_v61, %v679_v60 }
 0x211   :  { %2010 = vtanh.f32 %v2382_v62 }
 0x21a   :  { %v2009_v63 = vpop.eup %2008 }
 0x21b   :  { %668 = vrot.lane.b32.xlu0 %v2009_v63, %s2125_s2 }
 0x21e   :  { %v2011_v0 = vpop.eup %2010 }
 0x21f   :  { %692 = vrot.lane.b32.xlu1 %v2011_v0, %s2125_s2 }
 0x28d   :  { %v669_v6 = vpop.permute.xlu0 %668 }
 0x28e   :  { %v2390_v7 = vmul.f32 %v2005_v51, %v669_v6  ;;  %v973_v6 = vld [vmem:[#allocation2 + $0x8] sm:$0xf] }
 0x290   :  { %v746_v8 = vrot.slane %v2390_v7, %v2388_v5 }
 0x291   :  { %v693_v9 = vpop.permute.xlu1 %692 }
 0x292   :  { %v2394_v10 = vmul.f32 %v2007_v54, %v693_v9  ;;  %747 = vrot.lane.b32.xlu0 %v746_v8, %s2126_s9  ;;  %v977_v9 = vrot.slane %v975_v3, 2 }
 0x294   :  { %v757_v11 = vrot.slane %v2394_v10, %v2388_v5 }
 0x296   :  { %758 = vrot.lane.b32.xlu1 %v757_v11, %s2125_s2 }
 0x304   :  { %v748_v12 = vpop.permute.xlu0 %747 }
 0x308   :  { %v759_v13 = vpop.permute.xlu1 %758 }
 0x309   :  { %v762_v14 = vsel %vm761_vm1, %v748_v12, %v759_v13 }
 0x30a   :  { %v763_v16 = vpack.c.bf16 %v762_v14, %v762_v14 }
 0x30c   :  { %1933 = vmatmul.mubr.msk.bf16.vlgmr.msra.gmra.mxu1 %vm87_vm0, %v763_v16 }
 0x30d   :  { %1106 = vmatpush1.bf16.msra.mxu1 %v2304_v18  ;;  %1129 = vmatprep.mubr.bf16.mxu1 %v2124_v1 }
 0x30e   :  { %1107 = vmatprep.subr.bf16.mxu1 %v2310_v19 }
 0x311   :  { %1108 = vmatpush1.bf16.msra.mxu1 %v2319_v20 }
 0x312   :  { %1109 = vmatprep.subr.bf16.mxu1 %v2326_v21 }
 0x315   :  { %1110 = vmatpush1.bf16.msra.mxu1 %v2335_v22 }
 0x316   :  { %1111 = vmatprep.subr.bf16.mxu1 %v2341_v23 }
 0x319   :  { %1112 = vmatpush1.bf16.msra.mxu1 %v2349_v24 }
 0x31a   :  { %1433 = vmatprep.subr.bf16.mxu1 %v2291_v15 }
 0x3cc   :  { %v801_v25 = vpop.f32.mrf.mxu1 }
 0x3cd   :  { %v809_v28 = vadd.f32 %v808_v27, %v801_v25 }
 0x3ce   :  { %v803_v32 = vpop.f32.mrf.mxu1 }
 0x3cf   :  { %2012 = vtanh.f32 %v809_v28  ;;  %v814_v33 = vadd.f32 %v812_v29, %v803_v32  ;;  %v1934_v38 = vmul.f32 -1.442695, %v809_v28 }
 0x3d0   :  { %v805_v34 = vpop.f32.mrf.mxu1 }
 0x3d1   :  { %2014 = vtanh.f32 %v814_v33  ;;  %v1935_v39 = vmul.f32 -1.442695, %v814_v33 }
 0x3d2   :  { %v806_v35 = vpop.f32.mrf.mxu1  ;;  %2016 = vpow2.f32 %v1934_v38 }
 0x3d3   :  { %2018 = vpow2.f32 %v1935_v39 }
 0x3dc   :  { %v2013_v36 = vpop.eup %2012 }
 0x3dd   :  { %824 = vrot.lane.b32.xlu0 %v2013_v36, %s2125_s2 }
 0x3de   :  { %v2015_v37 = vpop.eup %2014 }
 0x3df   :  { %848 = vrot.lane.b32.xlu1 %v2015_v37, %s2125_s2  ;;  %v2017_v40 = vpop.eup %2016 }
 0x3e0   :  { %v2019_v41 = vpop.eup %2018  ;;  %v818_v30 = vadd.f32 1.0, %v2017_v40 }
 0x3e1   :  { %v842_v42 = vadd.f32 1.0, %v2019_v41 }
 0x3e2   :  { %2020 = vrcp.f32 %v818_v30 }
 0x3e3   :  { %2022 = vrcp.f32 %v842_v42 }
 0x3ef   :  { %v2021_v43 = vpop.eup %2020 }
 0x3f0   :  { %v2023_v45 = vpop.eup %2022  ;;  %v822_v48 = vmul.f32 %v2021_v43, %v2379_v59 }
 0x3f1   :  { %v846_v51 = vmul.f32 %v2023_v45, %v2382_v62 }
 0x44f   :  { %v825_v31 = vpop.permute.xlu0 %824 }
 0x450   :  { %v827_v44 = vmul.f32 %v2021_v43, %v825_v31 }
 0x451   :  { %v849_v46 = vpop.permute.xlu1 %848 }
 0x452   :  { %829 = vrot.lane.b32.xlu0 %v827_v44, %s2126_s9  ;;  %v851_v47 = vmul.f32 %v2023_v45, %v849_v46 }
 0x454   :  { %853 = vrot.lane.b32.xlu1 %v851_v47, %s2126_s9 }
 0x4c4   :  { %v830_v49 = vpop.permute.xlu0 %829 }
 0x4c5   :  { %v2416_v50 = vadd.f32 %v830_v49, %v822_v48 }
 0x4c6   :  { %v854_v52 = vpop.permute.xlu1 %853 }
 0x4c7   :  { %2024 = vtanh.f32 %v2416_v50  ;;  %v2420_v53 = vadd.f32 %v854_v52, %v846_v51 }
 0x4c9   :  { %2026 = vtanh.f32 %v2420_v53 }
 0x4d4   :  { %v2025_v54 = vpop.eup %2024 }
 0x4d5   :  { %835 = vrot.lane.b32.xlu0 %v2025_v54, %s2125_s2 }
 0x4d6   :  { %v2027_v55 = vpop.eup %2026 }
 0x4d7   :  { %859 = vrot.lane.b32.xlu1 %v2027_v55, %s2125_s2 }
 0x547   :  { %v836_v56 = vpop.permute.xlu0 %835 }
 0x548   :  { %v2425_v57 = vmul.f32 %v2021_v43, %v836_v56  ;;  %v1140_v56 = vld [vmem:[#allocation2 + $0x10] sm:$0xf] }
 0x549   :  { %v860_v59 = vpop.permute.xlu1 %859 }
 0x54a   :  { %v912_v58 = vrot.slane %v2425_v57, %v2388_v5  ;;  %v2429_v60 = vmul.f32 %v2023_v45, %v860_v59  ;;  %v1138_v59 = vld [vmem:[#allocation2 + $0xc] sm:$0xf] }
 0x54c   :  { %913 = vrot.lane.b32.xlu0 %v912_v58, %s2126_s9  ;;  %v923_v61 = vrot.slane %v2429_v60, %v2388_v5 }
 0x54e   :  { %924 = vrot.lane.b32.xlu1 %v923_v61, %s2125_s2 }
 0x5be   :  { %v914_v62 = vpop.permute.xlu0 %913 }
 0x5c0   :  { %v925_v63 = vpop.permute.xlu1 %924 }
 0x5c1   :  { %v927_v0 = vsel %vm761_vm1, %v914_v62, %v925_v63  ;;  %v1142_v62 = vrot.slane %v1140_v56, 2 }
 0x5c2   :  { %v928_v2 = vpack.c.bf16 %v927_v0, %v927_v0 }
 0x5c4   :  { %1938 = vmatmul.mubr.msk.bf16.vlgmr.msra.gmra.mxu0 %vm87_vm0, %v928_v2 }
 0x5c5   :  { %1271 = vmatpush1.bf16.msra.mxu0 %v2304_v18  ;;  %1294 = vmatprep.mubr.bf16.mxu0 %v2124_v1 }
 0x5c6   :  { %1272 = vmatprep.subr.bf16.mxu0 %v2310_v19 }
 0x5c9   :  { %1273 = vmatpush1.bf16.msra.mxu0 %v2319_v20 }
 0x5ca   :  { %1274 = vmatprep.subr.bf16.mxu0 %v2326_v21 }
 0x5cd   :  { %1275 = vmatpush1.bf16.msra.mxu0 %v2335_v22 }
 0x5ce   :  { %1276 = vmatprep.subr.bf16.mxu0 %v2341_v23 }
 0x5d1   :  { %1277 = vmatpush1.bf16.msra.mxu0 %v2349_v24 }
 0x5d2   :  { %1596 = vmatprep.subr.bf16.mxu0 %v2291_v15 }
 0x684   :  { %v966_v4 = vpop.f32.mrf.mxu0 }
 0x685   :  { %v974_v8 = vadd.f32 %v973_v6, %v966_v4 }
 0x686   :  { %v968_v11 = vpop.f32.mrf.mxu0 }
 0x687   :  { %2028 = vtanh.f32 %v974_v8  ;;  %v979_v12 = vadd.f32 %v977_v9, %v968_v11  ;;  %v1939_v25 = vmul.f32 -1.442695, %v974_v8 }
 0x688   :  { %v970_v13 = vpop.f32.mrf.mxu0 }
 0x689   :  { %2030 = vtanh.f32 %v979_v12  ;;  %v1940_v27 = vmul.f32 -1.442695, %v979_v12 }
 0x68a   :  { %v971_v14 = vpop.f32.mrf.mxu0  ;;  %2032 = vpow2.f32 %v1939_v25 }
 0x68b   :  { %2034 = vpow2.f32 %v1940_v27 }
 0x694   :  { %v2029_v16 = vpop.eup %2028 }
 0x695   :  { %989 = vrot.lane.b32.xlu0 %v2029_v16, %s2125_s2 }
 0x696   :  { %v2031_v17 = vpop.eup %2030 }
 0x697   :  { %1013 = vrot.lane.b32.xlu1 %v2031_v17, %s2125_s2  ;;  %v2033_v28 = vpop.eup %2032 }
 0x698   :  { %v2035_v29 = vpop.eup %2034  ;;  %v983_v32 = vadd.f32 1.0, %v2033_v28 }
 0x699   :  { %v1007_v33 = vadd.f32 1.0, %v2035_v29 }
 0x69a   :  { %2036 = vrcp.f32 %v983_v32 }
 0x69b   :  { %2038 = vrcp.f32 %v1007_v33 }
 0x6a7   :  { %v2037_v34 = vpop.eup %2036 }
 0x6a8   :  { %v2039_v37 = vpop.eup %2038  ;;  %v987_v40 = vmul.f32 %v2037_v34, %v2416_v50 }
 0x6a9   :  { %v1011_v42 = vmul.f32 %v2039_v37, %v2420_v53 }
 0x707   :  { %v990_v35 = vpop.permute.xlu0 %989 }
 0x708   :  { %v992_v36 = vmul.f32 %v2037_v34, %v990_v35 }
 0x709   :  { %v1014_v38 = vpop.permute.xlu1 %1013 }
 0x70a   :  { %994 = vrot.lane.b32.xlu0 %v992_v36, %s2126_s9  ;;  %v1016_v39 = vmul.f32 %v2039_v37, %v1014_v38 }
 0x70c   :  { %1018 = vrot.lane.b32.xlu1 %v1016_v39, %s2126_s9 }
 0x77c   :  { %v995_v41 = vpop.permute.xlu0 %994 }
 0x77d   :  { %v2451_v30 = vadd.f32 %v995_v41, %v987_v40 }
 0x77e   :  { %v1019_v43 = vpop.permute.xlu1 %1018 }
 0x77f   :  { %2040 = vtanh.f32 %v2451_v30  ;;  %v2455_v31 = vadd.f32 %v1019_v43, %v1011_v42 }
 0x781   :  { %2042 = vtanh.f32 %v2455_v31 }
 0x78c   :  { %v2041_v44 = vpop.eup %2040 }
 0x78d   :  { %1000 = vrot.lane.b32.xlu0 %v2041_v44, %s2125_s2 }
 0x78e   :  { %v2043_v45 = vpop.eup %2042 }
 0x78f   :  { %1024 = vrot.lane.b32.xlu1 %v2043_v45, %s2125_s2 }
 0x7ff   :  { %v1001_v46 = vpop.permute.xlu0 %1000 }
 0x800   :  { %v2460_v47 = vmul.f32 %v2037_v34, %v1001_v46 }
 0x801   :  { %v1025_v49 = vpop.permute.xlu1 %1024 }
 0x802   :  { %v1077_v48 = vrot.slane %v2460_v47, %v2388_v5  ;;  %v2464_v50 = vmul.f32 %v2039_v37, %v1025_v49 }
 0x804   :  { %1078 = vrot.lane.b32.xlu0 %v1077_v48, %s2126_s9  ;;  %v1088_v51 = vrot.slane %v2464_v50, %v2388_v5  ;;  %v1305_v48 = vld [vmem:[#allocation2 + $0xc] sm:$0xf] }
 0x806   :  { %1089 = vrot.lane.b32.xlu1 %v1088_v51, %s2125_s2  ;;  %v1303_v51 = vld [vmem:[#allocation2 + $0x10] sm:$0xf] }
 0x876   :  { %v1079_v52 = vpop.permute.xlu0 %1078 }
 0x878   :  { %v1090_v53 = vpop.permute.xlu1 %1089 }
 0x879   :  { %v1092_v54 = vsel %vm761_vm1, %v1079_v52, %v1090_v53  ;;  %v1307_v53 = vrot.slane %v1305_v48, 2 }
 0x87a   :  { %v1093_v55 = vpack.c.bf16 %v1092_v54, %v1092_v54 }
 0x87c   :  { %1943 = vmatmul.mubr.msk.bf16.vlgmr.msra.gmra.mxu1 %vm87_vm0, %v1093_v55 }
 0x87d   :  { %1434 = vmatpush1.bf16.msra.mxu1 %v2304_v18  ;;  %1457 = vmatprep.mubr.bf16.mxu1 %v2124_v1 }
 0x87e   :  { %1435 = vmatprep.subr.bf16.mxu1 %v2310_v19 }
 0x881   :  { %1436 = vmatpush1.bf16.msra.mxu1 %v2319_v20 }
 0x882   :  { %1437 = vmatprep.subr.bf16.mxu1 %v2326_v21 }
 0x885   :  { %1438 = vmatpush1.bf16.msra.mxu1 %v2335_v22 }
 0x886   :  { %1439 = vmatprep.subr.bf16.mxu1 %v2341_v23 }
 0x889   :  { %1440 = vmatpush1.bf16.msra.mxu1 %v2349_v24 }
 0x88a   :  { %1759 = vmatprep.subr.bf16.mxu1 %v2291_v15 }
 0x93c   :  { %v1131_v58 = vpop.f32.mrf.mxu1 }
 0x93d   :  { %v1139_v61 = vadd.f32 %v1138_v59, %v1131_v58 }
 0x93e   :  { %v1133_v63 = vpop.f32.mrf.mxu1 }
 0x93f   :  { %2044 = vtanh.f32 %v1139_v61  ;;  %v1144_v0 = vadd.f32 %v1142_v62, %v1133_v63  ;;  %v1944_v8 = vmul.f32 -1.442695, %v1139_v61 }
 0x940   :  { %v1135_v2 = vpop.f32.mrf.mxu1 }
 0x941   :  { %2046 = vtanh.f32 %v1144_v0  ;;  %v1945_v9 = vmul.f32 -1.442695, %v1144_v0 }
 0x942   :  { %v1136_v3 = vpop.f32.mrf.mxu1  ;;  %2048 = vpow2.f32 %v1944_v8 }
 0x943   :  { %2050 = vpow2.f32 %v1945_v9 }
 0x94c   :  { %v2045_v4 = vpop.eup %2044 }
 0x94d   :  { %1154 = vrot.lane.b32.xlu0 %v2045_v4, %s2125_s2 }
 0x94e   :  { %v2047_v6 = vpop.eup %2046 }
 0x94f   :  { %1178 = vrot.lane.b32.xlu1 %v2047_v6, %s2125_s2  ;;  %v2049_v15 = vpop.eup %2048 }
 0x950   :  { %v2051_v11 = vpop.eup %2050  ;;  %v1148_v12 = vadd.f32 1.0, %v2049_v15 }
 0x951   :  { %v1172_v13 = vadd.f32 1.0, %v2051_v11 }
 0x952   :  { %2052 = vrcp.f32 %v1148_v12 }
 0x953   :  { %2054 = vrcp.f32 %v1172_v13 }
 0x95f   :  { %v2053_v14 = vpop.eup %2052 }
 0x960   :  { %v2055_v25 = vpop.eup %2054  ;;  %v1152_v29 = vmul.f32 %v2053_v14, %v2451_v30 }
 0x961   :  { %v1176_v34 = vmul.f32 %v2055_v25, %v2455_v31 }
 0x9bf   :  { %v1155_v16 = vpop.permute.xlu0 %1154 }
 0x9c0   :  { %v1157_v17 = vmul.f32 %v2053_v14, %v1155_v16 }
 0x9c1   :  { %v1179_v27 = vpop.permute.xlu1 %1178 }
 0x9c2   :  { %1159 = vrot.lane.b32.xlu0 %v1157_v17, %s2126_s9  ;;  %v1181_v28 = vmul.f32 %v2055_v25, %v1179_v27 }
 0x9c4   :  { %1183 = vrot.lane.b32.xlu1 %v1181_v28, %s2126_s9 }
 0xa34   :  { %v1160_v32 = vpop.permute.xlu0 %1159 }
 0xa35   :  { %v2486_v33 = vadd.f32 %v1160_v32, %v1152_v29 }
 0xa36   :  { %v1184_v35 = vpop.permute.xlu1 %1183 }
 0xa37   :  { %2056 = vtanh.f32 %v2486_v33  ;;  %v2490_v36 = vadd.f32 %v1184_v35, %v1176_v34 }
 0xa39   :  { %2058 = vtanh.f32 %v2490_v36 }
 0xa44   :  { %v2057_v37 = vpop.eup %2056 }
 0xa45   :  { %1165 = vrot.lane.b32.xlu0 %v2057_v37, %s2125_s2 }
 0xa46   :  { %v2059_v38 = vpop.eup %2058 }
 0xa47   :  { %1189 = vrot.lane.b32.xlu1 %v2059_v38, %s2125_s2 }
 0xab7   :  { %v1166_v39 = vpop.permute.xlu0 %1165 }
 0xab8   :  { %v2495_v40 = vmul.f32 %v2053_v14, %v1166_v39 }
 0xab9   :  { %v1190_v30 = vpop.permute.xlu1 %1189 }
 0xaba   :  { %v1242_v41 = vrot.slane %v2495_v40, %v2388_v5  ;;  %v2499_v42 = vmul.f32 %v2055_v25, %v1190_v30 }
 0xabc   :  { %1243 = vrot.lane.b32.xlu0 %v1242_v41, %s2126_s9  ;;  %v1253_v43 = vrot.slane %v2499_v42, %v2388_v5 }
 0xabe   :  { %1254 = vrot.lane.b32.xlu1 %v1253_v43, %s2125_s2  ;;  %v1468_v43 = vld [vmem:[#allocation2 + $0x8] sm:$0xf] }
 0xb2e   :  { %v1244_v31 = vpop.permute.xlu0 %1243 }
 0xb30   :  { %v1255_v44 = vpop.permute.xlu1 %1254 }
 0xb31   :  { %v1257_v45 = vsel %vm761_vm1, %v1244_v31, %v1255_v44  ;;  %v1466_v44 = vld [vmem:[#allocation2 + $0x14] sm:$0xf] }
 0xb32   :  { %v1258_v46 = vpack.c.bf16 %v1257_v45, %v1257_v45 }
 0xb34   :  { %1948 = vmatmul.mubr.msk.bf16.vlgmr.msra.gmra.mxu0 %vm87_vm0, %v1258_v46  ;;  %v1470_v46 = vrot.slane %v1468_v43, 2 }
 0xb35   :  { %1597 = vmatpush1.bf16.msra.mxu0 %v2304_v18  ;;  %1620 = vmatprep.mubr.bf16.mxu0 %v2124_v1 }
 0xb36   :  { %1598 = vmatprep.subr.bf16.mxu0 %v2310_v19 }
 0xb39   :  { %1599 = vmatpush1.bf16.msra.mxu0 %v2319_v20 }
 0xb3a   :  { %1600 = vmatprep.subr.bf16.mxu0 %v2326_v21 }
 0xb3d   :  { %1601 = vmatpush1.bf16.msra.mxu0 %v2335_v22 }
 0xb3e   :  { %1602 = vmatprep.subr.bf16.mxu0 %v2341_v23 }
 0xb41   :  { %1603 = vmatpush1.bf16.msra.mxu0 %v2349_v24 }
 0xbf4   :  { %v1296_v49 = vpop.f32.mrf.mxu0 }
 0xbf5   :  { %v1304_v52 = vadd.f32 %v1303_v51, %v1296_v49 }
 0xbf6   :  { %v1298_v54 = vpop.f32.mrf.mxu0 }
 0xbf7   :  { %2060 = vtanh.f32 %v1304_v52  ;;  %v1309_v55 = vadd.f32 %v1307_v53, %v1298_v54  ;;  %v1949_v62 = vmul.f32 -1.442695, %v1304_v52 }
 0xbf8   :  { %v1300_v56 = vpop.f32.mrf.mxu0 }
 0xbf9   :  { %2062 = vtanh.f32 %v1309_v55  ;;  %v1950_v63 = vmul.f32 -1.442695, %v1309_v55 }
 0xbfa   :  { %v1301_v58 = vpop.f32.mrf.mxu0  ;;  %2064 = vpow2.f32 %v1949_v62 }
 0xbfb   :  { %2066 = vpow2.f32 %v1950_v63 }
 0xc04   :  { %v2061_v59 = vpop.eup %2060 }
 0xc05   :  { %1319 = vrot.lane.b32.xlu0 %v2061_v59, %s2125_s2 }
 0xc06   :  { %v2063_v61 = vpop.eup %2062 }
 0xc07   :  { %1343 = vrot.lane.b32.xlu1 %v2063_v61, %s2125_s2  ;;  %v2065_v0 = vpop.eup %2064 }
 0xc08   :  { %v2067_v2 = vpop.eup %2066  ;;  %v1313_v3 = vadd.f32 1.0, %v2065_v0 }
 0xc09   :  { %v1337_v4 = vadd.f32 1.0, %v2067_v2 }
 0xc0a   :  { %2068 = vrcp.f32 %v1313_v3 }
 0xc0b   :  { %2070 = vrcp.f32 %v1337_v4 }
 0xc17   :  { %v2069_v6 = vpop.eup %2068 }
 0xc18   :  { %v2071_v15 = vpop.eup %2070  ;;  %v1317_v13 = vmul.f32 %v2069_v6, %v2486_v33 }
 0xc19   :  { %v1341_v17 = vmul.f32 %v2071_v15, %v2490_v36 }
 0xc77   :  { %v1320_v8 = vpop.permute.xlu0 %1319 }
 0xc78   :  { %v1322_v9 = vmul.f32 %v2069_v6, %v1320_v8 }
 0xc79   :  { %v1344_v11 = vpop.permute.xlu1 %1343 }
 0xc7a   :  { %1324 = vrot.lane.b32.xlu0 %v1322_v9, %s2126_s9  ;;  %v1346_v12 = vmul.f32 %v2071_v15, %v1344_v11 }
 0xc7c   :  { %1348 = vrot.lane.b32.xlu1 %v1346_v12, %s2126_s9 }
 0xcec   :  { %v1325_v14 = vpop.permute.xlu0 %1324 }
 0xced   :  { %v2520_v16 = vadd.f32 %v1325_v14, %v1317_v13 }
 0xcee   :  { %v1349_v25 = vpop.permute.xlu1 %1348 }
 0xcef   :  { %2072 = vtanh.f32 %v2520_v16  ;;  %v2524_v27 = vadd.f32 %v1349_v25, %v1341_v17 }
 0xcf1   :  { %2074 = vtanh.f32 %v2524_v27 }
 0xcfc   :  { %v2073_v28 = vpop.eup %2072 }
 0xcfd   :  { %1330 = vrot.lane.b32.xlu0 %v2073_v28, %s2125_s2 }
 0xcfe   :  { %v2075_v29 = vpop.eup %2074 }
 0xcff   :  { %1354 = vrot.lane.b32.xlu1 %v2075_v29, %s2125_s2  ;;  %v1629_v29 = vld [vmem:[#allocation2 + $0x18] sm:$0xf] }
 0xd6f   :  { %v1331_v32 = vpop.permute.xlu0 %1330 }
 0xd70   :  { %v2529_v33 = vmul.f32 %v2069_v6, %v1331_v32 }
 0xd71   :  { %v1355_v35 = vpop.permute.xlu1 %1354 }
 0xd72   :  { %v1405_v34 = vrot.slane %v2529_v33, %v2388_v5  ;;  %v2533_v36 = vmul.f32 %v2071_v15, %v1355_v35 }
 0xd74   :  { %1406 = vrot.lane.b32.xlu0 %v1405_v34, %s2126_s9  ;;  %v1416_v37 = vrot.slane %v2533_v36, %v2388_v5 }
 0xd76   :  { %1417 = vrot.lane.b32.xlu1 %v1416_v37, %s2125_s2 }
 0xde6   :  { %v1407_v38 = vpop.permute.xlu0 %1406 }
 0xde8   :  { %v1418_v39 = vpop.permute.xlu1 %1417 }
 0xde9   :  { %v1420_v41 = vsel %vm761_vm1, %v1407_v38, %v1418_v39 }
 0xdea   :  { %v1421_v30 = vpack.c.bf16 %v1420_v41, %v1420_v41 }
 0xdec   :  { %1953 = vmatmul.mubr.msk.bf16.vlgmr.msra.gmra.mxu1 %vm87_vm0, %v1421_v30 }
 0xded   :  { %1760 = vmatpush1.bf16.msra.mxu1 %v2304_v18  ;;  %1783 = vmatprep.mubr.bf16.mxu1 %v2124_v1 }
 0xdee   :  { %1761 = vmatprep.subr.bf16.mxu1 %v2310_v19 }
 0xdf1   :  { %1762 = vmatpush1.bf16.msra.mxu1 %v2319_v20 }
 0xdf2   :  { %1763 = vmatprep.subr.bf16.mxu1 %v2326_v21 }
 0xdf5   :  { %1764 = vmatpush1.bf16.msra.mxu1 %v2335_v22 }
 0xdf6   :  { %1765 = vmatprep.subr.bf16.mxu1 %v2341_v23 }
 0xdf9   :  { %1766 = vmatpush1.bf16.msra.mxu1 %v2349_v24 }
 0xeac   :  { %v1459_v31 = vpop.f32.mrf.mxu1 }
 0xead   :  { %v1467_v45 = vadd.f32 %v1466_v44, %v1459_v31 }
 0xeae   :  { %v1461_v18 = vpop.f32.mrf.mxu1 }
 0xeaf   :  { %2076 = vtanh.f32 %v1467_v45  ;;  %v1472_v1 = vadd.f32 %v1470_v46, %v1461_v18  ;;  %v1954_v22 = vmul.f32 -1.442695, %v1467_v45 }
 0xeb0   :  { %v1463_v48 = vpop.f32.mrf.mxu1 }
 0xeb1   :  { %2078 = vtanh.f32 %v1472_v1  ;;  %v1955_v23 = vmul.f32 -1.442695, %v1472_v1 }
 0xeb2   :  { %v1464_v19 = vpop.f32.mrf.mxu1  ;;  %2080 = vpow2.f32 %v1954_v22 }
 0xeb3   :  { %2082 = vpow2.f32 %v1955_v23 }
 0xebc   :  { %v2077_v20 = vpop.eup %2076 }
 0xebd   :  { %1482 = vrot.lane.b32.xlu0 %v2077_v20, %s2125_s2 }
 0xebe   :  { %v2079_v21 = vpop.eup %2078 }
 0xebf   :  { %1506 = vrot.lane.b32.xlu1 %v2079_v21, %s2125_s2  ;;  %v2081_v24 = vpop.eup %2080 }
 0xec0   :  { %v2083_v49 = vpop.eup %2082  ;;  %v1476_v51 = vadd.f32 1.0, %v2081_v24 }
 0xec1   :  { %v1500_v52 = vadd.f32 1.0, %v2083_v49 }
 0xec2   :  { %2084 = vrcp.f32 %v1476_v51 }
 0xec3   :  { %2086 = vrcp.f32 %v1500_v52 }
 0xecf   :  { %v2085_v53 = vpop.eup %2084 }
 0xed0   :  { %v2087_v56 = vpop.eup %2086  ;;  %v1480_v61 = vmul.f32 %v2085_v53, %v2520_v16 }
 0xed1   :  { %v1504_v0 = vmul.f32 %v2087_v56, %v2524_v27  ;;  %v1631_v27 = vld [vmem:[#allocation2 + $0x4] sm:$0xf] }
 0xed2   :  { %v1633_v34 = vrot.slane %v1631_v27, 2 }
 0xf2f   :  { %v1483_v54 = vpop.permute.xlu0 %1482 }
 0xf30   :  { %v1485_v55 = vmul.f32 %v2085_v53, %v1483_v54 }
 0xf31   :  { %v1507_v58 = vpop.permute.xlu1 %1506 }
 0xf32   :  { %1487 = vrot.lane.b32.xlu0 %v1485_v55, %s2126_s9  ;;  %v1509_v59 = vmul.f32 %v2087_v56, %v1507_v58 }
 0xf34   :  { %1511 = vrot.lane.b32.xlu1 %v1509_v59, %s2126_s9 }
 0xfa4   :  { %v1488_v62 = vpop.permute.xlu0 %1487 }
 0xfa5   :  { %v1490_v63 = vadd.f32 %v1488_v62, %v1480_v61 }
 0xfa6   :  { %v1512_v2 = vpop.permute.xlu1 %1511 }
 0xfa7   :  { %2088 = vtanh.f32 %v1490_v63  ;;  %v1514_v3 = vadd.f32 %v1512_v2, %v1504_v0 }
 0xfa9   :  { %2090 = vtanh.f32 %v1514_v3 }
 0xfb4   :  { %v2089_v4 = vpop.eup %2088 }
 0xfb5   :  { %1493 = vrot.lane.b32.xlu0 %v2089_v4, %s2125_s2 }
 0xfb6   :  { %v2091_v6 = vpop.eup %2090 }
 0xfb7   :  { %1517 = vrot.lane.b32.xlu1 %v2091_v6, %s2125_s2  ;;  %v1794_v6 = vld [vmem:[#allocation2] sm:$0xf] }
0x1027   :  { %v1494_v8 = vpop.permute.xlu0 %1493 }
0x1028   :  { %v2557_v9 = vmul.f32 %v2085_v53, %v1494_v8 }
0x1029   :  { %v1518_v11 = vpop.permute.xlu1 %1517 }
0x102a   :  { %v1568_v15 = vrot.slane %v2557_v9, %v2388_v5  ;;  %v2561_v12 = vmul.f32 %v2087_v56, %v1518_v11 }
0x102c   :  { %1569 = vrot.lane.b32.xlu0 %v1568_v15, %s2126_s9  ;;  %v1579_v13 = vrot.slane %v2561_v12, %v2388_v5  ;;  %v1792_v15 = vld [vmem:[#allocation2 + $0x1c] sm:$0xf] }
0x102e   :  { %1580 = vrot.lane.b32.xlu1 %v1579_v13, %s2125_s2  ;;  %v1796_v13 = vrot.slane %v1794_v6, 2  ;;  %v1378_v6 = vpack.c.bf16 %v2533_v36, %v2533_v36 }
0x109e   :  { %v1570_v14 = vpop.permute.xlu0 %1569 }
0x10a0   :  { %v1581_v16 = vpop.permute.xlu1 %1580 }
0x10a1   :  { %v1583_v17 = vsel %vm761_vm1, %v1570_v14, %v1581_v16 }
0x10a2   :  { %v1584_v25 = vpack.c.bf16 %v1583_v17, %v1583_v17 }
0x10a4   :  { %1958 = vmatmul.mubr.msk.bf16.vlgmr.msra.gmra.mxu0 %vm87_vm0, %v1584_v25 }
0x1164   :  { %v1622_v28 = vpop.f32.mrf.mxu0 }
0x1165   :  { %v1630_v32 = vadd.f32 %v1629_v29, %v1622_v28 }
0x1166   :  { %v1624_v35 = vpop.f32.mrf.mxu0 }
0x1167   :  { %2092 = vtanh.f32 %v1630_v32  ;;  %v1635_v37 = vadd.f32 %v1633_v34, %v1624_v35  ;;  %v1959_v43 = vmul.f32 -1.442695, %v1630_v32 }
0x1168   :  { %v1626_v38 = vpop.f32.mrf.mxu0 }
0x1169   :  { %2094 = vtanh.f32 %v1635_v37  ;;  %v1960_v31 = vmul.f32 -1.442695, %v1635_v37 }
0x116a   :  { %v1627_v39 = vpop.f32.mrf.mxu0  ;;  %2096 = vpow2.f32 %v1959_v43 }
0x116b   :  { %2098 = vpow2.f32 %v1960_v31 }
0x1174   :  { %v2093_v41 = vpop.eup %2092 }
0x1175   :  { %1645 = vrot.lane.b32.xlu0 %v2093_v41, %s2125_s2 }
0x1176   :  { %v2095_v30 = vpop.eup %2094 }
0x1177   :  { %1669 = vrot.lane.b32.xlu1 %v2095_v30, %s2125_s2  ;;  %v2097_v44 = vpop.eup %2096 }
0x1178   :  { %v2099_v45 = vpop.eup %2098  ;;  %v1639_v46 = vadd.f32 1.0, %v2097_v44 }
0x1179   :  { %v1663_v18 = vadd.f32 1.0, %v2099_v45 }
0x117a   :  { %2100 = vrcp.f32 %v1639_v46 }
0x117b   :  { %2102 = vrcp.f32 %v1663_v18 }
0x1187   :  { %v2101_v1 = vpop.eup %2100 }
0x1188   :  { %v2103_v20 = vpop.eup %2102  ;;  %v1643_v23 = vmul.f32 %v2101_v1, %v1490_v63 }
0x1189   :  { %v1667_v51 = vmul.f32 %v2103_v20, %v1514_v3 }
0x11e7   :  { %v1646_v48 = vpop.permute.xlu0 %1645 }
0x11e8   :  { %v1648_v19 = vmul.f32 %v2101_v1, %v1646_v48 }
0x11e9   :  { %v1670_v21 = vpop.permute.xlu1 %1669 }
0x11ea   :  { %1650 = vrot.lane.b32.xlu0 %v1648_v19, %s2126_s9  ;;  %v1672_v22 = vmul.f32 %v2103_v20, %v1670_v21 }
0x11ec   :  { %1674 = vrot.lane.b32.xlu1 %v1672_v22, %s2126_s9 }
0x125c   :  { %v1651_v24 = vpop.permute.xlu0 %1650 }
0x125d   :  { %v1653_v49 = vadd.f32 %v1651_v24, %v1643_v23  ;;  %v696_v23 = vpack.c.bf16 %v2390_v7, %v2390_v7  ;;  %v717_v24 = vpack.c.bf16 %v2394_v10, %v2394_v10  ;;  %v1028_v7 = vpack.c.bf16 %v2460_v47, %v2460_v47 }
0x125e   :  { %v1675_v52 = vpop.permute.xlu1 %1674 }
0x125f   :  { %2104 = vtanh.f32 %v1653_v49  ;;  %v1677_v53 = vadd.f32 %v1675_v52, %v1667_v51  ;;  %v863_v51 = vpack.c.bf16 %v2425_v57, %v2425_v57 }
0x1261   :  { %2106 = vtanh.f32 %v1677_v53 }
0x126c   :  { %v2105_v54 = vpop.eup %2104 }
0x126d   :  { %1656 = vrot.lane.b32.xlu0 %v2105_v54, %s2125_s2 }
0x126e   :  { %v2107_v55 = vpop.eup %2106 }
0x126f   :  { %1680 = vrot.lane.b32.xlu1 %v2107_v55, %s2125_s2 }
0x12df   :  { %v1657_v56 = vpop.permute.xlu0 %1656 }
0x12e0   :  { %v2575_v58 = vmul.f32 %v2101_v1, %v1657_v56  ;;  %v2128_v1 = vmov 1966171168   ;;  %v1049_v56 = vpack.c.bf16 %v2464_v50, %v2464_v50 }
0x12e1   :  { %v1681_v61 = vpop.permute.xlu1 %1680  ;;  %v699_v48 = vunpack.c.l.s4 %v2128_v1 }
0x12e2   :  { %v1731_v59 = vrot.slane %v2575_v58, %v2388_v5  ;;  %v2579_v62 = vmul.f32 %v2103_v20, %v1681_v61  ;;  %v1193_v61 = vpack.c.bf16 %v2495_v40, %v2495_v40 }
0x12e3   :  { %v700_v21 = vunpack.c.0.s8 %v699_v48 }
0x12e4   :  { %1732 = vrot.lane.b32.xlu0 %v1731_v59, %s2126_s9  ;;  %v1742_v63 = vrot.slane %v2579_v62, %v2388_v5 }
0x12e5   :  { %v2600_v22 = vsub.s32 %v700_v21, %v2368_v26  ;;  %v884_v26 = vpack.c.bf16 %v2429_v60, %v2429_v60 }
0x12e6   :  { %1743 = vrot.lane.b32.xlu1 %v1742_v63, %s2125_s2 }
0x12e7   :  { %v871_v55 = vrot.slane %v863_v51, %v2600_v22  ;;  %v892_v57 = vrot.slane %v884_v26, %v2600_v22  ;;  %v1036_v60 = vrot.slane %v1028_v7, %v2600_v22  ;;  %v1057_v63 = vrot.slane %v1049_v56, %v2600_v22 }
0x12e9   :  { %v878_v47 = vrot.slane %v871_v55, %v2600_v22  ;;  %v899_v50 = vrot.slane %v892_v57, %v2600_v22  ;;  %v1043_v40 = vrot.slane %v1036_v60, %v2600_v22 }
0x1356   :  { %v1733_v0 = vpop.permute.xlu0 %1732 }
0x1358   :  { %v1744_v2 = vpop.permute.xlu1 %1743 }
0x1359   :  { %v1746_v3 = vsel %vm761_vm1, %v1733_v0, %v1744_v2  ;;  %v1214_v0 = vpack.c.bf16 %v2499_v42, %v2499_v42  ;;  %v1201_v2 = vrot.slane %v1193_v61, %v2600_v22  ;;  %v1064_v42 = vrot.slane %v1057_v63, %v2600_v22 }
0x135a   :  { %v1747_v4 = vpack.c.bf16 %v1746_v3, %v1746_v3  ;;  %v1358_v3 = vpack.c.bf16 %v2529_v33, %v2529_v33 }
0x135b   :  { %v1208_v33 = vrot.slane %v1201_v2, %v2600_v22 }
0x135c   :  { %1963 = vmatmul.mubr.msk.bf16.vlgmr.msra.gmra.mxu1 %vm87_vm0, %v1747_v4  ;;  %v1222_v4 = vrot.slane %v1214_v0, %v2600_v22 }
0x135e   :  { %v1229_v36 = vrot.slane %v1222_v4, %v2600_v22 }
0x141c   :  { %v1785_v8 = vpop.f32.mrf.mxu1 }
0x141d   :  { %v1793_v11 = vadd.f32 %v1792_v15, %v1785_v8  ;;  %v1366_v8 = vrot.slane %v1358_v3, %v2600_v22  ;;  %v1521_v15 = vpack.c.bf16 %v2557_v9, %v2557_v9 }
0x141e   :  { %v1787_v14 = vpop.f32.mrf.mxu1 }
0x141f   :  { %2108 = vtanh.f32 %v1793_v11  ;;  %v1798_v16 = vadd.f32 %v1796_v13, %v1787_v14  ;;  %v1964_v28 = vmul.f32 -1.442695, %v1793_v11  ;;  %v1386_v11 = vrot.slane %v1378_v6, %v2600_v22 }
0x1420   :  { %v1789_v17 = vpop.f32.mrf.mxu1  ;;  %v1541_v13 = vpack.c.bf16 %v2561_v12, %v2561_v12  ;;  %v1529_v14 = vrot.slane %v1521_v15, %v2600_v22  ;;  %v1373_v9 = vrot.slane %v1366_v8, %v2600_v22 }
0x1421   :  { %2110 = vtanh.f32 %v1798_v16  ;;  %v1965_v29 = vmul.f32 -1.442695, %v1798_v16  ;;  %v1684_v16 = vpack.c.bf16 %v2575_v58, %v2575_v58  ;;  %v1393_v12 = vrot.slane %v1386_v11, %v2600_v22 }
0x1422   :  { %v1790_v5 = vpop.f32.mrf.mxu1  ;;  %2112 = vpow2.f32 %v1964_v28  ;;  %v1549_v17 = vrot.slane %v1541_v13, %v2600_v22 }
0x1423   :  { %2114 = vpow2.f32 %v1965_v29  ;;  %v1704_v5 = vpack.c.bf16 %v2579_v62, %v2579_v62 }
0x1424   :  { %v1556_v28 = vrot.slane %v1549_v17, %v2600_v22 }
0x1425   :  { %v1712_v58 = vrot.slane %v1704_v5, %v2600_v22 }
0x1427   :  { %v1719_v62 = vrot.slane %v1712_v58, %v2600_v22 }
0x142c   :  { %v2109_v25 = vpop.eup %2108 }
0x142d   :  { %1808 = vrot.lane.b32.xlu0 %v2109_v25, %s2125_s2  ;;  %v1692_v25 = vrot.slane %v1684_v16, %v2600_v22 }
0x142e   :  { %v2111_v27 = vpop.eup %2110 }
0x142f   :  { %1832 = vrot.lane.b32.xlu1 %v2111_v27, %s2125_s2  ;;  %v2113_v32 = vpop.eup %2112  ;;  %v1536_v27 = vrot.slane %v1529_v14, %v2600_v22  ;;  %v1699_v29 = vrot.slane %v1692_v25, %v2600_v22 }
0x1430   :  { %v2115_v34 = vpop.eup %2114  ;;  %v1802_v35 = vadd.f32 1.0, %v2113_v32 }
0x1431   :  { %v1826_v37 = vadd.f32 1.0, %v2115_v34 }
0x1432   :  { %2116 = vrcp.f32 %v1802_v35 }
0x1433   :  { %2118 = vrcp.f32 %v1826_v37 }
0x143f   :  { %v2589_v38 = vpop.eup %2116 }
0x1440   :  { %v2592_v30 = vpop.eup %2118  ;;  %v1806_v44 = vmul.f32 %v2589_v38, %v1653_v49  ;;  %v704_v49 = vrot.slane %v696_v23, %v2600_v22 }
0x1441   :  { %v1830_v18 = vmul.f32 %v2592_v30, %v1677_v53  ;;  %v725_v53 = vrot.slane %v717_v24, %v2600_v22 }
0x1442   :  { %v711_v10 = vrot.slane %v704_v49, %v2600_v22 }
0x1443   :  { %v732_v59 = vrot.slane %v725_v53, %v2600_v22 }
0x149f   :  { %v1809_v39 = vpop.permute.xlu0 %1808 }
0x14a0   :  { %v1811_v41 = vmul.f32 %v2589_v38, %v1809_v39 }
0x14a1   :  { %v1833_v43 = vpop.permute.xlu1 %1832 }
0x14a2   :  { %1813 = vrot.lane.b32.xlu0 %v1811_v41, %s2126_s9  ;;  %v1835_v31 = vmul.f32 %v2592_v30, %v1833_v43 }
0x14a4   :  { %1837 = vrot.lane.b32.xlu1 %v1835_v31, %s2126_s9 }
0x1514   :  { %v1814_v45 = vpop.permute.xlu0 %1813 }
0x1515   :  { %v1816_v46 = vadd.f32 %v1814_v45, %v1806_v44 }
0x1516   :  { %v1838_v19 = vpop.permute.xlu1 %1837 }
0x1517   :  { %2120 = vtanh.f32 %v1816_v46  ;;  %v1840_v20 = vadd.f32 %v1838_v19, %v1830_v18 }
0x1519   :  { %2122 = vtanh.f32 %v1840_v20 }
0x1524   :  { %v2121_v52 = vpop.eup %2120 }
0x1525   :  { %1819 = vrot.lane.b32.xlu0 %v2121_v52, %s2125_s2 }
0x1526   :  { %v2123_v54 = vpop.eup %2122 }
0x1527   :  { %1843 = vrot.lane.b32.xlu1 %v2123_v54, %s2125_s2 }
0x1529   :  { %712 = vrot.lane.b32.xlu0 %v711_v10, %s2126_s9 }
0x152b   :  { %733 = vrot.lane.b32.xlu1 %v732_v59, %s2125_s2 }
0x152d   :  { %879 = vrot.lane.b32.xlu0 %v878_v47, %s2126_s9 }
0x152f   :  { %900 = vrot.lane.b32.xlu1 %v899_v50, %s2125_s2 }
0x1531   :  { %1044 = vrot.lane.b32.xlu0 %v1043_v40, %s2126_s9 }
0x1533   :  { %1065 = vrot.lane.b32.xlu1 %v1064_v42, %s2125_s2 }
0x1535   :  { %1209 = vrot.lane.b32.xlu0 %v1208_v33, %s2126_s9 }
0x1537   :  { %1230 = vrot.lane.b32.xlu1 %v1229_v36, %s2125_s2 }
0x1539   :  { %1374 = vrot.lane.b32.xlu0 %v1373_v9, %s2126_s9 }
0x153b   :  { %1394 = vrot.lane.b32.xlu1 %v1393_v12, %s2125_s2 }
0x153d   :  { %1537 = vrot.lane.b32.xlu0 %v1536_v27, %s2126_s9 }
0x153f   :  { %1557 = vrot.lane.b32.xlu1 %v1556_v28, %s2125_s2 }
0x1541   :  { %1700 = vrot.lane.b32.xlu0 %v1699_v29, %s2126_s9 }
0x1543   :  { %1720 = vrot.lane.b32.xlu1 %v1719_v62, %s2125_s2 }
0x1597   :  { %v1820_v32 = vpop.permute.xlu0 %1819 }
0x1598   :  { %v1822_v34 = vmul.f32 %v2589_v38, %v1820_v32 }
0x1599   :  { %v1844_v37 = vpop.permute.xlu1 %1843 }
0x159a   :  { %v1847_v35 = vpack.c.bf16 %v1822_v34, %v1822_v34  ;;  %v1846_v39 = vmul.f32 %v2592_v30, %v1844_v37 }
0x159b   :  { %v713_v41 = vpop.permute.xlu0 %712 }
0x159c   :  { %v1855_v43 = vrot.slane %v1847_v35, %v2600_v22  ;;  %716 = vst.msk [vmem:[%s2750_s4] sm:$0x1] %vm715_vm2, %v713_v41  ;;  %v1867_v31 = vpack.c.bf16 %v1846_v39, %v1846_v39 }
0x159d   :  { %v734_v44 = vpop.permute.xlu1 %733 }
0x159e   :  { %v1862_v45 = vrot.slane %v1855_v43, %v2600_v22  ;;  %v1875_v38 = vrot.slane %v1867_v31, %v2600_v22  ;;  %1932 = vst.msk [vmem:[%s2750_s4 + $0x7] sm:$0x1] %vm737_vm3, %v734_v44 }
0x159f   :  { %v880_v30 = vpop.permute.xlu0 %879 }
0x15a0   :  { %1936 = vst.msk [vmem:[%s2750_s4 + $0x1] sm:$0x1] %vm715_vm2, %v880_v30  ;;  %1863 = vrot.lane.b32.xlu0 %v1862_v45, %s2126_s9  ;;  %v1882_v46 = vrot.slane %v1875_v38, %v2600_v22 }
0x15a1   :  { %v901_v18 = vpop.permute.xlu1 %900 }
0x15a2   :  { %1937 = vst.msk [vmem:[%s2750_s4 + $0x6] sm:$0x1] %vm737_vm3, %v901_v18  ;;  %1883 = vrot.lane.b32.xlu1 %v1882_v46, %s2125_s2 }
0x15a3   :  { %v1045_v1 = vpop.permute.xlu0 %1044 }
0x15a4   :  { %1941 = vst.msk [vmem:[%s2750_s4 + $0x2] sm:$0x1] %vm715_vm2, %v1045_v1 }
0x15a5   :  { %v1066_v48 = vpop.permute.xlu1 %1065 }
0x15a6   :  { %1942 = vst.msk [vmem:[%s2750_s4 + $0x5] sm:$0x1] %vm737_vm3, %v1066_v48 }
0x15a7   :  { %v1210_v19 = vpop.permute.xlu0 %1209 }
0x15a8   :  { %1946 = vst.msk [vmem:[%s2750_s4 + $0x3] sm:$0x1] %vm715_vm2, %v1210_v19 }
0x15a9   :  { %v1231_v20 = vpop.permute.xlu1 %1230 }
0x15aa   :  { %1947 = vst.msk [vmem:[%s2750_s4 + $0x4] sm:$0x1] %vm737_vm3, %v1231_v20 }
0x15ab   :  { %v1375_v21 = vpop.permute.xlu0 %1374 }
0x15ac   :  { %1951 = vst.msk [vmem:[%s2750_s4 + $0x4] sm:$0x1] %vm715_vm2, %v1375_v21 }
0x15ad   :  { %v1395_v22 = vpop.permute.xlu1 %1394 }
0x15ae   :  { %1952 = vst.msk [vmem:[%s2750_s4 + $0x3] sm:$0x1] %vm737_vm3, %v1395_v22 }
0x15af   :  { %v1538_v23 = vpop.permute.xlu0 %1537 }
0x15b0   :  { %1956 = vst.msk [vmem:[%s2750_s4 + $0x5] sm:$0x1] %vm715_vm2, %v1538_v23 }
0x15b1   :  { %v1558_v24 = vpop.permute.xlu1 %1557 }
0x15b2   :  { %1957 = vst.msk [vmem:[%s2750_s4 + $0x2] sm:$0x1] %vm737_vm3, %v1558_v24 }
0x15b3   :  { %v1701_v49 = vpop.permute.xlu0 %1700 }
0x15b4   :  { %1961 = vst.msk [vmem:[%s2750_s4 + $0x6] sm:$0x1] %vm715_vm2, %v1701_v49 }
0x15b5   :  { %v1721_v51 = vpop.permute.xlu1 %1720 }
0x15b6   :  { %1962 = vst.msk [vmem:[%s2750_s4 + $0x1] sm:$0x1] %vm737_vm3, %v1721_v51 }
0x1612   :  { %v1864_v52 = vpop.permute.xlu0 %1863 }
0x1613   :  { %1966 = vst.msk [vmem:[%s2750_s4 + $0x7] sm:$0x1] %vm715_vm2, %v1864_v52 }
0x1614   :  { %v1884_v53 = vpop.permute.xlu1 %1883 }
0x1615   :  { %1886 = vst.msk [vmem:[%s2750_s4] sm:$0x1] %vm737_vm3, %v1884_v53 }

</bundles_post_ra>
